<compile_context>
chip_gen: v6e
topology: v6e:2x2x1
jax: 0.10.0
libtpu: 0.0.40
codegen_flags: <defaults>
</compile_context>

<pallas_src>
import functools
import numpy as np
import jax
import jax.numpy as jnp
from jax import lax
from jax.experimental import pallas as pl
from jax.experimental.pallas import tpu as pltpu


# ------------------------------- fused kernel ------------------------------

def _fused_forward_kernel(*refs, n_heads, n_encoders, conv_ks):
    """Whole CNNTransformer forward for one batch element, fully in VMEM.

    refs = [x, (c0w,c0b),(c1w,c1b),(c2w,c2b), pe,
            12 refs per encoder layer * n_encoders,
            c3w, c3b, fc1w, fc1b, fc2w, fc2b, out]
    """
    x_ref = refs[0]
    o_ref = refs[-1]
    w = refs[1:-1]
    conv_wb = [(w[2 * i], w[2 * i + 1]) for i in range(3)]
    pe_ref = w[6]
    enc = [w[7 + 12 * l: 7 + 12 * (l + 1)] for l in range(n_encoders)]
    c3w_ref, c3b_ref, fc1w_ref, fc1b_ref, fc2w_ref, fc2b_ref = w[7 + 12 * n_encoders:]

    f32, bf16 = jnp.float32, jnp.bfloat16

    def conv_bn_relu(xa, w_ref, b_ref, K):
        # xa: (L, Cin) f32; w_ref: (K*Cin, Cout) bf16 (BN scale folded in);
        # b_ref: (1, Cout) f32.  Stride 1, 'same' padding done in-kernel.
        L, Cin = xa.shape
        pad = K // 2
        z = jnp.zeros((pad, Cin), f32)
        xp = jnp.concatenate([z, xa, z], axis=0)                       # (L+2p, Cin)
        patches = jnp.concatenate([xp[k:k + L, :] for k in range(K)], axis=1)
        y = jnp.dot(patches.astype(bf16), w_ref[...],
                    preferred_element_type=f32) + b_ref[...]
        return jnp.maximum(y, 0.0)

    def layer_norm(z, g, b):
        mu = jnp.mean(z, axis=-1, keepdims=True)
        var = jnp.mean(jnp.square(z - mu), axis=-1, keepdims=True)
        return (z - mu) * lax.rsqrt(var + 1e-5) * g + b

    # ---- conv stack (pool0..pool2 identity, stride 1) ----
    x = x_ref[0]                                                        # (L, Cin)
    for (cw_ref, cb_ref), K in zip(conv_wb, conv_ks[:3]):
        x = conv_bn_relu(x, cw_ref, cb_ref, K)

    # ---- positional encoding + transformer encoder (post-LN, eval) ----
    x = x + pe_ref[...]                                                 # (S, E)
    S, E = x.shape
    hd = E // n_heads
    inv_sqrt_hd = 1.0 / float(np.sqrt(hd))
    trans_b = (((1,), (1,)), ((), ()))                                  # A @ B^T

    for lp in enc:
        (wqkv_ref, bqkv_ref, wo_ref, bo_ref, ln1g_ref, ln1b_ref,
         w1_ref, b1_ref, w2_ref, b2_ref, ln2g_ref, ln2b_ref) = lp

        qkv = jnp.dot(x.astype(bf16), wqkv_ref[...],
                      preferred_element_type=f32) + bqkv_ref[...]       # (S, 3E)
        q = qkv[:, :E].astype(bf16)
        k = qkv[:, E:2 * E].astype(bf16)
        v = qkv[:, 2 * E:].astype(bf16)

        heads = []
        for h in range(n_heads):                                        # static unroll
            lo, hi = h * hd, (h + 1) * hd
            s = lax.dot_general(q[:, lo:hi], k[:, lo:hi], trans_b,
                                preferred_element_type=f32) * inv_sqrt_hd
            s = s - jnp.max(s, axis=-1, keepdims=True)
            e = jnp.exp(s)
            p = e * pl.reciprocal(jnp.sum(e, axis=-1, keepdims=True), approx=True)
            heads.append(jnp.dot(p.astype(bf16), v[:, lo:hi],
                                 preferred_element_type=f32))
        concat = jnp.concatenate(heads, axis=1)                         # (S, E)
        sa = jnp.dot(concat.astype(bf16), wo_ref[...],
                     preferred_element_type=f32) + bo_ref[...]

        y = layer_norm(x + sa, ln1g_ref[...], ln1b_ref[...])
        ff = jnp.maximum(jnp.dot(y.astype(bf16), w1_ref[...],
                                 preferred_element_type=f32) + b1_ref[...], 0.0)
        ff = jnp.dot(ff.astype(bf16), w2_ref[...],
                     preferred_element_type=f32) + b2_ref[...]
        x = layer_norm(y + ff, ln2g_ref[...], ln2b_ref[...])

    # ---- conv3 + AdaptiveAvgPool1d(1) + fc head (Linear+BN+ReLU, Linear) ----
    feat = conv_bn_relu(x, c3w_ref, c3b_ref, conv_ks[3])                # (S, 2*base)
    pooled = jnp.mean(feat, axis=0, keepdims=True)                      # (1, 2*base)
    h1 = jnp.maximum(jnp.dot(pooled.astype(bf16), fc1w_ref[...],
                             preferred_element_type=f32) + fc1b_ref[...], 0.0)
    out = jnp.dot(h1.astype(bf16), fc2w_ref[...],
                  preferred_element_type=f32) + fc2b_ref[...]           # (1, out_dims)
    o_ref[0] = out


# ------------------------------ wrapper / glue ------------------------------

def cnn_transformer_forward(x, age, weights, *, cfg):
    """x: (N, C, L) f32, age: (N,) f32. Returns (N, out_dims) f32 (eval mode)."""
    N, C, L = x.shape
    # use_age == 'conv': append age as a constant extra channel; go time-major.
    xt = jnp.transpose(x, (0, 2, 1))                                    # (N, L, C)
    age_ch = jnp.broadcast_to(age.reshape(N, 1, 1).astype(x.dtype), (N, L, 1))
    x_in = jnp.concatenate([xt, age_ch], axis=2)                        # (N, L, C+1)

    kernel = functools.partial(
        _fused_forward_kernel, n_heads=cfg["n_heads"],
        n_encoders=cfg["n_encoders"], conv_ks=cfg["conv_ks"])

    def full_spec(a):
        nd = a.ndim
        return pl.BlockSpec(a.shape, lambda n, _nd=nd: (0,) * _nd)

    in_specs = ([pl.BlockSpec((1, L, C + 1), lambda n: (n, 0, 0))]
                + [full_spec(a) for a in weights])
    out = pl.pallas_call(
        kernel,
        out_shape=jax.ShapeDtypeStruct((N, 1, cfg["out_dims"]), jnp.float32),
        grid=(N,),
        in_specs=in_specs,
        out_specs=pl.BlockSpec((1, 1, cfg["out_dims"]), lambda n: (n, 0, 0)),
        compiler_params=pltpu.CompilerParams(
            dimension_semantics=("parallel",)),      # batch axis -> both TCs on v7x
    )(x_in, *weights)
    return out[:, 0, :]


# ------------------------------ params / prep -------------------------------

def make_positional_encoding(d_model, max_len=1024):
    position = np.arange(max_len, dtype=np.float32)[:, None]
    div_term = np.exp(np.arange(0, d_model, 2, dtype=np.float32)
                      * (-np.log(10000.0) / d_model))
    pe = np.zeros((max_len, d_model), np.float32)
    pe[:, 0::2] = np.sin(position * div_term)
    pe[:, 1::2] = np.cos(position * div_term)
    return jnp.asarray(pe)


def init_params(key, *, in_ch=5, base=16, out_dims=3, n_encoders=2):
    """PyTorch-layout parameters (random; eval-mode BN stats after reset)."""
    E = 4 * base
    d_ff = 16 * base
    keys = iter(jax.random.split(key, 128))

    def w(shape, scale=0.05):
        return scale * jax.random.normal(next(keys), shape, jnp.float32)

    def bn(c):  # (gamma, beta, running_mean, running_var) after reset_parameters()
        return (jnp.ones((c,), jnp.float32), jnp.zeros((c,), jnp.float32),
                jnp.zeros((c,), jnp.float32), jnp.ones((c,), jnp.float32))

    p = {}
    p["conv0_w"] = w((base, in_ch, 21));       p["bn0"] = bn(base)
    p["conv1_w"] = w((2 * base, base, 9));     p["bn1"] = bn(2 * base)
    p["conv2_w"] = w((4 * base, 2 * base, 9)); p["bn2"] = bn(4 * base)
    p["pe"] = make_positional_encoding(E)

    layers = []
    for _ in range(n_encoders):
        layers.append(dict(
            wqkv=w((3 * E, E)), bqkv=w((1, 3 * E), 0.01),
            wo=w((E, E)), bo=w((1, E), 0.01),
            ln1g=jnp.ones((1, E), jnp.float32), ln1b=jnp.zeros((1, E), jnp.float32),
            w1=w((d_ff, E)), b1=w((1, d_ff), 0.01),
            w2=w((E, d_ff)), b2=w((1, E), 0.01),
            ln2g=jnp.ones((1, E), jnp.float32), ln2b=jnp.zeros((1, E), jnp.float32),
        ))
    p["encoder_layers"] = layers

    p["conv3_w"] = w((2 * base, 4 * base, 9)); p["bn3"] = bn(2 * base)

    # fc_stages = 2: Linear(2*base->base, bias=False)+Dropout+BN+ReLU, Linear(base->out)
    p["fc1_w"] = w((base, 2 * base))
    p["fc_bn"] = bn(base)
    p["fc2_w"] = w((out_dims, base))
    p["fc2_b"] = w((1, out_dims), 0.01)
    return p


def prepare_params(p, *, seq_length, n_heads, eps=1e-5):
    """Host-side one-time prep: fold eval-BN, pre-transpose, cast MXU weights to bf16."""
    bf16, f32 = jnp.bfloat16, jnp.float32

    def fold_conv(wc, bnp):
        g, b, m, v = bnp
        s = g / jnp.sqrt(v + eps)                                       # (Cout,)
        cout, cin, K = wc.shape
        # patches[l, k*Cin+cin] = x_pad[l+k, cin]  ->  weight rows ordered (k, cin)
        w_t = jnp.transpose(wc * s[:, None, None], (2, 1, 0)).reshape(K * cin, cout)
        bias = (b - m * s).reshape(1, cout)
        return [w_t.astype(bf16), bias.astype(f32)]

    args = []
    args += fold_conv(p["conv0_w"], p["bn0"])
    args += fold_conv(p["conv1_w"], p["bn1"])
    args += fold_conv(p["conv2_w"], p["bn2"])
    args.append(p["pe"][:seq_length].astype(f32))                       # (S, E)

    for lp in p["encoder_layers"]:
        args += [
            lp["wqkv"].T.astype(bf16), lp["bqkv"].astype(f32),
            lp["wo"].T.astype(bf16),   lp["bo"].astype(f32),
            lp["ln1g"].astype(f32),    lp["ln1b"].astype(f32),
            lp["w1"].T.astype(bf16),   lp["b1"].astype(f32),
            lp["w2"].T.astype(bf16),   lp["b2"].astype(f32),
            lp["ln2g"].astype(f32),    lp["ln2b"].astype(f32),
        ]

    args += fold_conv(p["conv3_w"], p["bn3"])

    g, b, m, v = p["fc_bn"]
    s = g / jnp.sqrt(v + eps)
    args += [
        (p["fc1_w"] * s[:, None]).T.astype(bf16),                       # (2*base, base)
        (b - m * s).reshape(1, -1).astype(f32),
        p["fc2_w"].T.astype(bf16),                                      # (base, out)
        p["fc2_b"].astype(f32),
    ]

    cfg = dict(
        n_heads=n_heads,
        n_encoders=len(p["encoder_layers"]),
        conv_ks=(p["conv0_w"].shape[2], p["conv1_w"].shape[2],
                 p["conv2_w"].shape[2], p["conv3_w"].shape[2]),
        out_dims=p["fc2_w"].shape[0],
    )
    return args, cfg


if __name__ == "__main__":
    key = jax.random.PRNGKey(0)
    kx, ka, kp = jax.random.split(key, 3)

    N, C, L = 2, 4, 32          # batch, EEG channels, sequence length (in [32, 48])
    x = jax.random.normal(kx, (N, C, L), jnp.float32)
    age = jax.random.uniform(ka, (N,), jnp.float32)

    params = init_params(kp, in_ch=C + 1, base=16, out_dims=3, n_encoders=2)
    weights, cfg = prepare_params(params, seq_length=L, n_heads=4)

    fwd = jax.jit(functools.partial(cnn_transformer_forward, cfg=cfg))
    out = jax.block_until_ready(fwd(x, age, weights))

    assert out.shape == (N, 3), out.shape
    assert bool(jnp.all(jnp.isfinite(out)))
    print("KERNEL_OK")
</pallas_src>

<mosaic_0001>
module attributes {stable_mosaic.version = 11 : i64} {
  func.func @_fused_forward_kernel(%arg0: i32, %arg1: memref<1x32x5xf32, #tpu.memory_space<vmem>>, %arg2: memref<105x16xbf16, #tpu.memory_space<vmem>>, %arg3: memref<1x16xf32, #tpu.memory_space<vmem>>, %arg4: memref<144x32xbf16, #tpu.memory_space<vmem>>, %arg5: memref<1x32xf32, #tpu.memory_space<vmem>>, %arg6: memref<288x64xbf16, #tpu.memory_space<vmem>>, %arg7: memref<1x64xf32, #tpu.memory_space<vmem>>, %arg8: memref<32x64xf32, #tpu.memory_space<vmem>>, %arg9: memref<64x192xbf16, #tpu.memory_space<vmem>>, %arg10: memref<1x192xf32, #tpu.memory_space<vmem>>, %arg11: memref<64x64xbf16, #tpu.memory_space<vmem>>, %arg12: memref<1x64xf32, #tpu.memory_space<vmem>>, %arg13: memref<1x64xf32, #tpu.memory_space<vmem>>, %arg14: memref<1x64xf32, #tpu.memory_space<vmem>>, %arg15: memref<64x256xbf16, #tpu.memory_space<vmem>>, %arg16: memref<1x256xf32, #tpu.memory_space<vmem>>, %arg17: memref<256x64xbf16, #tpu.memory_space<vmem>>, %arg18: memref<1x64xf32, #tpu.memory_space<vmem>>, %arg19: memref<1x64xf32, #tpu.memory_space<vmem>>, %arg20: memref<1x64xf32, #tpu.memory_space<vmem>>, %arg21: memref<64x192xbf16, #tpu.memory_space<vmem>>, %arg22: memref<1x192xf32, #tpu.memory_space<vmem>>, %arg23: memref<64x64xbf16, #tpu.memory_space<vmem>>, %arg24: memref<1x64xf32, #tpu.memory_space<vmem>>, %arg25: memref<1x64xf32, #tpu.memory_space<vmem>>, %arg26: memref<1x64xf32, #tpu.memory_space<vmem>>, %arg27: memref<64x256xbf16, #tpu.memory_space<vmem>>, %arg28: memref<1x256xf32, #tpu.memory_space<vmem>>, %arg29: memref<256x64xbf16, #tpu.memory_space<vmem>>, %arg30: memref<1x64xf32, #tpu.memory_space<vmem>>, %arg31: memref<1x64xf32, #tpu.memory_space<vmem>>, %arg32: memref<1x64xf32, #tpu.memory_space<vmem>>, %arg33: memref<576x32xbf16, #tpu.memory_space<vmem>>, %arg34: memref<1x32xf32, #tpu.memory_space<vmem>>, %arg35: memref<32x16xbf16, #tpu.memory_space<vmem>>, %arg36: memref<1x16xf32, #tpu.memory_space<vmem>>, %arg37: memref<16x3xbf16, #tpu.memory_space<vmem>>, %arg38: memref<1x3xf32, #tpu.memory_space<vmem>>, %arg39: memref<1x1x3xf32, #tpu.memory_space<vmem>>) attributes {dimension_semantics = [#tpu.dimension_semantics<parallel>], iteration_bounds = array<i64: 2>, scalar_prefetch = 0 : i64, scratch_operands = 0 : i64, tpu.core_type = #tpu.core_type<tc>, window_params = [{transform_indices = @transform_0, window_bounds = array<i64: 1, 32, 5>}, {pipeline_mode = #tpu.pipeline_mode<synchronous>, transform_indices = @transform_1, window_bounds = array<i64: 105, 16>}, {pipeline_mode = #tpu.pipeline_mode<synchronous>, transform_indices = @transform_2, window_bounds = array<i64: 1, 16>}, {pipeline_mode = #tpu.pipeline_mode<synchronous>, transform_indices = @transform_3, window_bounds = array<i64: 144, 32>}, {pipeline_mode = #tpu.pipeline_mode<synchronous>, transform_indices = @transform_4, window_bounds = array<i64: 1, 32>}, {pipeline_mode = #tpu.pipeline_mode<synchronous>, transform_indices = @transform_5, window_bounds = array<i64: 288, 64>}, {pipeline_mode = #tpu.pipeline_mode<synchronous>, transform_indices = @transform_6, window_bounds = array<i64: 1, 64>}, {pipeline_mode = #tpu.pipeline_mode<synchronous>, transform_indices = @transform_7, window_bounds = array<i64: 32, 64>}, {pipeline_mode = #tpu.pipeline_mode<synchronous>, transform_indices = @transform_8, window_bounds = array<i64: 64, 192>}, {pipeline_mode = #tpu.pipeline_mode<synchronous>, transform_indices = @transform_9, window_bounds = array<i64: 1, 192>}, {pipeline_mode = #tpu.pipeline_mode<synchronous>, transform_indices = @transform_10, window_bounds = array<i64: 64, 64>}, {pipeline_mode = #tpu.pipeline_mode<synchronous>, transform_indices = @transform_11, window_bounds = array<i64: 1, 64>}, {pipeline_mode = #tpu.pipeline_mode<synchronous>, transform_indices = @transform_12, window_bounds = array<i64: 1, 64>}, {pipeline_mode = #tpu.pipeline_mode<synchronous>, transform_indices = @transform_13, window_bounds = array<i64: 1, 64>}, {pipeline_mode = #tpu.pipeline_mode<synchronous>, transform_indices = @transform_14, window_bounds = array<i64: 64, 256>}, {pipeline_mode = #tpu.pipeline_mode<synchronous>, transform_indices = @transform_15, window_bounds = array<i64: 1, 256>}, {pipeline_mode = #tpu.pipeline_mode<synchronous>, transform_indices = @transform_16, window_bounds = array<i64: 256, 64>}, {pipeline_mode = #tpu.pipeline_mode<synchronous>, transform_indices = @transform_17, window_bounds = array<i64: 1, 64>}, {pipeline_mode = #tpu.pipeline_mode<synchronous>, transform_indices = @transform_18, window_bounds = array<i64: 1, 64>}, {pipeline_mode = #tpu.pipeline_mode<synchronous>, transform_indices = @transform_19, window_bounds = array<i64: 1, 64>}, {pipeline_mode = #tpu.pipeline_mode<synchronous>, transform_indices = @transform_20, window_bounds = array<i64: 64, 192>}, {pipeline_mode = #tpu.pipeline_mode<synchronous>, transform_indices = @transform_21, window_bounds = array<i64: 1, 192>}, {pipeline_mode = #tpu.pipeline_mode<synchronous>, transform_indices = @transform_22, window_bounds = array<i64: 64, 64>}, {pipeline_mode = #tpu.pipeline_mode<synchronous>, transform_indices = @transform_23, window_bounds = array<i64: 1, 64>}, {pipeline_mode = #tpu.pipeline_mode<synchronous>, transform_indices = @transform_24, window_bounds = array<i64: 1, 64>}, {pipeline_mode = #tpu.pipeline_mode<synchronous>, transform_indices = @transform_25, window_bounds = array<i64: 1, 64>}, {pipeline_mode = #tpu.pipeline_mode<synchronous>, transform_indices = @transform_26, window_bounds = array<i64: 64, 256>}, {pipeline_mode = #tpu.pipeline_mode<synchronous>, transform_indices = @transform_27, window_bounds = array<i64: 1, 256>}, {pipeline_mode = #tpu.pipeline_mode<synchronous>, transform_indices = @transform_28, window_bounds = array<i64: 256, 64>}, {pipeline_mode = #tpu.pipeline_mode<synchronous>, transform_indices = @transform_29, window_bounds = array<i64: 1, 64>}, {pipeline_mode = #tpu.pipeline_mode<synchronous>, transform_indices = @transform_30, window_bounds = array<i64: 1, 64>}, {pipeline_mode = #tpu.pipeline_mode<synchronous>, transform_indices = @transform_31, window_bounds = array<i64: 1, 64>}, {pipeline_mode = #tpu.pipeline_mode<synchronous>, transform_indices = @transform_32, window_bounds = array<i64: 576, 32>}, {pipeline_mode = #tpu.pipeline_mode<synchronous>, transform_indices = @transform_33, window_bounds = array<i64: 1, 32>}, {pipeline_mode = #tpu.pipeline_mode<synchronous>, transform_indices = @transform_34, window_bounds = array<i64: 32, 16>}, {pipeline_mode = #tpu.pipeline_mode<synchronous>, transform_indices = @transform_35, window_bounds = array<i64: 1, 16>}, {pipeline_mode = #tpu.pipeline_mode<synchronous>, transform_indices = @transform_36, window_bounds = array<i64: 16, 3>}, {pipeline_mode = #tpu.pipeline_mode<synchronous>, transform_indices = @transform_37, window_bounds = array<i64: 1, 3>}, {transform_indices = @transform_38, window_bounds = array<i64: 1, 1, 3>}]} {
    %c0 = arith.constant 0 : index
    %c0_0 = arith.constant 0 : index
    %c0_1 = arith.constant 0 : index
    %0 = vector.load %arg1[%c0, %c0_0, %c0_1] : memref<1x32x5xf32, #tpu.memory_space<vmem>>, vector<1x32x5xf32>
    %1 = vector.shape_cast %0 : vector<1x32x5xf32> to vector<32x5xf32>
    %cst = arith.constant 0.000000e+00 : f32
    %2 = vector.broadcast %cst : f32 to vector<10x5xf32>
    %3 = tpu.concatenate %2, %1, %2 in 0 : vector<10x5xf32>, vector<32x5xf32>, vector<10x5xf32> -> vector<52x5xf32>
    %4 = vector.extract_strided_slice %3 {offsets = [0, 0], sizes = [32, 5], strides = [1, 1]} : vector<52x5xf32> to vector<32x5xf32>
    %5 = vector.extract_strided_slice %3 {offsets = [1, 0], sizes = [32, 5], strides = [1, 1]} : vector<52x5xf32> to vector<32x5xf32>
    %6 = vector.extract_strided_slice %3 {offsets = [2, 0], sizes = [32, 5], strides = [1, 1]} : vector<52x5xf32> to vector<32x5xf32>
    %7 = vector.extract_strided_slice %3 {offsets = [3, 0], sizes = [32, 5], strides = [1, 1]} : vector<52x5xf32> to vector<32x5xf32>
    %8 = vector.extract_strided_slice %3 {offsets = [4, 0], sizes = [32, 5], strides = [1, 1]} : vector<52x5xf32> to vector<32x5xf32>
    %9 = vector.extract_strided_slice %3 {offsets = [5, 0], sizes = [32, 5], strides = [1, 1]} : vector<52x5xf32> to vector<32x5xf32>
    %10 = vector.extract_strided_slice %3 {offsets = [6, 0], sizes = [32, 5], strides = [1, 1]} : vector<52x5xf32> to vector<32x5xf32>
    %11 = vector.extract_strided_slice %3 {offsets = [7, 0], sizes = [32, 5], strides = [1, 1]} : vector<52x5xf32> to vector<32x5xf32>
    %12 = vector.extract_strided_slice %3 {offsets = [8, 0], sizes = [32, 5], strides = [1, 1]} : vector<52x5xf32> to vector<32x5xf32>
    %13 = vector.extract_strided_slice %3 {offsets = [9, 0], sizes = [32, 5], strides = [1, 1]} : vector<52x5xf32> to vector<32x5xf32>
    %14 = vector.extract_strided_slice %3 {offsets = [10, 0], sizes = [32, 5], strides = [1, 1]} : vector<52x5xf32> to vector<32x5xf32>
    %15 = vector.extract_strided_slice %3 {offsets = [11, 0], sizes = [32, 5], strides = [1, 1]} : vector<52x5xf32> to vector<32x5xf32>
    %16 = vector.extract_strided_slice %3 {offsets = [12, 0], sizes = [32, 5], strides = [1, 1]} : vector<52x5xf32> to vector<32x5xf32>
    %17 = vector.extract_strided_slice %3 {offsets = [13, 0], sizes = [32, 5], strides = [1, 1]} : vector<52x5xf32> to vector<32x5xf32>
    %18 = vector.extract_strided_slice %3 {offsets = [14, 0], sizes = [32, 5], strides = [1, 1]} : vector<52x5xf32> to vector<32x5xf32>
    %19 = vector.extract_strided_slice %3 {offsets = [15, 0], sizes = [32, 5], strides = [1, 1]} : vector<52x5xf32> to vector<32x5xf32>
    %20 = vector.extract_strided_slice %3 {offsets = [16, 0], sizes = [32, 5], strides = [1, 1]} : vector<52x5xf32> to vector<32x5xf32>
    %21 = vector.extract_strided_slice %3 {offsets = [17, 0], sizes = [32, 5], strides = [1, 1]} : vector<52x5xf32> to vector<32x5xf32>
    %22 = vector.extract_strided_slice %3 {offsets = [18, 0], sizes = [32, 5], strides = [1, 1]} : vector<52x5xf32> to vector<32x5xf32>
    %23 = vector.extract_strided_slice %3 {offsets = [19, 0], sizes = [32, 5], strides = [1, 1]} : vector<52x5xf32> to vector<32x5xf32>
    %24 = vector.extract_strided_slice %3 {offsets = [20, 0], sizes = [32, 5], strides = [1, 1]} : vector<52x5xf32> to vector<32x5xf32>
    %25 = tpu.concatenate %4, %5, %6, %7, %8, %9, %10, %11, %12, %13, %14, %15, %16, %17, %18, %19 in 1 : vector<32x5xf32>, vector<32x5xf32>, vector<32x5xf32>, vector<32x5xf32>, vector<32x5xf32>, vector<32x5xf32>, vector<32x5xf32>, vector<32x5xf32>, vector<32x5xf32>, vector<32x5xf32>, vector<32x5xf32>, vector<32x5xf32>, vector<32x5xf32>, vector<32x5xf32>, vector<32x5xf32>, vector<32x5xf32> -> vector<32x80xf32>
    %26 = tpu.concatenate %20, %21, %22, %23, %24 in 1 : vector<32x5xf32>, vector<32x5xf32>, vector<32x5xf32>, vector<32x5xf32>, vector<32x5xf32> -> vector<32x25xf32>
    %27 = tpu.concatenate %25, %26 in 1 : vector<32x80xf32>, vector<32x25xf32> -> vector<32x105xf32>
    %28 = arith.truncf %27 : vector<32x105xf32> to vector<32x105xbf16>
    %c0_2 = arith.constant 0 : index
    %c0_3 = arith.constant 0 : index
    %29 = vector.load %arg2[%c0_2, %c0_3] : memref<105x16xbf16, #tpu.memory_space<vmem>>, vector<105x16xbf16>
    %cst_4 = arith.constant dense<0.000000e+00> : vector<32x16xf32>
    %30 = tpu.matmul %28, %29, %cst_4 {dimension_numbers = #tpu.dot_dimension_numbers<[1], [0], [0], [1], [0, 0, 1, 1], [], []>} : vector<32x105xbf16>, vector<105x16xbf16>, vector<32x16xf32> -> vector<32x16xf32>
    %c0_5 = arith.constant 0 : index
    %c0_6 = arith.constant 0 : index
    %31 = vector.load %arg3[%c0_5, %c0_6] : memref<1x16xf32, #tpu.memory_space<vmem>>, vector<1x16xf32>
    %32 = vector.broadcast %31 : vector<1x16xf32> to vector<32x16xf32>
    %33 = arith.addf %30, %32 : vector<32x16xf32>
    %cst_7 = arith.constant 0.000000e+00 : f32
    %34 = vector.broadcast %cst_7 : f32 to vector<32x16xf32>
    %35 = arith.maximumf %33, %34 : vector<32x16xf32>
    %cst_8 = arith.constant 0.000000e+00 : f32
    %36 = vector.broadcast %cst_8 : f32 to vector<4x16xf32>
    %37 = tpu.concatenate %36, %35, %36 in 0 : vector<4x16xf32>, vector<32x16xf32>, vector<4x16xf32> -> vector<40x16xf32>
    %38 = vector.extract_strided_slice %37 {offsets = [0, 0], sizes = [32, 16], strides = [1, 1]} : vector<40x16xf32> to vector<32x16xf32>
    %39 = vector.extract_strided_slice %37 {offsets = [1, 0], sizes = [32, 16], strides = [1, 1]} : vector<40x16xf32> to vector<32x16xf32>
    %40 = vector.extract_strided_slice %37 {offsets = [2, 0], sizes = [32, 16], strides = [1, 1]} : vector<40x16xf32> to vector<32x16xf32>
    %41 = vector.extract_strided_slice %37 {offsets = [3, 0], sizes = [32, 16], strides = [1, 1]} : vector<40x16xf32> to vector<32x16xf32>
    %42 = vector.extract_strided_slice %37 {offsets = [4, 0], sizes = [32, 16], strides = [1, 1]} : vector<40x16xf32> to vector<32x16xf32>
    %43 = vector.extract_strided_slice %37 {offsets = [5, 0], sizes = [32, 16], strides = [1, 1]} : vector<40x16xf32> to vector<32x16xf32>
    %44 = vector.extract_strided_slice %37 {offsets = [6, 0], sizes = [32, 16], strides = [1, 1]} : vector<40x16xf32> to vector<32x16xf32>
    %45 = vector.extract_strided_slice %37 {offsets = [7, 0], sizes = [32, 16], strides = [1, 1]} : vector<40x16xf32> to vector<32x16xf32>
    %46 = vector.extract_strided_slice %37 {offsets = [8, 0], sizes = [32, 16], strides = [1, 1]} : vector<40x16xf32> to vector<32x16xf32>
    %47 = tpu.concatenate %38, %39, %40, %41, %42, %43, %44, %45, %46 in 1 : vector<32x16xf32>, vector<32x16xf32>, vector<32x16xf32>, vector<32x16xf32>, vector<32x16xf32>, vector<32x16xf32>, vector<32x16xf32>, vector<32x16xf32>, vector<32x16xf32> -> vector<32x144xf32>
    %48 = arith.truncf %47 : vector<32x144xf32> to vector<32x144xbf16>
    %c0_9 = arith.constant 0 : index
    %c0_10 = arith.constant 0 : index
    %49 = vector.load %arg4[%c0_9, %c0_10] : memref<144x32xbf16, #tpu.memory_space<vmem>>, vector<144x32xbf16>
    %cst_11 = arith.constant dense<0.000000e+00> : vector<32x32xf32>
    %50 = tpu.matmul %48, %49, %cst_11 {dimension_numbers = #tpu.dot_dimension_numbers<[1], [0], [0], [1], [0, 0, 1, 1], [], []>} : vector<32x144xbf16>, vector<144x32xbf16>, vector<32x32xf32> -> vector<32x32xf32>
    %c0_12 = arith.constant 0 : index
    %c0_13 = arith.constant 0 : index
    %51 = vector.load %arg5[%c0_12, %c0_13] : memref<1x32xf32, #tpu.memory_space<vmem>>, vector<1x32xf32>
    %52 = vector.broadcast %51 : vector<1x32xf32> to vector<32x32xf32>
    %53 = arith.addf %50, %52 : vector<32x32xf32>
    %cst_14 = arith.constant 0.000000e+00 : f32
    %54 = vector.broadcast %cst_14 : f32 to vector<32x32xf32>
    %55 = arith.maximumf %53, %54 : vector<32x32xf32>
    %cst_15 = arith.constant 0.000000e+00 : f32
    %56 = vector.broadcast %cst_15 : f32 to vector<4x32xf32>
    %57 = tpu.concatenate %56, %55, %56 in 0 : vector<4x32xf32>, vector<32x32xf32>, vector<4x32xf32> -> vector<40x32xf32>
    %58 = vector.extract_strided_slice %57 {offsets = [0, 0], sizes = [32, 32], strides = [1, 1]} : vector<40x32xf32> to vector<32x32xf32>
    %59 = vector.extract_strided_slice %57 {offsets = [1, 0], sizes = [32, 32], strides = [1, 1]} : vector<40x32xf32> to vector<32x32xf32>
    %60 = vector.extract_strided_slice %57 {offsets = [2, 0], sizes = [32, 32], strides = [1, 1]} : vector<40x32xf32> to vector<32x32xf32>
    %61 = vector.extract_strided_slice %57 {offsets = [3, 0], sizes = [32, 32], strides = [1, 1]} : vector<40x32xf32> to vector<32x32xf32>
    %62 = vector.extract_strided_slice %57 {offsets = [4, 0], sizes = [32, 32], strides = [1, 1]} : vector<40x32xf32> to vector<32x32xf32>
    %63 = vector.extract_strided_slice %57 {offsets = [5, 0], sizes = [32, 32], strides = [1, 1]} : vector<40x32xf32> to vector<32x32xf32>
    %64 = vector.extract_strided_slice %57 {offsets = [6, 0], sizes = [32, 32], strides = [1, 1]} : vector<40x32xf32> to vector<32x32xf32>
    %65 = vector.extract_strided_slice %57 {offsets = [7, 0], sizes = [32, 32], strides = [1, 1]} : vector<40x32xf32> to vector<32x32xf32>
    %66 = vector.extract_strided_slice %57 {offsets = [8, 0], sizes = [32, 32], strides = [1, 1]} : vector<40x32xf32> to vector<32x32xf32>
    %67 = tpu.concatenate %58, %59, %60, %61, %62, %63, %64, %65, %66 in 1 : vector<32x32xf32>, vector<32x32xf32>, vector<32x32xf32>, vector<32x32xf32>, vector<32x32xf32>, vector<32x32xf32>, vector<32x32xf32>, vector<32x32xf32>, vector<32x32xf32> -> vector<32x288xf32>
    %68 = arith.truncf %67 : vector<32x288xf32> to vector<32x288xbf16>
    %c0_16 = arith.constant 0 : index
    %c0_17 = arith.constant 0 : index
    %69 = vector.load %arg6[%c0_16, %c0_17] : memref<288x64xbf16, #tpu.memory_space<vmem>>, vector<288x64xbf16>
    %cst_18 = arith.constant dense<0.000000e+00> : vector<32x64xf32>
    %70 = tpu.matmul %68, %69, %cst_18 {dimension_numbers = #tpu.dot_dimension_numbers<[1], [0], [0], [1], [0, 0, 1, 1], [], []>} : vector<32x288xbf16>, vector<288x64xbf16>, vector<32x64xf32> -> vector<32x64xf32>
    %c0_19 = arith.constant 0 : index
    %c0_20 = arith.constant 0 : index
    %71 = vector.load %arg7[%c0_19, %c0_20] : memref<1x64xf32, #tpu.memory_space<vmem>>, vector<1x64xf32>
    %72 = vector.broadcast %71 : vector<1x64xf32> to vector<32x64xf32>
    %73 = arith.addf %70, %72 : vector<32x64xf32>
    %cst_21 = arith.constant 0.000000e+00 : f32
    %74 = vector.broadcast %cst_21 : f32 to vector<32x64xf32>
    %75 = arith.maximumf %73, %74 : vector<32x64xf32>
    %c0_22 = arith.constant 0 : index
    %c0_23 = arith.constant 0 : index
    %76 = vector.load %arg8[%c0_22, %c0_23] : memref<32x64xf32, #tpu.memory_space<vmem>>, vector<32x64xf32>
    %77 = arith.addf %75, %76 : vector<32x64xf32>
    %78 = arith.truncf %77 : vector<32x64xf32> to vector<32x64xbf16>
    %c0_24 = arith.constant 0 : index
    %c0_25 = arith.constant 0 : index
    %79 = vector.load %arg9[%c0_24, %c0_25] : memref<64x192xbf16, #tpu.memory_space<vmem>>, vector<64x192xbf16>
    %cst_26 = arith.constant dense<0.000000e+00> : vector<32x192xf32>
    %80 = tpu.matmul %78, %79, %cst_26 {dimension_numbers = #tpu.dot_dimension_numbers<[1], [0], [0], [1], [0, 0, 1, 1], [], []>} : vector<32x64xbf16>, vector<64x192xbf16>, vector<32x192xf32> -> vector<32x192xf32>
    %c0_27 = arith.constant 0 : index
    %c0_28 = arith.constant 0 : index
    %81 = vector.load %arg10[%c0_27, %c0_28] : memref<1x192xf32, #tpu.memory_space<vmem>>, vector<1x192xf32>
    %82 = vector.broadcast %81 : vector<1x192xf32> to vector<32x192xf32>
    %83 = arith.addf %80, %82 : vector<32x192xf32>
    %84 = vector.extract_strided_slice %83 {offsets = [0, 0], sizes = [32, 64], strides = [1, 1]} : vector<32x192xf32> to vector<32x64xf32>
    %85 = arith.truncf %84 : vector<32x64xf32> to vector<32x64xbf16>
    %86 = vector.extract_strided_slice %83 {offsets = [0, 64], sizes = [32, 64], strides = [1, 1]} : vector<32x192xf32> to vector<32x64xf32>
    %87 = arith.truncf %86 : vector<32x64xf32> to vector<32x64xbf16>
    %88 = vector.extract_strided_slice %83 {offsets = [0, 128], sizes = [32, 64], strides = [1, 1]} : vector<32x192xf32> to vector<32x64xf32>
    %89 = arith.truncf %88 : vector<32x64xf32> to vector<32x64xbf16>
    %90 = vector.extract_strided_slice %85 {offsets = [0, 0], sizes = [32, 16], strides = [1, 1]} : vector<32x64xbf16> to vector<32x16xbf16>
    %91 = vector.extract_strided_slice %87 {offsets = [0, 0], sizes = [32, 16], strides = [1, 1]} : vector<32x64xbf16> to vector<32x16xbf16>
    %cst_29 = arith.constant dense<0.000000e+00> : vector<32x32xf32>
    %92 = tpu.matmul %90, %91, %cst_29 {dimension_numbers = #tpu.dot_dimension_numbers<[1], [1], [0], [0], [0, 0, 1, 0], [], []>} : vector<32x16xbf16>, vector<32x16xbf16>, vector<32x32xf32> -> vector<32x32xf32>
    %cst_30 = arith.constant 2.500000e-01 : f32
    %93 = vector.broadcast %cst_30 : f32 to vector<32x32xf32>
    %94 = arith.mulf %92, %93 : vector<32x32xf32>
    %cst_31 = arith.constant dense<0xFF800000> : vector<32xf32>
    %95 = vector.multi_reduction <maximumf>, %94, %cst_31 [1] : vector<32x32xf32> to vector<32xf32>
    %96 = vector.shape_cast %95 : vector<32xf32> to vector<32x1xf32>
    %97 = vector.broadcast %96 : vector<32x1xf32> to vector<32x32xf32>
    %98 = arith.subf %94, %97 : vector<32x32xf32>
    %99 = math.exp %98 : vector<32x32xf32>
    %cst_32 = arith.constant dense<0.000000e+00> : vector<32xf32>
    %100 = vector.multi_reduction <add>, %99, %cst_32 [1] : vector<32x32xf32> to vector<32xf32>
    %101 = vector.shape_cast %100 : vector<32xf32> to vector<32x1xf32>
    %102 = tpu.reciprocal %101 {approx = true} : vector<32x1xf32> -> vector<32x1xf32>
    %103 = vector.broadcast %102 : vector<32x1xf32> to vector<32x32xf32>
    %104 = arith.mulf %99, %103 : vector<32x32xf32>
    %105 = arith.truncf %104 : vector<32x32xf32> to vector<32x32xbf16>
    %106 = vector.extract_strided_slice %89 {offsets = [0, 0], sizes = [32, 16], strides = [1, 1]} : vector<32x64xbf16> to vector<32x16xbf16>
    %cst_33 = arith.constant dense<0.000000e+00> : vector<32x16xf32>
    %107 = tpu.matmul %105, %106, %cst_33 {dimension_numbers = #tpu.dot_dimension_numbers<[1], [0], [0], [1], [0, 0, 1, 1], [], []>} : vector<32x32xbf16>, vector<32x16xbf16>, vector<32x16xf32> -> vector<32x16xf32>
    %108 = vector.extract_strided_slice %85 {offsets = [0, 16], sizes = [32, 16], strides = [1, 1]} : vector<32x64xbf16> to vector<32x16xbf16>
    %109 = vector.extract_strided_slice %87 {offsets = [0, 16], sizes = [32, 16], strides = [1, 1]} : vector<32x64xbf16> to vector<32x16xbf16>
    %cst_34 = arith.constant dense<0.000000e+00> : vector<32x32xf32>
    %110 = tpu.matmul %108, %109, %cst_34 {dimension_numbers = #tpu.dot_dimension_numbers<[1], [1], [0], [0], [0, 0, 1, 0], [], []>} : vector<32x16xbf16>, vector<32x16xbf16>, vector<32x32xf32> -> vector<32x32xf32>
    %cst_35 = arith.constant 2.500000e-01 : f32
    %111 = vector.broadcast %cst_35 : f32 to vector<32x32xf32>
    %112 = arith.mulf %110, %111 : vector<32x32xf32>
    %cst_36 = arith.constant dense<0xFF800000> : vector<32xf32>
    %113 = vector.multi_reduction <maximumf>, %112, %cst_36 [1] : vector<32x32xf32> to vector<32xf32>
    %114 = vector.shape_cast %113 : vector<32xf32> to vector<32x1xf32>
    %115 = vector.broadcast %114 : vector<32x1xf32> to vector<32x32xf32>
    %116 = arith.subf %112, %115 : vector<32x32xf32>
    %117 = math.exp %116 : vector<32x32xf32>
    %cst_37 = arith.constant dense<0.000000e+00> : vector<32xf32>
    %118 = vector.multi_reduction <add>, %117, %cst_37 [1] : vector<32x32xf32> to vector<32xf32>
    %119 = vector.shape_cast %118 : vector<32xf32> to vector<32x1xf32>
    %120 = tpu.reciprocal %119 {approx = true} : vector<32x1xf32> -> vector<32x1xf32>
    %121 = vector.broadcast %120 : vector<32x1xf32> to vector<32x32xf32>
    %122 = arith.mulf %117, %121 : vector<32x32xf32>
    %123 = arith.truncf %122 : vector<32x32xf32> to vector<32x32xbf16>
    %124 = vector.extract_strided_slice %89 {offsets = [0, 16], sizes = [32, 16], strides = [1, 1]} : vector<32x64xbf16> to vector<32x16xbf16>
    %cst_38 = arith.constant dense<0.000000e+00> : vector<32x16xf32>
    %125 = tpu.matmul %123, %124, %cst_38 {dimension_numbers = #tpu.dot_dimension_numbers<[1], [0], [0], [1], [0, 0, 1, 1], [], []>} : vector<32x32xbf16>, vector<32x16xbf16>, vector<32x16xf32> -> vector<32x16xf32>
    %126 = vector.extract_strided_slice %85 {offsets = [0, 32], sizes = [32, 16], strides = [1, 1]} : vector<32x64xbf16> to vector<32x16xbf16>
    %127 = vector.extract_strided_slice %87 {offsets = [0, 32], sizes = [32, 16], strides = [1, 1]} : vector<32x64xbf16> to vector<32x16xbf16>
    %cst_39 = arith.constant dense<0.000000e+00> : vector<32x32xf32>
    %128 = tpu.matmul %126, %127, %cst_39 {dimension_numbers = #tpu.dot_dimension_numbers<[1], [1], [0], [0], [0, 0, 1, 0], [], []>} : vector<32x16xbf16>, vector<32x16xbf16>, vector<32x32xf32> -> vector<32x32xf32>
    %cst_40 = arith.constant 2.500000e-01 : f32
    %129 = vector.broadcast %cst_40 : f32 to vector<32x32xf32>
    %130 = arith.mulf %128, %129 : vector<32x32xf32>
    %cst_41 = arith.constant dense<0xFF800000> : vector<32xf32>
    %131 = vector.multi_reduction <maximumf>, %130, %cst_41 [1] : vector<32x32xf32> to vector<32xf32>
    %132 = vector.shape_cast %131 : vector<32xf32> to vector<32x1xf32>
    %133 = vector.broadcast %132 : vector<32x1xf32> to vector<32x32xf32>
    %134 = arith.subf %130, %133 : vector<32x32xf32>
    %135 = math.exp %134 : vector<32x32xf32>
    %cst_42 = arith.constant dense<0.000000e+00> : vector<32xf32>
    %136 = vector.multi_reduction <add>, %135, %cst_42 [1] : vector<32x32xf32> to vector<32xf32>
    %137 = vector.shape_cast %136 : vector<32xf32> to vector<32x1xf32>
    %138 = tpu.reciprocal %137 {approx = true} : vector<32x1xf32> -> vector<32x1xf32>
    %139 = vector.broadcast %138 : vector<32x1xf32> to vector<32x32xf32>
    %140 = arith.mulf %135, %139 : vector<32x32xf32>
    %141 = arith.truncf %140 : vector<32x32xf32> to vector<32x32xbf16>
    %142 = vector.extract_strided_slice %89 {offsets = [0, 32], sizes = [32, 16], strides = [1, 1]} : vector<32x64xbf16> to vector<32x16xbf16>
    %cst_43 = arith.constant dense<0.000000e+00> : vector<32x16xf32>
    %143 = tpu.matmul %141, %142, %cst_43 {dimension_numbers = #tpu.dot_dimension_numbers<[1], [0], [0], [1], [0, 0, 1, 1], [], []>} : vector<32x32xbf16>, vector<32x16xbf16>, vector<32x16xf32> -> vector<32x16xf32>
    %144 = vector.extract_strided_slice %85 {offsets = [0, 48], sizes = [32, 16], strides = [1, 1]} : vector<32x64xbf16> to vector<32x16xbf16>
    %145 = vector.extract_strided_slice %87 {offsets = [0, 48], sizes = [32, 16], strides = [1, 1]} : vector<32x64xbf16> to vector<32x16xbf16>
    %cst_44 = arith.constant dense<0.000000e+00> : vector<32x32xf32>
    %146 = tpu.matmul %144, %145, %cst_44 {dimension_numbers = #tpu.dot_dimension_numbers<[1], [1], [0], [0], [0, 0, 1, 0], [], []>} : vector<32x16xbf16>, vector<32x16xbf16>, vector<32x32xf32> -> vector<32x32xf32>
    %cst_45 = arith.constant 2.500000e-01 : f32
    %147 = vector.broadcast %cst_45 : f32 to vector<32x32xf32>
    %148 = arith.mulf %146, %147 : vector<32x32xf32>
    %cst_46 = arith.constant dense<0xFF800000> : vector<32xf32>
    %149 = vector.multi_reduction <maximumf>, %148, %cst_46 [1] : vector<32x32xf32> to vector<32xf32>
    %150 = vector.shape_cast %149 : vector<32xf32> to vector<32x1xf32>
    %151 = vector.broadcast %150 : vector<32x1xf32> to vector<32x32xf32>
    %152 = arith.subf %148, %151 : vector<32x32xf32>
    %153 = math.exp %152 : vector<32x32xf32>
    %cst_47 = arith.constant dense<0.000000e+00> : vector<32xf32>
    %154 = vector.multi_reduction <add>, %153, %cst_47 [1] : vector<32x32xf32> to vector<32xf32>
    %155 = vector.shape_cast %154 : vector<32xf32> to vector<32x1xf32>
    %156 = tpu.reciprocal %155 {approx = true} : vector<32x1xf32> -> vector<32x1xf32>
    %157 = vector.broadcast %156 : vector<32x1xf32> to vector<32x32xf32>
    %158 = arith.mulf %153, %157 : vector<32x32xf32>
    %159 = arith.truncf %158 : vector<32x32xf32> to vector<32x32xbf16>
    %160 = vector.extract_strided_slice %89 {offsets = [0, 48], sizes = [32, 16], strides = [1, 1]} : vector<32x64xbf16> to vector<32x16xbf16>
    %cst_48 = arith.constant dense<0.000000e+00> : vector<32x16xf32>
    %161 = tpu.matmul %159, %160, %cst_48 {dimension_numbers = #tpu.dot_dimension_numbers<[1], [0], [0], [1], [0, 0, 1, 1], [], []>} : vector<32x32xbf16>, vector<32x16xbf16>, vector<32x16xf32> -> vector<32x16xf32>
    %162 = tpu.concatenate %107, %125, %143, %161 in 1 : vector<32x16xf32>, vector<32x16xf32>, vector<32x16xf32>, vector<32x16xf32> -> vector<32x64xf32>
    %163 = arith.truncf %162 : vector<32x64xf32> to vector<32x64xbf16>
    %c0_49 = arith.constant 0 : index
    %c0_50 = arith.constant 0 : index
    %164 = vector.load %arg11[%c0_49, %c0_50] : memref<64x64xbf16, #tpu.memory_space<vmem>>, vector<64x64xbf16>
    %cst_51 = arith.constant dense<0.000000e+00> : vector<32x64xf32>
    %165 = tpu.matmul %163, %164, %cst_51 {dimension_numbers = #tpu.dot_dimension_numbers<[1], [0], [0], [1], [0, 0, 1, 1], [], []>} : vector<32x64xbf16>, vector<64x64xbf16>, vector<32x64xf32> -> vector<32x64xf32>
    %c0_52 = arith.constant 0 : index
    %c0_53 = arith.constant 0 : index
    %166 = vector.load %arg12[%c0_52, %c0_53] : memref<1x64xf32, #tpu.memory_space<vmem>>, vector<1x64xf32>
    %167 = vector.broadcast %166 : vector<1x64xf32> to vector<32x64xf32>
    %168 = arith.addf %165, %167 : vector<32x64xf32>
    %169 = arith.addf %77, %168 : vector<32x64xf32>
    %c0_54 = arith.constant 0 : index
    %c0_55 = arith.constant 0 : index
    %170 = vector.load %arg13[%c0_54, %c0_55] : memref<1x64xf32, #tpu.memory_space<vmem>>, vector<1x64xf32>
    %c0_56 = arith.constant 0 : index
    %c0_57 = arith.constant 0 : index
    %171 = vector.load %arg14[%c0_56, %c0_57] : memref<1x64xf32, #tpu.memory_space<vmem>>, vector<1x64xf32>
    %cst_58 = arith.constant dense<0.000000e+00> : vector<32xf32>
    %172 = vector.multi_reduction <add>, %169, %cst_58 [1] : vector<32x64xf32> to vector<32xf32>
    %173 = vector.shape_cast %172 : vector<32xf32> to vector<32x1xf32>
    %cst_59 = arith.constant 6.400000e+01 : f32
    %174 = vector.broadcast %cst_59 : f32 to vector<32x1xf32>
    %175 = arith.divf %173, %174 : vector<32x1xf32>
    %176 = vector.broadcast %175 : vector<32x1xf32> to vector<32x64xf32>
    %177 = arith.subf %169, %176 : vector<32x64xf32>
    %178 = arith.mulf %177, %177 : vector<32x64xf32>
    %cst_60 = arith.constant dense<0.000000e+00> : vector<32xf32>
    %179 = vector.multi_reduction <add>, %178, %cst_60 [1] : vector<32x64xf32> to vector<32xf32>
    %180 = vector.shape_cast %179 : vector<32xf32> to vector<32x1xf32>
    %cst_61 = arith.constant 6.400000e+01 : f32
    %181 = vector.broadcast %cst_61 : f32 to vector<32x1xf32>
    %182 = arith.divf %180, %181 : vector<32x1xf32>
    %183 = vector.broadcast %175 : vector<32x1xf32> to vector<32x64xf32>
    %184 = arith.subf %169, %183 : vector<32x64xf32>
    %cst_62 = arith.constant 9.99999974E-6 : f32
    %185 = vector.broadcast %cst_62 : f32 to vector<32x1xf32>
    %186 = arith.addf %182, %185 : vector<32x1xf32>
    %187 = math.rsqrt %186 : vector<32x1xf32>
    %188 = vector.broadcast %187 : vector<32x1xf32> to vector<32x64xf32>
    %189 = arith.mulf %184, %188 : vector<32x64xf32>
    %190 = vector.broadcast %170 : vector<1x64xf32> to vector<32x64xf32>
    %191 = arith.mulf %189, %190 : vector<32x64xf32>
    %192 = vector.broadcast %171 : vector<1x64xf32> to vector<32x64xf32>
    %193 = arith.addf %191, %192 : vector<32x64xf32>
    %194 = arith.truncf %193 : vector<32x64xf32> to vector<32x64xbf16>
    %c0_63 = arith.constant 0 : index
    %c0_64 = arith.constant 0 : index
    %195 = vector.load %arg15[%c0_63, %c0_64] : memref<64x256xbf16, #tpu.memory_space<vmem>>, vector<64x256xbf16>
    %cst_65 = arith.constant dense<0.000000e+00> : vector<32x256xf32>
    %196 = tpu.matmul %194, %195, %cst_65 {dimension_numbers = #tpu.dot_dimension_numbers<[1], [0], [0], [1], [0, 0, 1, 1], [], []>} : vector<32x64xbf16>, vector<64x256xbf16>, vector<32x256xf32> -> vector<32x256xf32>
    %c0_66 = arith.constant 0 : index
    %c0_67 = arith.constant 0 : index
    %197 = vector.load %arg16[%c0_66, %c0_67] : memref<1x256xf32, #tpu.memory_space<vmem>>, vector<1x256xf32>
    %198 = vector.broadcast %197 : vector<1x256xf32> to vector<32x256xf32>
    %199 = arith.addf %196, %198 : vector<32x256xf32>
    %cst_68 = arith.constant 0.000000e+00 : f32
    %200 = vector.broadcast %cst_68 : f32 to vector<32x256xf32>
    %201 = arith.maximumf %199, %200 : vector<32x256xf32>
    %202 = arith.truncf %201 : vector<32x256xf32> to vector<32x256xbf16>
    %c0_69 = arith.constant 0 : index
    %c0_70 = arith.constant 0 : index
    %203 = vector.load %arg17[%c0_69, %c0_70] : memref<256x64xbf16, #tpu.memory_space<vmem>>, vector<256x64xbf16>
    %cst_71 = arith.constant dense<0.000000e+00> : vector<32x64xf32>
    %204 = tpu.matmul %202, %203, %cst_71 {dimension_numbers = #tpu.dot_dimension_numbers<[1], [0], [0], [1], [0, 0, 1, 1], [], []>} : vector<32x256xbf16>, vector<256x64xbf16>, vector<32x64xf32> -> vector<32x64xf32>
    %c0_72 = arith.constant 0 : index
    %c0_73 = arith.constant 0 : index
    %205 = vector.load %arg18[%c0_72, %c0_73] : memref<1x64xf32, #tpu.memory_space<vmem>>, vector<1x64xf32>
    %206 = vector.broadcast %205 : vector<1x64xf32> to vector<32x64xf32>
    %207 = arith.addf %204, %206 : vector<32x64xf32>
    %208 = arith.addf %193, %207 : vector<32x64xf32>
    %c0_74 = arith.constant 0 : index
    %c0_75 = arith.constant 0 : index
    %209 = vector.load %arg19[%c0_74, %c0_75] : memref<1x64xf32, #tpu.memory_space<vmem>>, vector<1x64xf32>
    %c0_76 = arith.constant 0 : index
    %c0_77 = arith.constant 0 : index
    %210 = vector.load %arg20[%c0_76, %c0_77] : memref<1x64xf32, #tpu.memory_space<vmem>>, vector<1x64xf32>
    %cst_78 = arith.constant dense<0.000000e+00> : vector<32xf32>
    %211 = vector.multi_reduction <add>, %208, %cst_78 [1] : vector<32x64xf32> to vector<32xf32>
    %212 = vector.shape_cast %211 : vector<32xf32> to vector<32x1xf32>
    %cst_79 = arith.constant 6.400000e+01 : f32
    %213 = vector.broadcast %cst_79 : f32 to vector<32x1xf32>
    %214 = arith.divf %212, %213 : vector<32x1xf32>
    %215 = vector.broadcast %214 : vector<32x1xf32> to vector<32x64xf32>
    %216 = arith.subf %208, %215 : vector<32x64xf32>
    %217 = arith.mulf %216, %216 : vector<32x64xf32>
    %cst_80 = arith.constant dense<0.000000e+00> : vector<32xf32>
    %218 = vector.multi_reduction <add>, %217, %cst_80 [1] : vector<32x64xf32> to vector<32xf32>
    %219 = vector.shape_cast %218 : vector<32xf32> to vector<32x1xf32>
    %cst_81 = arith.constant 6.400000e+01 : f32
    %220 = vector.broadcast %cst_81 : f32 to vector<32x1xf32>
    %221 = arith.divf %219, %220 : vector<32x1xf32>
    %222 = vector.broadcast %214 : vector<32x1xf32> to vector<32x64xf32>
    %223 = arith.subf %208, %222 : vector<32x64xf32>
    %cst_82 = arith.constant 9.99999974E-6 : f32
    %224 = vector.broadcast %cst_82 : f32 to vector<32x1xf32>
    %225 = arith.addf %221, %224 : vector<32x1xf32>
    %226 = math.rsqrt %225 : vector<32x1xf32>
    %227 = vector.broadcast %226 : vector<32x1xf32> to vector<32x64xf32>
    %228 = arith.mulf %223, %227 : vector<32x64xf32>
    %229 = vector.broadcast %209 : vector<1x64xf32> to vector<32x64xf32>
    %230 = arith.mulf %228, %229 : vector<32x64xf32>
    %231 = vector.broadcast %210 : vector<1x64xf32> to vector<32x64xf32>
    %232 = arith.addf %230, %231 : vector<32x64xf32>
    %233 = arith.truncf %232 : vector<32x64xf32> to vector<32x64xbf16>
    %c0_83 = arith.constant 0 : index
    %c0_84 = arith.constant 0 : index
    %234 = vector.load %arg21[%c0_83, %c0_84] : memref<64x192xbf16, #tpu.memory_space<vmem>>, vector<64x192xbf16>
    %cst_85 = arith.constant dense<0.000000e+00> : vector<32x192xf32>
    %235 = tpu.matmul %233, %234, %cst_85 {dimension_numbers = #tpu.dot_dimension_numbers<[1], [0], [0], [1], [0, 0, 1, 1], [], []>} : vector<32x64xbf16>, vector<64x192xbf16>, vector<32x192xf32> -> vector<32x192xf32>
    %c0_86 = arith.constant 0 : index
    %c0_87 = arith.constant 0 : index
    %236 = vector.load %arg22[%c0_86, %c0_87] : memref<1x192xf32, #tpu.memory_space<vmem>>, vector<1x192xf32>
    %237 = vector.broadcast %236 : vector<1x192xf32> to vector<32x192xf32>
    %238 = arith.addf %235, %237 : vector<32x192xf32>
    %239 = vector.extract_strided_slice %238 {offsets = [0, 0], sizes = [32, 64], strides = [1, 1]} : vector<32x192xf32> to vector<32x64xf32>
    %240 = arith.truncf %239 : vector<32x64xf32> to vector<32x64xbf16>
    %241 = vector.extract_strided_slice %238 {offsets = [0, 64], sizes = [32, 64], strides = [1, 1]} : vector<32x192xf32> to vector<32x64xf32>
    %242 = arith.truncf %241 : vector<32x64xf32> to vector<32x64xbf16>
    %243 = vector.extract_strided_slice %238 {offsets = [0, 128], sizes = [32, 64], strides = [1, 1]} : vector<32x192xf32> to vector<32x64xf32>
    %244 = arith.truncf %243 : vector<32x64xf32> to vector<32x64xbf16>
    %245 = vector.extract_strided_slice %240 {offsets = [0, 0], sizes = [32, 16], strides = [1, 1]} : vector<32x64xbf16> to vector<32x16xbf16>
    %246 = vector.extract_strided_slice %242 {offsets = [0, 0], sizes = [32, 16], strides = [1, 1]} : vector<32x64xbf16> to vector<32x16xbf16>
    %cst_88 = arith.constant dense<0.000000e+00> : vector<32x32xf32>
    %247 = tpu.matmul %245, %246, %cst_88 {dimension_numbers = #tpu.dot_dimension_numbers<[1], [1], [0], [0], [0, 0, 1, 0], [], []>} : vector<32x16xbf16>, vector<32x16xbf16>, vector<32x32xf32> -> vector<32x32xf32>
    %cst_89 = arith.constant 2.500000e-01 : f32
    %248 = vector.broadcast %cst_89 : f32 to vector<32x32xf32>
    %249 = arith.mulf %247, %248 : vector<32x32xf32>
    %cst_90 = arith.constant dense<0xFF800000> : vector<32xf32>
    %250 = vector.multi_reduction <maximumf>, %249, %cst_90 [1] : vector<32x32xf32> to vector<32xf32>
    %251 = vector.shape_cast %250 : vector<32xf32> to vector<32x1xf32>
    %252 = vector.broadcast %251 : vector<32x1xf32> to vector<32x32xf32>
    %253 = arith.subf %249, %252 : vector<32x32xf32>
    %254 = math.exp %253 : vector<32x32xf32>
    %cst_91 = arith.constant dense<0.000000e+00> : vector<32xf32>
    %255 = vector.multi_reduction <add>, %254, %cst_91 [1] : vector<32x32xf32> to vector<32xf32>
    %256 = vector.shape_cast %255 : vector<32xf32> to vector<32x1xf32>
    %257 = tpu.reciprocal %256 {approx = true} : vector<32x1xf32> -> vector<32x1xf32>
    %258 = vector.broadcast %257 : vector<32x1xf32> to vector<32x32xf32>
    %259 = arith.mulf %254, %258 : vector<32x32xf32>
    %260 = arith.truncf %259 : vector<32x32xf32> to vector<32x32xbf16>
    %261 = vector.extract_strided_slice %244 {offsets = [0, 0], sizes = [32, 16], strides = [1, 1]} : vector<32x64xbf16> to vector<32x16xbf16>
    %cst_92 = arith.constant dense<0.000000e+00> : vector<32x16xf32>
    %262 = tpu.matmul %260, %261, %cst_92 {dimension_numbers = #tpu.dot_dimension_numbers<[1], [0], [0], [1], [0, 0, 1, 1], [], []>} : vector<32x32xbf16>, vector<32x16xbf16>, vector<32x16xf32> -> vector<32x16xf32>
    %263 = vector.extract_strided_slice %240 {offsets = [0, 16], sizes = [32, 16], strides = [1, 1]} : vector<32x64xbf16> to vector<32x16xbf16>
    %264 = vector.extract_strided_slice %242 {offsets = [0, 16], sizes = [32, 16], strides = [1, 1]} : vector<32x64xbf16> to vector<32x16xbf16>
    %cst_93 = arith.constant dense<0.000000e+00> : vector<32x32xf32>
    %265 = tpu.matmul %263, %264, %cst_93 {dimension_numbers = #tpu.dot_dimension_numbers<[1], [1], [0], [0], [0, 0, 1, 0], [], []>} : vector<32x16xbf16>, vector<32x16xbf16>, vector<32x32xf32> -> vector<32x32xf32>
    %cst_94 = arith.constant 2.500000e-01 : f32
    %266 = vector.broadcast %cst_94 : f32 to vector<32x32xf32>
    %267 = arith.mulf %265, %266 : vector<32x32xf32>
    %cst_95 = arith.constant dense<0xFF800000> : vector<32xf32>
    %268 = vector.multi_reduction <maximumf>, %267, %cst_95 [1] : vector<32x32xf32> to vector<32xf32>
    %269 = vector.shape_cast %268 : vector<32xf32> to vector<32x1xf32>
    %270 = vector.broadcast %269 : vector<32x1xf32> to vector<32x32xf32>
    %271 = arith.subf %267, %270 : vector<32x32xf32>
    %272 = math.exp %271 : vector<32x32xf32>
    %cst_96 = arith.constant dense<0.000000e+00> : vector<32xf32>
    %273 = vector.multi_reduction <add>, %272, %cst_96 [1] : vector<32x32xf32> to vector<32xf32>
    %274 = vector.shape_cast %273 : vector<32xf32> to vector<32x1xf32>
    %275 = tpu.reciprocal %274 {approx = true} : vector<32x1xf32> -> vector<32x1xf32>
    %276 = vector.broadcast %275 : vector<32x1xf32> to vector<32x32xf32>
    %277 = arith.mulf %272, %276 : vector<32x32xf32>
    %278 = arith.truncf %277 : vector<32x32xf32> to vector<32x32xbf16>
    %279 = vector.extract_strided_slice %244 {offsets = [0, 16], sizes = [32, 16], strides = [1, 1]} : vector<32x64xbf16> to vector<32x16xbf16>
    %cst_97 = arith.constant dense<0.000000e+00> : vector<32x16xf32>
    %280 = tpu.matmul %278, %279, %cst_97 {dimension_numbers = #tpu.dot_dimension_numbers<[1], [0], [0], [1], [0, 0, 1, 1], [], []>} : vector<32x32xbf16>, vector<32x16xbf16>, vector<32x16xf32> -> vector<32x16xf32>
    %281 = vector.extract_strided_slice %240 {offsets = [0, 32], sizes = [32, 16], strides = [1, 1]} : vector<32x64xbf16> to vector<32x16xbf16>
    %282 = vector.extract_strided_slice %242 {offsets = [0, 32], sizes = [32, 16], strides = [1, 1]} : vector<32x64xbf16> to vector<32x16xbf16>
    %cst_98 = arith.constant dense<0.000000e+00> : vector<32x32xf32>
    %283 = tpu.matmul %281, %282, %cst_98 {dimension_numbers = #tpu.dot_dimension_numbers<[1], [1], [0], [0], [0, 0, 1, 0], [], []>} : vector<32x16xbf16>, vector<32x16xbf16>, vector<32x32xf32> -> vector<32x32xf32>
    %cst_99 = arith.constant 2.500000e-01 : f32
    %284 = vector.broadcast %cst_99 : f32 to vector<32x32xf32>
    %285 = arith.mulf %283, %284 : vector<32x32xf32>
    %cst_100 = arith.constant dense<0xFF800000> : vector<32xf32>
    %286 = vector.multi_reduction <maximumf>, %285, %cst_100 [1] : vector<32x32xf32> to vector<32xf32>
    %287 = vector.shape_cast %286 : vector<32xf32> to vector<32x1xf32>
    %288 = vector.broadcast %287 : vector<32x1xf32> to vector<32x32xf32>
    %289 = arith.subf %285, %288 : vector<32x32xf32>
    %290 = math.exp %289 : vector<32x32xf32>
    %cst_101 = arith.constant dense<0.000000e+00> : vector<32xf32>
    %291 = vector.multi_reduction <add>, %290, %cst_101 [1] : vector<32x32xf32> to vector<32xf32>
    %292 = vector.shape_cast %291 : vector<32xf32> to vector<32x1xf32>
    %293 = tpu.reciprocal %292 {approx = true} : vector<32x1xf32> -> vector<32x1xf32>
    %294 = vector.broadcast %293 : vector<32x1xf32> to vector<32x32xf32>
    %295 = arith.mulf %290, %294 : vector<32x32xf32>
    %296 = arith.truncf %295 : vector<32x32xf32> to vector<32x32xbf16>
    %297 = vector.extract_strided_slice %244 {offsets = [0, 32], sizes = [32, 16], strides = [1, 1]} : vector<32x64xbf16> to vector<32x16xbf16>
    %cst_102 = arith.constant dense<0.000000e+00> : vector<32x16xf32>
    %298 = tpu.matmul %296, %297, %cst_102 {dimension_numbers = #tpu.dot_dimension_numbers<[1], [0], [0], [1], [0, 0, 1, 1], [], []>} : vector<32x32xbf16>, vector<32x16xbf16>, vector<32x16xf32> -> vector<32x16xf32>
    %299 = vector.extract_strided_slice %240 {offsets = [0, 48], sizes = [32, 16], strides = [1, 1]} : vector<32x64xbf16> to vector<32x16xbf16>
    %300 = vector.extract_strided_slice %242 {offsets = [0, 48], sizes = [32, 16], strides = [1, 1]} : vector<32x64xbf16> to vector<32x16xbf16>
    %cst_103 = arith.constant dense<0.000000e+00> : vector<32x32xf32>
    %301 = tpu.matmul %299, %300, %cst_103 {dimension_numbers = #tpu.dot_dimension_numbers<[1], [1], [0], [0], [0, 0, 1, 0], [], []>} : vector<32x16xbf16>, vector<32x16xbf16>, vector<32x32xf32> -> vector<32x32xf32>
    %cst_104 = arith.constant 2.500000e-01 : f32
    %302 = vector.broadcast %cst_104 : f32 to vector<32x32xf32>
    %303 = arith.mulf %301, %302 : vector<32x32xf32>
    %cst_105 = arith.constant dense<0xFF800000> : vector<32xf32>
    %304 = vector.multi_reduction <maximumf>, %303, %cst_105 [1] : vector<32x32xf32> to vector<32xf32>
    %305 = vector.shape_cast %304 : vector<32xf32> to vector<32x1xf32>
    %306 = vector.broadcast %305 : vector<32x1xf32> to vector<32x32xf32>
    %307 = arith.subf %303, %306 : vector<32x32xf32>
    %308 = math.exp %307 : vector<32x32xf32>
    %cst_106 = arith.constant dense<0.000000e+00> : vector<32xf32>
    %309 = vector.multi_reduction <add>, %308, %cst_106 [1] : vector<32x32xf32> to vector<32xf32>
    %310 = vector.shape_cast %309 : vector<32xf32> to vector<32x1xf32>
    %311 = tpu.reciprocal %310 {approx = true} : vector<32x1xf32> -> vector<32x1xf32>
    %312 = vector.broadcast %311 : vector<32x1xf32> to vector<32x32xf32>
    %313 = arith.mulf %308, %312 : vector<32x32xf32>
    %314 = arith.truncf %313 : vector<32x32xf32> to vector<32x32xbf16>
    %315 = vector.extract_strided_slice %244 {offsets = [0, 48], sizes = [32, 16], strides = [1, 1]} : vector<32x64xbf16> to vector<32x16xbf16>
    %cst_107 = arith.constant dense<0.000000e+00> : vector<32x16xf32>
    %316 = tpu.matmul %314, %315, %cst_107 {dimension_numbers = #tpu.dot_dimension_numbers<[1], [0], [0], [1], [0, 0, 1, 1], [], []>} : vector<32x32xbf16>, vector<32x16xbf16>, vector<32x16xf32> -> vector<32x16xf32>
    %317 = tpu.concatenate %262, %280, %298, %316 in 1 : vector<32x16xf32>, vector<32x16xf32>, vector<32x16xf32>, vector<32x16xf32> -> vector<32x64xf32>
    %318 = arith.truncf %317 : vector<32x64xf32> to vector<32x64xbf16>
    %c0_108 = arith.constant 0 : index
    %c0_109 = arith.constant 0 : index
    %319 = vector.load %arg23[%c0_108, %c0_109] : memref<64x64xbf16, #tpu.memory_space<vmem>>, vector<64x64xbf16>
    %cst_110 = arith.constant dense<0.000000e+00> : vector<32x64xf32>
    %320 = tpu.matmul %318, %319, %cst_110 {dimension_numbers = #tpu.dot_dimension_numbers<[1], [0], [0], [1], [0, 0, 1, 1], [], []>} : vector<32x64xbf16>, vector<64x64xbf16>, vector<32x64xf32> -> vector<32x64xf32>
    %c0_111 = arith.constant 0 : index
    %c0_112 = arith.constant 0 : index
    %321 = vector.load %arg24[%c0_111, %c0_112] : memref<1x64xf32, #tpu.memory_space<vmem>>, vector<1x64xf32>
    %322 = vector.broadcast %321 : vector<1x64xf32> to vector<32x64xf32>
    %323 = arith.addf %320, %322 : vector<32x64xf32>
    %324 = arith.addf %232, %323 : vector<32x64xf32>
    %c0_113 = arith.constant 0 : index
    %c0_114 = arith.constant 0 : index
    %325 = vector.load %arg25[%c0_113, %c0_114] : memref<1x64xf32, #tpu.memory_space<vmem>>, vector<1x64xf32>
    %c0_115 = arith.constant 0 : index
    %c0_116 = arith.constant 0 : index
    %326 = vector.load %arg26[%c0_115, %c0_116] : memref<1x64xf32, #tpu.memory_space<vmem>>, vector<1x64xf32>
    %cst_117 = arith.constant dense<0.000000e+00> : vector<32xf32>
    %327 = vector.multi_reduction <add>, %324, %cst_117 [1] : vector<32x64xf32> to vector<32xf32>
    %328 = vector.shape_cast %327 : vector<32xf32> to vector<32x1xf32>
    %cst_118 = arith.constant 6.400000e+01 : f32
    %329 = vector.broadcast %cst_118 : f32 to vector<32x1xf32>
    %330 = arith.divf %328, %329 : vector<32x1xf32>
    %331 = vector.broadcast %330 : vector<32x1xf32> to vector<32x64xf32>
    %332 = arith.subf %324, %331 : vector<32x64xf32>
    %333 = arith.mulf %332, %332 : vector<32x64xf32>
    %cst_119 = arith.constant dense<0.000000e+00> : vector<32xf32>
    %334 = vector.multi_reduction <add>, %333, %cst_119 [1] : vector<32x64xf32> to vector<32xf32>
    %335 = vector.shape_cast %334 : vector<32xf32> to vector<32x1xf32>
    %cst_120 = arith.constant 6.400000e+01 : f32
    %336 = vector.broadcast %cst_120 : f32 to vector<32x1xf32>
    %337 = arith.divf %335, %336 : vector<32x1xf32>
    %338 = vector.broadcast %330 : vector<32x1xf32> to vector<32x64xf32>
    %339 = arith.subf %324, %338 : vector<32x64xf32>
    %cst_121 = arith.constant 9.99999974E-6 : f32
    %340 = vector.broadcast %cst_121 : f32 to vector<32x1xf32>
    %341 = arith.addf %337, %340 : vector<32x1xf32>
    %342 = math.rsqrt %341 : vector<32x1xf32>
    %343 = vector.broadcast %342 : vector<32x1xf32> to vector<32x64xf32>
    %344 = arith.mulf %339, %343 : vector<32x64xf32>
    %345 = vector.broadcast %325 : vector<1x64xf32> to vector<32x64xf32>
    %346 = arith.mulf %344, %345 : vector<32x64xf32>
    %347 = vector.broadcast %326 : vector<1x64xf32> to vector<32x64xf32>
    %348 = arith.addf %346, %347 : vector<32x64xf32>
    %349 = arith.truncf %348 : vector<32x64xf32> to vector<32x64xbf16>
    %c0_122 = arith.constant 0 : index
    %c0_123 = arith.constant 0 : index
    %350 = vector.load %arg27[%c0_122, %c0_123] : memref<64x256xbf16, #tpu.memory_space<vmem>>, vector<64x256xbf16>
    %cst_124 = arith.constant dense<0.000000e+00> : vector<32x256xf32>
    %351 = tpu.matmul %349, %350, %cst_124 {dimension_numbers = #tpu.dot_dimension_numbers<[1], [0], [0], [1], [0, 0, 1, 1], [], []>} : vector<32x64xbf16>, vector<64x256xbf16>, vector<32x256xf32> -> vector<32x256xf32>
    %c0_125 = arith.constant 0 : index
    %c0_126 = arith.constant 0 : index
    %352 = vector.load %arg28[%c0_125, %c0_126] : memref<1x256xf32, #tpu.memory_space<vmem>>, vector<1x256xf32>
    %353 = vector.broadcast %352 : vector<1x256xf32> to vector<32x256xf32>
    %354 = arith.addf %351, %353 : vector<32x256xf32>
    %cst_127 = arith.constant 0.000000e+00 : f32
    %355 = vector.broadcast %cst_127 : f32 to vector<32x256xf32>
    %356 = arith.maximumf %354, %355 : vector<32x256xf32>
    %357 = arith.truncf %356 : vector<32x256xf32> to vector<32x256xbf16>
    %c0_128 = arith.constant 0 : index
    %c0_129 = arith.constant 0 : index
    %358 = vector.load %arg29[%c0_128, %c0_129] : memref<256x64xbf16, #tpu.memory_space<vmem>>, vector<256x64xbf16>
    %cst_130 = arith.constant dense<0.000000e+00> : vector<32x64xf32>
    %359 = tpu.matmul %357, %358, %cst_130 {dimension_numbers = #tpu.dot_dimension_numbers<[1], [0], [0], [1], [0, 0, 1, 1], [], []>} : vector<32x256xbf16>, vector<256x64xbf16>, vector<32x64xf32> -> vector<32x64xf32>
    %c0_131 = arith.constant 0 : index
    %c0_132 = arith.constant 0 : index
    %360 = vector.load %arg30[%c0_131, %c0_132] : memref<1x64xf32, #tpu.memory_space<vmem>>, vector<1x64xf32>
    %361 = vector.broadcast %360 : vector<1x64xf32> to vector<32x64xf32>
    %362 = arith.addf %359, %361 : vector<32x64xf32>
    %363 = arith.addf %348, %362 : vector<32x64xf32>
    %c0_133 = arith.constant 0 : index
    %c0_134 = arith.constant 0 : index
    %364 = vector.load %arg31[%c0_133, %c0_134] : memref<1x64xf32, #tpu.memory_space<vmem>>, vector<1x64xf32>
    %c0_135 = arith.constant 0 : index
    %c0_136 = arith.constant 0 : index
    %365 = vector.load %arg32[%c0_135, %c0_136] : memref<1x64xf32, #tpu.memory_space<vmem>>, vector<1x64xf32>
    %cst_137 = arith.constant dense<0.000000e+00> : vector<32xf32>
    %366 = vector.multi_reduction <add>, %363, %cst_137 [1] : vector<32x64xf32> to vector<32xf32>
    %367 = vector.shape_cast %366 : vector<32xf32> to vector<32x1xf32>
    %cst_138 = arith.constant 6.400000e+01 : f32
    %368 = vector.broadcast %cst_138 : f32 to vector<32x1xf32>
    %369 = arith.divf %367, %368 : vector<32x1xf32>
    %370 = vector.broadcast %369 : vector<32x1xf32> to vector<32x64xf32>
    %371 = arith.subf %363, %370 : vector<32x64xf32>
    %372 = arith.mulf %371, %371 : vector<32x64xf32>
    %cst_139 = arith.constant dense<0.000000e+00> : vector<32xf32>
    %373 = vector.multi_reduction <add>, %372, %cst_139 [1] : vector<32x64xf32> to vector<32xf32>
    %374 = vector.shape_cast %373 : vector<32xf32> to vector<32x1xf32>
    %cst_140 = arith.constant 6.400000e+01 : f32
    %375 = vector.broadcast %cst_140 : f32 to vector<32x1xf32>
    %376 = arith.divf %374, %375 : vector<32x1xf32>
    %377 = vector.broadcast %369 : vector<32x1xf32> to vector<32x64xf32>
    %378 = arith.subf %363, %377 : vector<32x64xf32>
    %cst_141 = arith.constant 9.99999974E-6 : f32
    %379 = vector.broadcast %cst_141 : f32 to vector<32x1xf32>
    %380 = arith.addf %376, %379 : vector<32x1xf32>
    %381 = math.rsqrt %380 : vector<32x1xf32>
    %382 = vector.broadcast %381 : vector<32x1xf32> to vector<32x64xf32>
    %383 = arith.mulf %378, %382 : vector<32x64xf32>
    %384 = vector.broadcast %364 : vector<1x64xf32> to vector<32x64xf32>
    %385 = arith.mulf %383, %384 : vector<32x64xf32>
    %386 = vector.broadcast %365 : vector<1x64xf32> to vector<32x64xf32>
    %387 = arith.addf %385, %386 : vector<32x64xf32>
    %cst_142 = arith.constant 0.000000e+00 : f32
    %388 = vector.broadcast %cst_142 : f32 to vector<4x64xf32>
    %389 = tpu.concatenate %388, %387, %388 in 0 : vector<4x64xf32>, vector<32x64xf32>, vector<4x64xf32> -> vector<40x64xf32>
    %390 = vector.extract_strided_slice %389 {offsets = [0, 0], sizes = [32, 64], strides = [1, 1]} : vector<40x64xf32> to vector<32x64xf32>
    %391 = vector.extract_strided_slice %389 {offsets = [1, 0], sizes = [32, 64], strides = [1, 1]} : vector<40x64xf32> to vector<32x64xf32>
    %392 = vector.extract_strided_slice %389 {offsets = [2, 0], sizes = [32, 64], strides = [1, 1]} : vector<40x64xf32> to vector<32x64xf32>
    %393 = vector.extract_strided_slice %389 {offsets = [3, 0], sizes = [32, 64], strides = [1, 1]} : vector<40x64xf32> to vector<32x64xf32>
    %394 = vector.extract_strided_slice %389 {offsets = [4, 0], sizes = [32, 64], strides = [1, 1]} : vector<40x64xf32> to vector<32x64xf32>
    %395 = vector.extract_strided_slice %389 {offsets = [5, 0], sizes = [32, 64], strides = [1, 1]} : vector<40x64xf32> to vector<32x64xf32>
    %396 = vector.extract_strided_slice %389 {offsets = [6, 0], sizes = [32, 64], strides = [1, 1]} : vector<40x64xf32> to vector<32x64xf32>
    %397 = vector.extract_strided_slice %389 {offsets = [7, 0], sizes = [32, 64], strides = [1, 1]} : vector<40x64xf32> to vector<32x64xf32>
    %398 = vector.extract_strided_slice %389 {offsets = [8, 0], sizes = [32, 64], strides = [1, 1]} : vector<40x64xf32> to vector<32x64xf32>
    %399 = tpu.concatenate %390, %391, %392, %393, %394, %395, %396, %397, %398 in 1 : vector<32x64xf32>, vector<32x64xf32>, vector<32x64xf32>, vector<32x64xf32>, vector<32x64xf32>, vector<32x64xf32>, vector<32x64xf32>, vector<32x64xf32>, vector<32x64xf32> -> vector<32x576xf32>
    %400 = arith.truncf %399 : vector<32x576xf32> to vector<32x576xbf16>
    %c0_143 = arith.constant 0 : index
    %c0_144 = arith.constant 0 : index
    %401 = vector.load %arg33[%c0_143, %c0_144] : memref<576x32xbf16, #tpu.memory_space<vmem>>, vector<576x32xbf16>
    %cst_145 = arith.constant dense<0.000000e+00> : vector<32x32xf32>
    %402 = tpu.matmul %400, %401, %cst_145 {dimension_numbers = #tpu.dot_dimension_numbers<[1], [0], [0], [1], [0, 0, 1, 1], [], []>} : vector<32x576xbf16>, vector<576x32xbf16>, vector<32x32xf32> -> vector<32x32xf32>
    %c0_146 = arith.constant 0 : index
    %c0_147 = arith.constant 0 : index
    %403 = vector.load %arg34[%c0_146, %c0_147] : memref<1x32xf32, #tpu.memory_space<vmem>>, vector<1x32xf32>
    %404 = vector.broadcast %403 : vector<1x32xf32> to vector<32x32xf32>
    %405 = arith.addf %402, %404 : vector<32x32xf32>
    %cst_148 = arith.constant 0.000000e+00 : f32
    %406 = vector.broadcast %cst_148 : f32 to vector<32x32xf32>
    %407 = arith.maximumf %405, %406 : vector<32x32xf32>
    %cst_149 = arith.constant dense<0.000000e+00> : vector<32xf32>
    %408 = vector.multi_reduction <add>, %407, %cst_149 [0] : vector<32x32xf32> to vector<32xf32>
    %409 = vector.shape_cast %408 : vector<32xf32> to vector<1x32xf32>
    %cst_150 = arith.constant 3.200000e+01 : f32
    %410 = vector.broadcast %cst_150 : f32 to vector<1x32xf32>
    %411 = arith.divf %409, %410 : vector<1x32xf32>
    %412 = arith.truncf %411 : vector<1x32xf32> to vector<1x32xbf16>
    %c0_151 = arith.constant 0 : index
    %c0_152 = arith.constant 0 : index
    %413 = vector.load %arg35[%c0_151, %c0_152] : memref<32x16xbf16, #tpu.memory_space<vmem>>, vector<32x16xbf16>
    %cst_153 = arith.constant dense<0.000000e+00> : vector<1x16xf32>
    %414 = tpu.matmul %412, %413, %cst_153 {dimension_numbers = #tpu.dot_dimension_numbers<[1], [0], [0], [1], [0, 0, 1, 1], [], []>} : vector<1x32xbf16>, vector<32x16xbf16>, vector<1x16xf32> -> vector<1x16xf32>
    %c0_154 = arith.constant 0 : index
    %c0_155 = arith.constant 0 : index
    %415 = vector.load %arg36[%c0_154, %c0_155] : memref<1x16xf32, #tpu.memory_space<vmem>>, vector<1x16xf32>
    %416 = arith.addf %414, %415 : vector<1x16xf32>
    %cst_156 = arith.constant 0.000000e+00 : f32
    %417 = vector.broadcast %cst_156 : f32 to vector<1x16xf32>
    %418 = arith.maximumf %416, %417 : vector<1x16xf32>
    %419 = arith.truncf %418 : vector<1x16xf32> to vector<1x16xbf16>
    %c0_157 = arith.constant 0 : index
    %c0_158 = arith.constant 0 : index
    %420 = vector.load %arg37[%c0_157, %c0_158] : memref<16x3xbf16, #tpu.memory_space<vmem>>, vector<16x3xbf16>
    %cst_159 = arith.constant dense<0.000000e+00> : vector<1x3xf32>
    %421 = tpu.matmul %419, %420, %cst_159 {dimension_numbers = #tpu.dot_dimension_numbers<[1], [0], [0], [1], [0, 0, 1, 1], [], []>} : vector<1x16xbf16>, vector<16x3xbf16>, vector<1x3xf32> -> vector<1x3xf32>
    %c0_160 = arith.constant 0 : index
    %c0_161 = arith.constant 0 : index
    %422 = vector.load %arg38[%c0_160, %c0_161] : memref<1x3xf32, #tpu.memory_space<vmem>>, vector<1x3xf32>
    %423 = arith.addf %421, %422 : vector<1x3xf32>
    %c0_162 = arith.constant 0 : index
    %c0_163 = arith.constant 0 : index
    %c0_164 = arith.constant 0 : index
    %424 = vector.load %arg39[%c0_162, %c0_163, %c0_164] : memref<1x1x3xf32, #tpu.memory_space<vmem>>, vector<1x1x3xf32>
    %425 = vector.shape_cast %424 : vector<1x1x3xf32> to vector<1x3xf32>
    %426 = vector.shape_cast %423 : vector<1x3xf32> to vector<1x1x3xf32>
    tpu.vector_store %arg39[%c0_162, %c0_163, %c0_164], %426 {strides = array<i32>} : memref<1x1x3xf32, #tpu.memory_space<vmem>>, vector<1x1x3xf32>,
    return
  }
  func.func @transform_0(%arg0: i32) -> (i32, i32, i32) {
    %c0_i32 = arith.constant 0 : i32
    %c0_i32_0 = arith.constant 0 : i32
    %c0_i32_1 = arith.constant 0 : i32
    return %arg0, %c0_i32, %c0_i32_0 : i32, i32, i32
  }
  func.func @transform_1(%arg0: i32) -> (i32, i32) {
    %c0_i32 = arith.constant 0 : i32
    %c0_i32_0 = arith.constant 0 : i32
    %c0_i32_1 = arith.constant 0 : i32
    return %c0_i32, %c0_i32_0 : i32, i32
  }
  func.func @transform_2(%arg0: i32) -> (i32, i32) {
    %c0_i32 = arith.constant 0 : i32
    %c0_i32_0 = arith.constant 0 : i32
    %c0_i32_1 = arith.constant 0 : i32
    return %c0_i32, %c0_i32_0 : i32, i32
  }
  func.func @transform_3(%arg0: i32) -> (i32, i32) {
    %c0_i32 = arith.constant 0 : i32
    %c0_i32_0 = arith.constant 0 : i32
    %c0_i32_1 = arith.constant 0 : i32
    return %c0_i32, %c0_i32_0 : i32, i32
  }
  func.func @transform_4(%arg0: i32) -> (i32, i32) {
    %c0_i32 = arith.constant 0 : i32
    %c0_i32_0 = arith.constant 0 : i32
    %c0_i32_1 = arith.constant 0 : i32
    return %c0_i32, %c0_i32_0 : i32, i32
  }
  func.func @transform_5(%arg0: i32) -> (i32, i32) {
    %c0_i32 = arith.constant 0 : i32
    %c0_i32_0 = arith.constant 0 : i32
    %c0_i32_1 = arith.constant 0 : i32
    return %c0_i32, %c0_i32_0 : i32, i32
  }
  func.func @transform_6(%arg0: i32) -> (i32, i32) {
    %c0_i32 = arith.constant 0 : i32
    %c0_i32_0 = arith.constant 0 : i32
    %c0_i32_1 = arith.constant 0 : i32
    return %c0_i32, %c0_i32_0 : i32, i32
  }
  func.func @transform_7(%arg0: i32) -> (i32, i32) {
    %c0_i32 = arith.constant 0 : i32
    %c0_i32_0 = arith.constant 0 : i32
    %c0_i32_1 = arith.constant 0 : i32
    return %c0_i32, %c0_i32_0 : i32, i32
  }
  func.func @transform_8(%arg0: i32) -> (i32, i32) {
    %c0_i32 = arith.constant 0 : i32
    %c0_i32_0 = arith.constant 0 : i32
    %c0_i32_1 = arith.constant 0 : i32
    return %c0_i32, %c0_i32_0 : i32, i32
  }
  func.func @transform_9(%arg0: i32) -> (i32, i32) {
    %c0_i32 = arith.constant 0 : i32
    %c0_i32_0 = arith.constant 0 : i32
    %c0_i32_1 = arith.constant 0 : i32
    return %c0_i32, %c0_i32_0 : i32, i32
  }
  func.func @transform_10(%arg0: i32) -> (i32, i32) {
    %c0_i32 = arith.constant 0 : i32
    %c0_i32_0 = arith.constant 0 : i32
    %c0_i32_1 = arith.constant 0 : i32
    return %c0_i32, %c0_i32_0 : i32, i32
  }
  func.func @transform_11(%arg0: i32) -> (i32, i32) {
    %c0_i32 = arith.constant 0 : i32
    %c0_i32_0 = arith.constant 0 : i32
    %c0_i32_1 = arith.constant 0 : i32
    return %c0_i32, %c0_i32_0 : i32, i32
  }
  func.func @transform_12(%arg0: i32) -> (i32, i32) {
    %c0_i32 = arith.constant 0 : i32
    %c0_i32_0 = arith.constant 0 : i32
    %c0_i32_1 = arith.constant 0 : i32
    return %c0_i32, %c0_i32_0 : i32, i32
  }
  func.func @transform_13(%arg0: i32) -> (i32, i32) {
    %c0_i32 = arith.constant 0 : i32
    %c0_i32_0 = arith.constant 0 : i32
    %c0_i32_1 = arith.constant 0 : i32
    return %c0_i32, %c0_i32_0 : i32, i32
  }
  func.func @transform_14(%arg0: i32) -> (i32, i32) {
    %c0_i32 = arith.constant 0 : i32
    %c0_i32_0 = arith.constant 0 : i32
    %c0_i32_1 = arith.constant 0 : i32
    return %c0_i32, %c0_i32_0 : i32, i32
  }
  func.func @transform_15(%arg0: i32) -> (i32, i32) {
    %c0_i32 = arith.constant 0 : i32
    %c0_i32_0 = arith.constant 0 : i32
    %c0_i32_1 = arith.constant 0 : i32
    return %c0_i32, %c0_i32_0 : i32, i32
  }
  func.func @transform_16(%arg0: i32) -> (i32, i32) {
    %c0_i32 = arith.constant 0 : i32
    %c0_i32_0 = arith.constant 0 : i32
    %c0_i32_1 = arith.constant 0 : i32
    return %c0_i32, %c0_i32_0 : i32, i32
  }
  func.func @transform_17(%arg0: i32) -> (i32, i32) {
    %c0_i32 = arith.constant 0 : i32
    %c0_i32_0 = arith.constant 0 : i32
    %c0_i32_1 = arith.constant 0 : i32
    return %c0_i32, %c0_i32_0 : i32, i32
  }
  func.func @transform_18(%arg0: i32) -> (i32, i32) {
    %c0_i32 = arith.constant 0 : i32
    %c0_i32_0 = arith.constant 0 : i32
    %c0_i32_1 = arith.constant 0 : i32
    return %c0_i32, %c0_i32_0 : i32, i32
  }
  func.func @transform_19(%arg0: i32) -> (i32, i32) {
    %c0_i32 = arith.constant 0 : i32
    %c0_i32_0 = arith.constant 0 : i32
    %c0_i32_1 = arith.constant 0 : i32
    return %c0_i32, %c0_i32_0 : i32, i32
  }
  func.func @transform_20(%arg0: i32) -> (i32, i32) {
    %c0_i32 = arith.constant 0 : i32
    %c0_i32_0 = arith.constant 0 : i32
    %c0_i32_1 = arith.constant 0 : i32
    return %c0_i32, %c0_i32_0 : i32, i32
  }
  func.func @transform_21(%arg0: i32) -> (i32, i32) {
    %c0_i32 = arith.constant 0 : i32
    %c0_i32_0 = arith.constant 0 : i32
    %c0_i32_1 = arith.constant 0 : i32
    return %c0_i32, %c0_i32_0 : i32, i32
  }
  func.func @transform_22(%arg0: i32) -> (i32, i32) {
    %c0_i32 = arith.constant 0 : i32
    %c0_i32_0 = arith.constant 0 : i32
    %c0_i32_1 = arith.constant 0 : i32
    return %c0_i32, %c0_i32_0 : i32, i32
  }
  func.func @transform_23(%arg0: i32) -> (i32, i32) {
    %c0_i32 = arith.constant 0 : i32
    %c0_i32_0 = arith.constant 0 : i32
    %c0_i32_1 = arith.constant 0 : i32
    return %c0_i32, %c0_i32_0 : i32, i32
  }
  func.func @transform_24(%arg0: i32) -> (i32, i32) {
    %c0_i32 = arith.constant 0 : i32
    %c0_i32_0 = arith.constant 0 : i32
    %c0_i32_1 = arith.constant 0 : i32
    return %c0_i32, %c0_i32_0 : i32, i32
  }
  func.func @transform_25(%arg0: i32) -> (i32, i32) {
    %c0_i32 = arith.constant 0 : i32
    %c0_i32_0 = arith.constant 0 : i32
    %c0_i32_1 = arith.constant 0 : i32
    return %c0_i32, %c0_i32_0 : i32, i32
  }
  func.func @transform_26(%arg0: i32) -> (i32, i32) {
    %c0_i32 = arith.constant 0 : i32
    %c0_i32_0 = arith.constant 0 : i32
    %c0_i32_1 = arith.constant 0 : i32
    return %c0_i32, %c0_i32_0 : i32, i32
  }
  func.func @transform_27(%arg0: i32) -> (i32, i32) {
    %c0_i32 = arith.constant 0 : i32
    %c0_i32_0 = arith.constant 0 : i32
    %c0_i32_1 = arith.constant 0 : i32
    return %c0_i32, %c0_i32_0 : i32, i32
  }
  func.func @transform_28(%arg0: i32) -> (i32, i32) {
    %c0_i32 = arith.constant 0 : i32
    %c0_i32_0 = arith.constant 0 : i32
    %c0_i32_1 = arith.constant 0 : i32
    return %c0_i32, %c0_i32_0 : i32, i32
  }
  func.func @transform_29(%arg0: i32) -> (i32, i32) {
    %c0_i32 = arith.constant 0 : i32
    %c0_i32_0 = arith.constant 0 : i32
    %c0_i32_1 = arith.constant 0 : i32
    return %c0_i32, %c0_i32_0 : i32, i32
  }
  func.func @transform_30(%arg0: i32) -> (i32, i32) {
    %c0_i32 = arith.constant 0 : i32
    %c0_i32_0 = arith.constant 0 : i32
    %c0_i32_1 = arith.constant 0 : i32
    return %c0_i32, %c0_i32_0 : i32, i32
  }
  func.func @transform_31(%arg0: i32) -> (i32, i32) {
    %c0_i32 = arith.constant 0 : i32
    %c0_i32_0 = arith.constant 0 : i32
    %c0_i32_1 = arith.constant 0 : i32
    return %c0_i32, %c0_i32_0 : i32, i32
  }
  func.func @transform_32(%arg0: i32) -> (i32, i32) {
    %c0_i32 = arith.constant 0 : i32
    %c0_i32_0 = arith.constant 0 : i32
    %c0_i32_1 = arith.constant 0 : i32
    return %c0_i32, %c0_i32_0 : i32, i32
  }
  func.func @transform_33(%arg0: i32) -> (i32, i32) {
    %c0_i32 = arith.constant 0 : i32
    %c0_i32_0 = arith.constant 0 : i32
    %c0_i32_1 = arith.constant 0 : i32
    return %c0_i32, %c0_i32_0 : i32, i32
  }
  func.func @transform_34(%arg0: i32) -> (i32, i32) {
    %c0_i32 = arith.constant 0 : i32
    %c0_i32_0 = arith.constant 0 : i32
    %c0_i32_1 = arith.constant 0 : i32
    return %c0_i32, %c0_i32_0 : i32, i32
  }
  func.func @transform_35(%arg0: i32) -> (i32, i32) {
    %c0_i32 = arith.constant 0 : i32
    %c0_i32_0 = arith.constant 0 : i32
    %c0_i32_1 = arith.constant 0 : i32
    return %c0_i32, %c0_i32_0 : i32, i32
  }
  func.func @transform_36(%arg0: i32) -> (i32, i32) {
    %c0_i32 = arith.constant 0 : i32
    %c0_i32_0 = arith.constant 0 : i32
    %c0_i32_1 = arith.constant 0 : i32
    return %c0_i32, %c0_i32_0 : i32, i32
  }
  func.func @transform_37(%arg0: i32) -> (i32, i32) {
    %c0_i32 = arith.constant 0 : i32
    %c0_i32_0 = arith.constant 0 : i32
    %c0_i32_1 = arith.constant 0 : i32
    return %c0_i32, %c0_i32_0 : i32, i32
  }
  func.func @transform_38(%arg0: i32) -> (i32, i32, i32) {
    %c0_i32 = arith.constant 0 : i32
    %c0_i32_0 = arith.constant 0 : i32
    %c0_i32_1 = arith.constant 0 : i32
    return %arg0, %c0_i32, %c0_i32_0 : i32, i32, i32
  }
}

</mosaic_0001>

<bundles_post_ra>
// kernel: cnn_transformer_forward.1
= control target key start
LH: loop header
LB: loop body
LE: loop exit
PB: predicated region body
PF: predicated region fallthrough
CT: control target
= control target key end

     0   :  { %s7879_s6 = smov 1   ;;  %s7880_s10 = smov 2   ;;  %s9801_s0 = inlined_call_operand.smem [shape: u32[39], index: -1, kind: input, shape index: {}] }
   0x1   :  { %s7952_s5 = sld [smem:[%s9801_s0]]   ;;  %s7881_s14 = smov 3  }
   0x2   :  { %s7957_s9 = sld [smem:[%s9801_s0 + %s7879_s6]]   ;;  %s7882_s18 = smov 4  }
   0x3   :  { %s7962_s13 = sld [smem:[%s9801_s0 + %s7880_s10]]   ;;  %s7883_s22 = smov 5  }
   0x4   :  { %s7967_s17 = sld [smem:[%s9801_s0 + %s7881_s14]]   ;;  %s7884_s26 = smov 6  }
   0x5   :  { %s7972_s21 = sld [smem:[%s9801_s0 + %s7882_s18]]   ;;  %s7885_s30 = smov 7  }
   0x6   :  { %s7977_s25 = sld [smem:[%s9801_s0 + %s7883_s22]]   ;;  %s7886_s4 = smov 8  }
   0x7   :  { %9832 = sst [smem:[#allocation5_spill]] %s7952_s5  ;;  %s7887_s10 = smov 9  }
   0x8   :  { %9833 = sst [smem:[#allocation6_spill]] %s7957_s9  ;;  %s7888_s15 = smov 10  }
   0x9   :  { %s7982_s29 = sld [smem:[%s9801_s0 + %s7884_s26]]   ;;  %s7889_s20 = smov 11  }
   0xa   :  { %s7987_s3 = sld [smem:[%s9801_s0 + %s7885_s30]]   ;;  %s7890_s26 = smov 12  }
   0xb   :  { %s7992_s8 = sld [smem:[%s9801_s0 + %s7886_s4]]   ;;  %s7891_s1 = smov 13  }
   0xc   :  { %s7997_s14 = sld [smem:[%s9801_s0 + %s7887_s10]]   ;;  %s7892_s7 = smov 14  }
   0xd   :  { %s8002_s19 = sld [smem:[%s9801_s0 + %s7888_s15]]   ;;  %s7893_s15 = smov 15  }
   0xe   :  { %s8007_s24 = sld [smem:[%s9801_s0 + %s7889_s20]]   ;;  %s7894_s22 = smov 16  }
   0xf   :  { %s8012_s30 = sld [smem:[%s9801_s0 + %s7890_s26]]   ;;  %s7895_s28 = smov 17  }
  0x10   :  { %9834 = sst [smem:[#allocation7_spill]] %s7987_s3 }
  0x11   :  { %9835 = sst [smem:[#allocation8_spill]] %s7992_s8 }
  0x12   :  { %s8017_s6 = sld [smem:[%s9801_s0 + %s7891_s1]]  }
  0x13   :  { %s8022_s12 = sld [smem:[%s9801_s0 + %s7892_s7]]   ;;  %s7896_s7 = smov 18  }
  0x14   :  { %s8027_s20 = sld [smem:[%s9801_s0 + %s7893_s15]]   ;;  %s7897_s15 = smov 19  }
  0x15   :  { %9836 = sst [smem:[#allocation9_spill]] %s8012_s30 }
  0x16   :  { %s8032_s27 = sld [smem:[%s9801_s0 + %s7894_s22]]   ;;  %s7898_s22 = smov 20  }
  0x17   :  { %s8037_s4 = sld [smem:[%s9801_s0 + %s7895_s28]]   ;;  %s7899_s28 = smov 21  }
  0x18   :  { %9837 = sst [smem:[#allocation10_spill]] %s8017_s6 }
  0x19   :  { %9838 = sst [smem:[#allocation11_spill]] %s8022_s12 }
  0x1a   :  { %9839 = sst [smem:[#allocation12_spill]] %s8027_s20 }
  0x1b   :  { %s8042_s6 = sld [smem:[%s9801_s0 + %s7896_s7]]   ;;  %s7900_s7 = smov 22  }
  0x1c   :  { %s8047_s20 = sld [smem:[%s9801_s0 + %s7897_s15]]   ;;  %s7901_s15 = smov 23  }
  0x1d   :  { %9840 = sst [smem:[#allocation13_spill]] %s8037_s4 }
  0x1e   :  { %s8052_s30 = sld [smem:[%s9801_s0 + %s7898_s22]]   ;;  %s7902_s22 = smov 24  }
  0x1f   :  { %s8057_s4 = sld [smem:[%s9801_s0 + %s7899_s28]]   ;;  %s7903_s28 = smov 25  }
  0x21   :  { %9841 = sst [smem:[#allocation14_spill]] %s8042_s6 }
  0x22   :  { %9842 = sst [smem:[#allocation15_spill]] %s8047_s20 }
  0x23   :  { %s8062_s6 = sld [smem:[%s9801_s0 + %s7900_s7]]   ;;  %s7904_s7 = smov 26  }
  0x24   :  { %9843 = sst [smem:[#allocation16_spill]] %s8052_s30 }
  0x25   :  { %9844 = sst [smem:[#allocation17_spill]] %s8057_s4 }
  0x26   :  { %s8067_s20 = sld [smem:[%s9801_s0 + %s7901_s15]]   ;;  %s7905_s15 = smov 27  }
  0x27   :  { %s8072_s30 = sld [smem:[%s9801_s0 + %s7902_s22]]   ;;  %s7906_s22 = smov 28  }
  0x28   :  { %s8077_s4 = sld [smem:[%s9801_s0 + %s7903_s28]]   ;;  %s7907_s28 = smov 29  }
  0x29   :  { %9845 = sst [smem:[#allocation18_spill]] %s8062_s6 }
  0x2a   :  { %s8082_s6 = sld [smem:[%s9801_s0 + %s7904_s7]]   ;;  %s7908_s7 = smov 30  }
  0x2c   :  { %9846 = sst [smem:[#allocation19_spill]] %s8067_s20 }
  0x2d   :  { %9847 = sst [smem:[#allocation20_spill]] %s8072_s30 }
  0x2e   :  { %9848 = sst [smem:[#allocation21_spill]] %s8077_s4 }
  0x2f   :  { %s8087_s20 = sld [smem:[%s9801_s0 + %s7905_s15]]   ;;  %s7909_s15 = smov 31  }
  0x30   :  { %9849 = sst [smem:[#allocation22_spill]] %s8082_s6 }
  0x31   :  { %s8092_s30 = sld [smem:[%s9801_s0 + %s7906_s22]]   ;;  %s7910_s22 = smov 32  }
  0x32   :  { %s8097_s4 = sld [smem:[%s9801_s0 + %s7907_s28]]   ;;  %s7911_s28 = smov 33  }
  0x33   :  { %s8102_s6 = sld [smem:[%s9801_s0 + %s7908_s7]]   ;;  %s7912_s7 = smov 34  }
  0x35   :  { %9850 = sst [smem:[#allocation23_spill]] %s8087_s20 }
  0x36   :  { %s8107_s20 = sld [smem:[%s9801_s0 + %s7909_s15]]   ;;  %s7913_s15 = smov 35  }
  0x37   :  { %9851 = sst [smem:[#allocation24_spill]] %s8092_s30 }
  0x38   :  { %9852 = sst [smem:[#allocation25_spill]] %s8097_s4 }
  0x39   :  { %9853 = sst [smem:[#allocation26_spill]] %s8102_s6 }
  0x3a   :  { %s8112_s30 = sld [smem:[%s9801_s0 + %s7910_s22]]   ;;  %s7914_s22 = smov 36  }
  0x3b   :  { %s8117_s4 = sld [smem:[%s9801_s0 + %s7911_s28]]   ;;  %s7915_s28 = smov 37  }
  0x3c   :  { %9854 = sst [smem:[#allocation27_spill]] %s8107_s20 }
  0x3d   :  { %s8122_s6 = sld [smem:[%s9801_s0 + %s7912_s7]]   ;;  %s7916_s7 = smov 38  }
  0x3e   :  { %s8127_s20 = sld [smem:[%s9801_s0 + %s7913_s15]]  }
  0x40   :  { %9855 = sst [smem:[#allocation28_spill]] %s8112_s30 }
  0x41   :  { %9856 = sst [smem:[#allocation29_spill]] %s8117_s4 }
  0x42   :  { %s8132_s30 = sld [smem:[%s9801_s0 + %s7914_s22]]  }
  0x43   :  { %9857 = sst [smem:[#allocation30_spill]] %s8122_s6 }
  0x44   :  { %s8137_s4 = sld [smem:[%s9801_s0 + %s7915_s28]]  }
  0x45   :  { %s8142_s6 = sld [smem:[%s9801_s0 + %s7916_s7]]  }
  0x4a   :  { %9858 = sst [smem:[#allocation31_spill]] %s8137_s4 }
  0x4b   :  { %82 = vsyncpa [#allocation3], 0 }
  0x4c   :  { %84 = vsyncpa [#allocation3 + $0x1], 0  ;;  %s8144_s15 = smov 0   ;;  %s8146_s16 = smov 0  }
  0x4d   :  { %s8148_s18 = smov 0   ;;  %s8150_s22 = smov 0  }
  0x4e LB: > { %s9859_s12 = sld [smem:[#allocation11_spill]]  ;;  %s8165_s0 = sadd.s32 4294967295, %s7877_s22   ;;  %s7877_s22 = sphi %s8150_s22, %s9909_s22   ;;  %s7873_s18 = sphi %s8148_s18, %s9908_s18   ;;  %s7869_s16 = sphi %s8146_s16, %s9907_s16   ;;  %s7865_s15 = sphi %s8144_s15, %s9906_s15  }
  0x4f   : > { %s9860_s9 = sld [smem:[#allocation6_spill]]  ;;  %s6298_s23 = sadd.s32 4294967294, %s7877_s22  }
  0x50   : > { %s9861_s8 = sld [smem:[#allocation8_spill]]  ;;  %s8169_s26 = sadd.s32 1, %s7877_s22  }
  0x51   : > { %s9862_s3 = sld [smem:[#allocation7_spill]]  ;;  %s900_s28 = sadd.s32 1, %s7873_s18 }
  0x52   : > { %s897_s1 = ssub.s32 %s7877_s22, %s8169_s26  ;;  %p910_p0 = scmp.ne.s32.totalorder %s7873_s18, %s7869_s16 }
  0x53   : > { %p898_p1 = scmp.eq.s32.totalorder %s897_s1, 0  ;;  %p911_p2 = scmp.eq.s32.totalorder %s8165_s0, 1 }
  0x54   : > { %p916_p3 = scmp.ne.s32.totalorder %s7869_s16, %s7865_s15  ;;  %p917_p4 = scmp.eq.s32.totalorder %s6298_s23, 1 }
  0x55   : > { %s8180_s2 = scalar_select %p898_p1, %s7873_s18, %s900_s28  }
  0x56   : > { %p8182_p5 = por %p911_p2, %p910_p0  ;;  %p8186_p6 = por %p917_p4, %p916_p3 }
  0x57   : > { %p6301_p7 = scmp.ge.s32.totalorder %s7877_s22, 1  ;;  %p1054_p8 = scmp.lt.s32.totalorder %s7877_s22, 3 }
  0x59   : > { %p1055_p9 = pnand %p6301_p7, %p1054_p8 }
  0x5a   : > { %s9865_s5 = sld [smem:[#allocation5_spill]] (!%p1055_p9)  ;;  %p1147_p10 = scmp.lt.s32.totalorder (!%p1055_p9), %s8165_s0, 1 }
  0x5b   : > { %1058 = sbr.rel (%p1055_p9) target bundleno = 8107 (0x1fab), region = 172  ;;  %s7918_s1 = smov (!%p1055_p9), 5  }
  0x5c   : > { %s9905_s4 = sld [smem:[#allocation31_spill]] (!%p1055_p9) }
  0x60   : > { %s1148_s11 = scalar_select %p1147_p10, %s8165_s0, 1  ;;  %vm1161_vm0 = vcmask 1041408   ;;  %vm1178_vm1 = vcmask 1046528   ;;  %v7917_v2 = vmov 0.0   ;;  %vm1222_vm2 = vcmask 1044480  }
  0x61   : > { %v8196_v3 = vrot.slane %v7917_v2, 1  ;;  %vm1200_vm3 = vcmask 1045504   ;;  %vm1244_vm4 = vcmask 1043456   ;;  %v8199_v10 = vrot.slane %v7917_v2, 2 }
  0x62   : > { %s6522_s23 = sshll.u32 %s1148_s11, 5  ;;  %v8211_v14 = vrot.slane %v7917_v2, 4  ;;  %v8223_v22 = vrot.slane %v7917_v2, 3  ;;  %s7919_s11 = smov 15   ;;  %vm1266_vm5 = vcmask 1042432   ;;  %v1267_v56 = vrot.slane %v7917_v2, 5 }
  0x63   : > { %s1151_s28 = scalar_lea.vmem %s9865_s5, %s6522_s23  ;;  %s7920_s23 = smov 10   ;;  %v1288_v57 = vrot.slane %v7917_v2, 6  ;;  %vm9808_vm6 = vcmask 1040384   ;;  %vm1442_vm7 = vcmask 39936   ;;  %vm1447_vm8 = vcmask 80896  }
  0x64   : > { %v1155_v0 = vld [vmem:[%s1151_s28 + $0x10] sm:$0xff]  ;;  %v1156_v1 = vld [vmem:[%s1151_s28 + $0x18] sm:$0xff]  ;;  %v1154_v4 = vld [vmem:[%s1151_s28 + $0x8] sm:$0xff]  ;;  %vm1452_vm9 = vcmask 121856   ;;  %vm1457_vm10 = vcmask 162816   ;;  %vm1462_vm11 = vcmask 203776  }
  0x65   : > { %v1165_v5 = vrot.slane %v1155_v0, 6  ;;  %v1167_v6 = vrot.slane %v1156_v1, 6  ;;  %v1163_v7 = vrot.slane %v1154_v4, 6  ;;  %v1153_v8 = vld [vmem:[%s1151_s28] sm:$0xff]  ;;  %s7921_s28 = smov 20   ;;  %vm1467_vm12 = vcmask 244736  }
  0x66   : > { %v1162_v9 = vrot.slane %v1153_v8, 6  ;;  %vm1472_vm13 = vcmask 285696   ;;  %vm1477_vm14 = vcmask 326656   ;;  %vm1482_vm15 = vcmask 367616   ;;  %s9872_s5 = smov 96  }
  0x67   : > { %v8202_v11 = vsel %vm1161_vm0, %v1165_v5, %v1167_v6  ;;  %v8205_v12 = vsel %vm1161_vm0, %v1167_v6, 0.0  ;;  %v8208_v13 = vsel %vm1161_vm0, %v1163_v7, %v1165_v5 }
  0x68   : > { %v1186_v15 = vrot.slane %v8202_v11, 1  ;;  %v1344_v16 = vrot.slane %v8205_v12, 1  ;;  %v1184_v17 = vrot.slane %v8208_v13, 1  ;;  %v8217_v18 = vsel %vm1161_vm0, %v1162_v9, %v1163_v7 }
  0x69   : > { %v1182_v19 = vrot.slane %v8217_v18, 1  ;;  %v1226_v20 = vrot.slane %v8217_v18, 3  ;;  %v1228_v21 = vrot.slane %v8208_v13, 3  ;;  %v1230_v30 = vrot.slane %v8202_v11, 3 }
  0x6a   : > { %v8226_v23 = vsel %vm1178_vm1, %v1186_v15, %v1344_v16  ;;  %v1517_v24 = vsel %vm1178_vm1, %v1344_v16, %v8196_v3  ;;  %v8231_v25 = vsel %vm1178_vm1, %v1184_v17, %v1186_v15  ;;  %v1204_v31 = vrot.slane %v8217_v18, 2 }
  0x6b   : > { %v7096_v26 = vpack.i.bf16 %v1517_v24, %v8226_v23  ;;  %v8235_v27 = vsel %vm1178_vm1, %v1182_v19, %v1184_v17  ;;  %v8242_v29 = vsel %vm1222_vm2, %v1226_v20, %v1228_v21  ;;  %v8248_v32 = vsel %vm1161_vm0, 0.0, %v1162_v9 }
  0x6c   : > { %v7086_v28 = vpack.i.bf16 %v8231_v25, %v8235_v27  ;;  %v1206_v33 = vrot.slane %v8208_v13, 2  ;;  %v1208_v34 = vrot.slane %v8202_v11, 2  ;;  %v1248_v35 = vrot.slane %v8217_v18, 4 }
  0x6d   : > { %7097 = vrot.lane.b32.xlu1 %v7096_v26, %s7918_s1  ;;  %v8255_v36 = vsel %vm1222_vm2, %v1228_v21, %v1230_v30  ;;  %v1250_v37 = vrot.slane %v8208_v13, 4  ;;  %v1252_v38 = vrot.slane %v8202_v11, 4  ;;  %v1358_v39 = vrot.slane %v8205_v12, 2 }
  0x6e   : > { %7087 = vrot.lane.b32.xlu0 %v7086_v28, %s7918_s1  ;;  %v7101_v40 = vpack.i.bf16 %v8255_v36, %v8242_v29  ;;  %v8263_v41 = vsel %vm1200_vm3, %v1204_v31, %v1206_v33  ;;  %v8266_v42 = vsel %vm1200_vm3, %v1206_v33, %v1208_v34  ;;  %v1386_v43 = vrot.slane %v8205_v12, 4 }
  0x6f   : > { %v7091_v44 = vpack.i.bf16 %v8266_v42, %v8263_v41  ;;  %v8272_v45 = vsel %vm1244_vm4, %v1248_v35, %v1250_v37  ;;  %v8275_v46 = vsel %vm1244_vm4, %v1250_v37, %v1252_v38  ;;  %v8278_v47 = vsel %vm1200_vm3, %v1208_v34, %v1358_v39 }
  0x70   : > { %v7111_v48 = vpack.i.bf16 %v8275_v46, %v8272_v45  ;;  %v1524_v49 = vsel %vm1200_vm3, %v1358_v39, %v8199_v10  ;;  %v8286_v50 = vsel %vm1244_vm4, %v1252_v38, %v1386_v43  ;;  %v1538_v52 = vsel %vm1244_vm4, %v1386_v43, %v8211_v14 }
  0x71   : > { %7102 = vrot.lane.b32.xlu1 %v7101_v40, %s7919_s11  ;;  %v7106_v51 = vpack.i.bf16 %v1524_v49, %v8278_v47  ;;  %v1372_v53 = vrot.slane %v8205_v12, 3  ;;  %v1202_v54 = vrot.slane %v8248_v32, 2  ;;  %v1180_v55 = vrot.slane %v8248_v32, 1 }
  0x72   : > { %7092 = vrot.lane.b32.xlu0 %v7091_v44, %s7920_s23  ;;  %v7121_v60 = vpack.i.bf16 %v1538_v52, %v8286_v50  ;;  %v1246_v0 = vrot.slane %v8248_v32, 4  ;;  %v1270_v4 = vrot.slane %v8217_v18, 5  ;;  %v1272_v5 = vrot.slane %v8208_v13, 5 }
  0x73   : > { %v8298_v58 = vsel %vm1222_vm2, %v1230_v30, %v1372_v53  ;;  %v1531_v59 = vsel %vm1222_vm2, %v1372_v53, %v8223_v22  ;;  %v1203_v62 = vsel %vm1200_vm3, %v8199_v10, %v1202_v54  ;;  %v8309_v63 = vsel %vm1200_vm3, %v1202_v54, %v1204_v31 }
  0x74   : > { %v7116_v61 = vpack.i.bf16 %v1531_v59, %v8298_v58  ;;  %v8313_v1 = vsel %vm1178_vm1, %v1180_v55, %v1182_v19  ;;  %v1274_v6 = vrot.slane %v8202_v11, 5  ;;  %v1291_v7 = vrot.slane %v8217_v18, 6 }
  0x75   : > { %7112 = vrot.lane.b32.xlu1 %v7111_v48, %s7921_s28  ;;  %v1293_v8 = vrot.slane %v8208_v13, 6  ;;  %v7131_v9 = vpack.i.bf16 %v8309_v63, %v1203_v62  ;;  %v1181_v10 = vsel %vm1178_vm1, %v8196_v3, %v1180_v55  ;;  %v1247_v15 = vsel %vm1244_vm4, %v8211_v14, %v1246_v0 }
  0x76   : > { %7107 = vrot.lane.b32.xlu0 %v7106_v51, %s7920_s23  ;;  %v8328_v16 = vsel %vm1244_vm4, %v1246_v0, %v1248_v35  ;;  %v7126_v17 = vpack.i.bf16 %v8313_v1, %v1181_v10  ;;  %v1224_v19 = vrot.slane %v8248_v32, 3  ;;  %v1268_v21 = vrot.slane %v8248_v32, 5 }
  0x77   : > { %v1295_v24 = vrot.slane %v8202_v11, 6  ;;  %v1313_v26 = vrot.slane %v8217_v18, 7  ;;  %v1315_v3 = vrot.slane %v8208_v13, 7  ;;  %v1289_v28 = vrot.slane %v8248_v32, 6 }
  0x78   : > { %v7141_v14 = vpack.i.bf16 %v8328_v16, %v1247_v15  ;;  %v1225_v30 = vsel %vm1222_vm2, %v8223_v22, %v1224_v19  ;;  %v1227_v31 = vsel %vm1222_vm2, %v1224_v19, %v1226_v20  ;;  %v8345_v33 = vsel %vm1266_vm5, %v1270_v4, %v1272_v5 }
  0x79   : > { %7122 = vrot.lane.b32.xlu1 %v7121_v60, %s7921_s28  ;;  %v8350_v34 = vsel %vm1266_vm5, %v1272_v5, %v1274_v6  ;;  %v7136_v35 = vpack.i.bf16 %v1227_v31, %v1225_v30  ;;  %v1269_v37 = vsel %vm1266_vm5, %v1267_v56, %v1268_v21  ;;  %v8355_v38 = vsel %vm1266_vm5, %v1268_v21, %v1270_v4 }
  0x7a   : > { %7117 = vrot.lane.b32.xlu0 %v7116_v61, %s7919_s11  ;;  %v1317_v22 = vrot.slane %v8202_v11, 7  ;;  %v7151_v20 = vpack.i.bf16 %v8350_v34, %v8345_v33  ;;  %v8362_v39 = vsel %vm1161_vm0, %v1291_v7, %v1293_v8  ;;  %v8367_v40 = vsel %vm1161_vm0, %v1293_v8, %v1295_v24  ;;  %v7497_v8 = vld [vmem:[%s9860_s9 + $0x28] sm:$0xff]  }
  0x7b   : > { %v7146_v43 = vpack.i.bf16 %v8355_v38, %v1269_v37  ;;  %v1290_v44 = vsel %vm1161_vm0, %v1288_v57, %v1289_v28  ;;  %v8373_v48 = vsel %vm1161_vm0, %v1289_v28, %v1291_v7  ;;  %v1310_v49 = vrot.slane %v7917_v2, 7 }
  0x7c   : > { %v1311_v51 = vrot.slane %v8248_v32, 7  ;;  %v7161_v52 = vpack.i.bf16 %v8367_v40, %v8362_v39  ;;  %v8380_v53 = vsel %vm9808_vm6, %v1313_v26, %v1315_v3  ;;  %v8385_v54 = vsel %vm9808_vm6, %v1315_v3, %v1317_v22 }
  0x7d   : > { %7132 = vrot.lane.b32.xlu1 %v7131_v9, %s7920_s23  ;;  %v7156_v55 = vpack.i.bf16 %v8373_v48, %v1290_v44  ;;  %v7171_v59 = vpack.i.bf16 %v8385_v54, %v8380_v53  ;;  %s7924_s23 = smov 35   ;;  %v7181_v61 = vpack.i.bf16 %v8202_v11, %v8208_v13  ;;  %v7176_v62 = vpack.i.bf16 %v8217_v18, %v8248_v32 }
  0x7e   : > { %7127 = vrot.lane.b32.xlu0 %v7126_v17, %s7918_s1  ;;  %s7922_s1 = smov 25   ;;  %v1312_v56 = vsel %vm9808_vm6, %v1310_v49, %v1311_v51  ;;  %v8390_v57 = vsel %vm9808_vm6, %v1311_v51, %v1313_v26  ;;  %v7191_v0 = vpack.i.bf16 %v8226_v23, %v8231_v25  ;;  %v7186_v4 = vpack.i.bf16 %v8235_v27, %v8313_v1  ;;  %v7498_v17 = vld [vmem:[%s9860_s9 + $0x20] sm:$0xff]   ;;  %v7500_v26 = vld [vmem:[%s9860_s9 + $0x10] sm:$0xff]  }
  0x7f   : > { %v7166_v60 = vpack.i.bf16 %v8390_v57, %v1312_v56  ;;  %v7201_v5 = vpack.i.bf16 %v8278_v47, %v8266_v42  ;;  %v7196_v7 = vpack.i.bf16 %v8263_v41, %v8309_v63  ;;  %v7211_v23 = vpack.i.bf16 %v8298_v58, %v8255_v36  ;;  %v7496_v63 = vld [vmem:[%s9860_s9 + $0x30] sm:$0x1f]  }
  0x80   : > { %v1400_v25 = vrot.slane %v8205_v12, 5  ;;  %v7206_v27 = vpack.i.bf16 %v8242_v29, %v1227_v31  ;;  %v7221_v42 = vpack.i.bf16 %v8286_v50, %v8275_v46  ;;  %v1414_v47 = vrot.slane %v8205_v12, 6 }
  0x81   : > { %7142 = vrot.lane.b32.xlu1 %v7141_v14, %s7921_s28  ;;  %s7925_s28 = smov 40   ;;  %v7216_v36 = vpack.i.bf16 %v8272_v45, %v8328_v16  ;;  %v1428_v46 = vrot.slane %v8205_v12, 7  ;;  %v7226_v50 = vpack.i.bf16 %v8345_v33, %v8355_v38  ;;  %v7930_v1 = vmov 65535   ;;  %v7501_v14 = vld [vmem:[%s9860_s9 + $0x8] sm:$0xff]  }
  0x82   : > { %7137 = vrot.lane.b32.xlu0 %v7136_v35, %s7919_s11  ;;  %s7923_s11 = smov 30   ;;  %v1401_v41 = vsel %vm1266_vm5, %v1274_v6, %v1400_v25  ;;  %v1415_v58 = vsel %vm1161_vm0, %v1295_v24, %v1414_v47  ;;  %v1645_v6 = vsel %vm1244_vm4, 4294967295, %v7930_v1  ;;  %v7236_v16 = vpack.i.bf16 %v8362_v39, %v8373_v48  ;;  %v7499_v24 = vld [vmem:[%s9860_s9 + $0x18] sm:$0xff]  }
  0x83   : > { %v7231_v29 = vpack.i.bf16 %v1401_v41, %v8350_v34  ;;  %v1646_v45 = vsel %vm1222_vm2, %v1645_v6, 0  ;;  %v7241_v9 = vpack.i.bf16 %v1415_v58, %v8367_v40  ;;  %v1429_v15 = vsel %vm9808_vm6, %v1317_v22, %v1428_v46 }
  0x84   : > { %v1648_v10 = vand.u32 %v7496_v63, %v1646_v45  ;;  %v7251_v19 = vpack.i.bf16 %v1429_v15, %v8385_v54  ;;  %v7246_v21 = vpack.i.bf16 %v8380_v53, %v8390_v57  ;;  %vm1507_vm6 = vcmask 572416  }
  0x85   : > { %7152 = vrot.lane.b32.xlu1 %v7151_v20, %s7922_s1  ;;  %v7502_v20 = vld [vmem:[%s9860_s9] sm:$0xff]   ;;  %s9880_s9 = sld [smem:[#allocation10_spill]] }
  0x86   : > { %7147 = vrot.lane.b32.xlu0 %v7146_v43, %s7922_s1  ;;  %s7926_s1 = smov 45   ;;  %6763 = vmatprep.subr.bf16.mxu0 %v1648_v10 }
  0x87   : > { %6764 = vmatpush3.bf16.msra.mxu0 %v1648_v10 }
  0x88   : > { %6765 = vmatprep.subr.bf16.mxu0 %v7497_v8 }
  0x89   : > { %7162 = vrot.lane.b32.xlu1 %v7161_v52, %s7923_s11 }
  0x8a   : > { %7157 = vrot.lane.b32.xlu0 %v7156_v55, %s7923_s11  ;;  %s7927_s11 = smov 50  }
  0x8b   : > { %6766 = vmatpush3.bf16.msra.mxu0 %v7497_v8 }
  0x8c   : > { %6767 = vmatprep.subr.bf16.mxu0 %v7498_v17 }
  0x8d   : > { %7172 = vrot.lane.b32.xlu1 %v7171_v59, %s7924_s23 }
  0x8e   : > { %7167 = vrot.lane.b32.xlu0 %v7166_v60, %s7924_s23  ;;  %s7928_s23 = smov 55  }
  0x8f   : > { %6768 = vmatpush3.bf16.msra.mxu0 %v7498_v17 }
  0x90   : > { %6769 = vmatprep.subr.bf16.mxu0 %v7499_v24 }
  0x91   : > { %7182 = vrot.lane.b32.xlu1 %v7181_v61, %s7925_s28 }
  0x92   : > { %7177 = vrot.lane.b32.xlu0 %v7176_v62, %s7925_s28  ;;  %s7929_s28 = smov 60  }
  0x93   : > { %6770 = vmatpush3.bf16.msra.mxu0 %v7499_v24 }
  0x94   : > { %6771 = vmatprep.subr.bf16.mxu0 %v7500_v26 }
  0x95   : > { %7192 = vrot.lane.b32.xlu1 %v7191_v0, %s7926_s1 }
  0x96   : > { %7187 = vrot.lane.b32.xlu0 %v7186_v4, %s7926_s1  ;;  %s7931_s1 = smov 65  }
  0x97   : > { %6772 = vmatpush3.bf16.msra.mxu0 %v7500_v26 }
  0x98   : > { %6773 = vmatprep.subr.bf16.mxu0 %v7501_v14 }
  0x99   : > { %7202 = vrot.lane.b32.xlu1 %v7201_v5, %s7927_s11 }
  0x9a   : > { %7197 = vrot.lane.b32.xlu0 %v7196_v7, %s7927_s11  ;;  %s7932_s11 = smov 70  }
  0x9b   : > { %6774 = vmatpush3.bf16.msra.mxu0 %v7501_v14 }
  0x9c   : > { %6775 = vmatprep.subr.bf16.mxu0 %v7502_v20 }
  0x9d   : > { %7212 = vrot.lane.b32.xlu1 %v7211_v23, %s7928_s23 }
  0x9e   : > { %7207 = vrot.lane.b32.xlu0 %v7206_v27, %s7928_s23  ;;  %s7933_s23 = smov 75  }
  0x9f   : > { %6776 = vmatpush3.bf16.msra.mxu0 %v7502_v20 }
  0xa1   : > { %7222 = vrot.lane.b32.xlu1 %v7221_v42, %s7929_s28 }
  0xa2   : > { %7217 = vrot.lane.b32.xlu0 %v7216_v36, %s7929_s28  ;;  %s9819_s28 = smov 80  }
  0xa5   : > { %7232 = vrot.lane.b32.xlu1 %v7231_v29, %s7931_s1 }
  0xa6   : > { %7227 = vrot.lane.b32.xlu0 %v7226_v50, %s7931_s1  ;;  %s9809_s1 = smov 32  }
  0xa9   : > { %7242 = vrot.lane.b32.xlu1 %v7241_v9, %s7932_s11 }
  0xaa   : > { %7237 = vrot.lane.b32.xlu0 %v7236_v16, %s7932_s11  ;;  %s9815_s11 = smov 16  }
  0xad   : > { %7252 = vrot.lane.b32.xlu1 %v7251_v19, %s7933_s23 }
  0xae   : > { %7247 = vrot.lane.b32.xlu0 %v7246_v21, %s7933_s23  ;;  %s9811_s23 = smov 64  }
  0xdf   : > { %v7098_v3 = vpop.permute.xlu1 %7097 }
  0xe0   : > { %v7088_v28 = vpop.permute.xlu0 %7087  ;;  %v7100_v53 = vunpack.i.h.bf16 %v7098_v3  ;;  %v7099_v54 = vunpack.i.l.bf16 %v7098_v3 }
  0xe1   : > { %v7090_v30 = vunpack.i.h.bf16 %v7088_v28  ;;  %v7089_v31 = vunpack.i.l.bf16 %v7088_v28 }
  0xe2   : > { %v1546_v5 = vsel %vm1442_vm7, %v8205_v12, %v7100_v53  ;;  %v1545_v7 = vsel %vm1442_vm7, %v8202_v11, %v7099_v54 }
  0xe3   : > { %v7103_v33 = vpop.permute.xlu1 %7102  ;;  %v1446_v39 = vsel %vm1442_vm7, %v8208_v13, %v7090_v30  ;;  %v1445_v40 = vsel %vm1442_vm7, %v8217_v18, %v7089_v31 }
  0xe4   : > { %v7093_v34 = vpop.permute.xlu0 %7092  ;;  %v7105_v35 = vunpack.i.h.bf16 %v7103_v33  ;;  %v7104_v37 = vunpack.i.l.bf16 %v7103_v33 }
  0xe5   : > { %v7095_v38 = vunpack.i.h.bf16 %v7093_v34  ;;  %v7094_v22 = vunpack.i.l.bf16 %v7093_v34 }
  0xe7   : > { %v1450_v43 = vsel %vm1447_vm8, %v1445_v40, %v7094_v22  ;;  %v1451_v44 = vsel %vm1447_vm8, %v1446_v39, %v7095_v38  ;;  %v7113_v48 = vpop.permute.xlu1 %7112 }
  0xe8   : > { %v7115_v49 = vunpack.i.h.bf16 %v7113_v48  ;;  %v7114_v51 = vunpack.i.l.bf16 %v7113_v48  ;;  %v7108_v52 = vpop.permute.xlu0 %7107  ;;  %v1455_v55 = vsel %vm1452_vm9, %v1450_v43, %v7104_v37  ;;  %v1456_v13 = vsel %vm1452_vm9, %v1451_v44, %v7105_v35 }
  0xe9   : > { %v7110_v56 = vunpack.i.h.bf16 %v7108_v52  ;;  %v7109_v18 = vunpack.i.l.bf16 %v7108_v52 }
  0xea   : > { %v8453_v57 = vsel %vm1457_vm10, %v1455_v55, %v7114_v51  ;;  %v8456_v59 = vsel %vm1457_vm10, %v1456_v13, %v7115_v49 }
  0xeb   : > { %v7123_v60 = vpop.permute.xlu1 %7122  ;;  %v7256_v61 = vpack.i.bf16 %v8456_v59, %v8453_v57  ;;  %v1548_v27 = vsel %vm1447_vm8, %v1546_v5, %v7110_v56  ;;  %v1547_v42 = vsel %vm1447_vm8, %v1545_v7, %v7109_v18 }
  0xec   : > { %v7125_v62 = vunpack.i.h.bf16 %v7123_v60  ;;  %v7124_v0 = vunpack.i.l.bf16 %v7123_v60  ;;  %v7118_v4 = vpop.permute.xlu0 %7117 }
  0xed   : > { %v7120_v23 = vunpack.i.h.bf16 %v7118_v4  ;;  %v7119_v25 = vunpack.i.l.bf16 %v7118_v4  ;;  %7257 = vrot.lane.b32.xlu0 %v7256_v61, %s9819_s28 }
  0xef   : > { %v7133_v41 = vpop.permute.xlu1 %7132  ;;  %v1549_v47 = vsel %vm1452_vm9, %v1547_v42, %v7119_v25  ;;  %v1550_v36 = vsel %vm1452_vm9, %v1548_v27, %v7120_v23 }
  0xf0   : > { %v7135_v29 = vunpack.i.h.bf16 %v7133_v41  ;;  %v7134_v58 = vunpack.i.l.bf16 %v7133_v41  ;;  %v1551_v12 = vsel %vm1457_vm10, %v1549_v47, %v7124_v0  ;;  %v1552_v11 = vsel %vm1457_vm10, %v1550_v36, %v7125_v62  ;;  %v7128_v46 = vpop.permute.xlu0 %7127 }
  0xf1   : > { %v7261_v50 = vpack.i.bf16 %v1552_v11, %v1551_v12  ;;  %v7130_v63 = vunpack.i.h.bf16 %v7128_v46  ;;  %v7129_v1 = vunpack.i.l.bf16 %v7128_v46 }
  0xf3   : > { %7262 = vrot.lane.b32.xlu1 %v7261_v50, %s9819_s28  ;;  %v7143_v6 = vpop.permute.xlu1 %7142  ;;  %v1444_v45 = vsel %vm1442_vm7, %v8248_v32, %v7130_v63  ;;  %v1443_v8 = vsel %vm1442_vm7, 0.0, %v7129_v1  ;;  %vm1487_vm7 = vcmask 408576  }
  0xf4   : > { %v7145_v9 = vunpack.i.h.bf16 %v7143_v6  ;;  %v7144_v10 = vunpack.i.l.bf16 %v7143_v6  ;;  %v1448_v15 = vsel %vm1447_vm8, %v1443_v8, %v7134_v58  ;;  %v7138_v16 = vpop.permute.xlu0 %7137  ;;  %v1449_v17 = vsel %vm1447_vm8, %v1444_v45, %v7135_v29 }
  0xf5   : > { %v7140_v19 = vunpack.i.h.bf16 %v7138_v16  ;;  %v7139_v21 = vunpack.i.l.bf16 %v7138_v16  ;;  %vm1492_vm8 = vcmask 449536  }
  0xf7   : > { %v1453_v24 = vsel %vm1452_vm9, %v1448_v15, %v7139_v21  ;;  %v1454_v26 = vsel %vm1452_vm9, %v1449_v17, %v7140_v19  ;;  %v8481_v14 = vpop.permute.xlu1 %7152  ;;  %vm1497_vm9 = vcmask 490496  }
  0xf8   : > { %v1458_v3 = vsel %vm1457_vm10, %v1453_v24, %v7144_v10  ;;  %v1459_v28 = vsel %vm1457_vm10, %v1454_v26, %v7145_v9  ;;  %v7148_v32 = vpop.permute.xlu0 %7147  ;;  %v7154_v12 = vunpack.i.l.bf16 %v8481_v14  ;;  %v7155_v50 = vunpack.i.h.bf16 %v8481_v14 }
  0xf9   : > { %v7150_v39 = vunpack.i.h.bf16 %v7148_v32  ;;  %v7149_v40 = vunpack.i.l.bf16 %v7148_v32  ;;  %vm1502_vm10 = vcmask 531456  }
  0xfa   : > { %v1465_v17 = vsel %vm1462_vm11, %v8453_v57, %v7154_v12  ;;  %v1466_v19 = vsel %vm1462_vm11, %v8456_v59, %v7155_v50 }
  0xfb   : > { %v8483_v31 = vpop.permute.xlu1 %7162  ;;  %v1463_v51 = vsel %vm1462_vm11, %v1458_v3, %v7149_v40  ;;  %v1464_v52 = vsel %vm1462_vm11, %v1459_v28, %v7150_v39  ;;  %vm1512_vm11 = vcmask 613376  }
  0xfc   : > { %v7158_v30 = vpop.permute.xlu0 %7157  ;;  %v7164_v63 = vunpack.i.l.bf16 %v8483_v31  ;;  %v7165_v9 = vunpack.i.h.bf16 %v8483_v31 }
  0xfd   : > { %v7160_v44 = vunpack.i.h.bf16 %v7158_v30  ;;  %v7159_v48 = vunpack.i.l.bf16 %v7158_v30 }
  0xfe   : > { %v1470_v21 = vsel %vm1467_vm12, %v1465_v17, %v7164_v63  ;;  %v1471_v57 = vsel %vm1467_vm12, %v1466_v19, %v7165_v9 }
  0xff   : > { %v8485_v34 = vpop.permute.xlu1 %7172  ;;  %v1468_v55 = vsel %vm1467_vm12, %v1463_v51, %v7159_v48  ;;  %v1469_v13 = vsel %vm1467_vm12, %v1464_v52, %v7160_v44  ;;  %vm1569_vm12 = vcmask 654336  }
 0x100   : > { %v7168_v33 = vpop.permute.xlu0 %7167  ;;  %v7174_v10 = vunpack.i.l.bf16 %v8485_v34  ;;  %v7175_v3 = vunpack.i.h.bf16 %v8485_v34 }
 0x101   : > { %v7170_v53 = vunpack.i.h.bf16 %v7168_v33  ;;  %v7169_v54 = vunpack.i.l.bf16 %v7168_v33 }
 0x102   : > { %v1475_v30 = vsel %vm1472_vm13, %v1470_v21, %v7174_v10 }
 0x103   : > { %v8487_v37 = vpop.permute.xlu1 %7182  ;;  %v1473_v62 = vsel %vm1472_vm13, %v1468_v55, %v7169_v54  ;;  %v1474_v0 = vsel %vm1472_vm13, %v1469_v13, %v7170_v53 }
 0x104   : > { %v7178_v35 = vpop.permute.xlu0 %7177  ;;  %v7184_v28 = vunpack.i.l.bf16 %v8487_v37  ;;  %v7185_v31 = vunpack.i.h.bf16 %v8487_v37  ;;  %v1476_v37 = vsel %vm1472_vm13, %v1471_v57, %v7175_v3  ;;  %vm1638_vm13 = vcmask 859136   ;;  %v7503_v3 = vld [vmem:[%s7967_s17 + $0x38] sm:$0xff]   ;;  %v7506_v57 = vld [vmem:[%s7967_s17 + $0x20] sm:$0xff]  }
 0x105   : > { %v7180_v18 = vunpack.i.h.bf16 %v7178_v35  ;;  %v7179_v60 = vunpack.i.l.bf16 %v7178_v35 }
 0x106   : > { %v1480_v51 = vsel %vm1477_vm14, %v1475_v30, %v7184_v28  ;;  %v7935_v28 = vmov 0   ;;  %v7507_v30 = vld [vmem:[%s7967_s17 + $0x18] sm:$0xff]  }
 0x107   : > { %v8489_v22 = vpop.permute.xlu1 %7192  ;;  %v1478_v7 = vsel %vm1477_vm14, %v1473_v62, %v7179_v60  ;;  %v1479_v23 = vsel %vm1477_vm14, %v1474_v0, %v7180_v18  ;;  %1993 = vmatprep.subr.bf16.mxu1 %v7935_v28 }
 0x108   : > { %v7188_v38 = vpop.permute.xlu0 %7187  ;;  %v7194_v59 = vunpack.i.l.bf16 %v8489_v22  ;;  %v7195_v33 = vunpack.i.h.bf16 %v8489_v22  ;;  %v1481_v22 = vsel %vm1477_vm14, %v1476_v37, %v7185_v31  ;;  %1994 = vmatpush1.bf16.msra.mxu1 %v7503_v3  ;;  %vm9866_vm14 = vcmask 1040384  }
 0x109   : > { %v7190_v4 = vunpack.i.h.bf16 %v7188_v38  ;;  %v7189_v5 = vunpack.i.l.bf16 %v7188_v38  ;;  %1995 = vmatprep.subr.bf16.mxu1 %v7935_v28 }
 0x10a   : > { %v1485_v52 = vsel %vm1482_vm15, %v1480_v51, %v7194_v59  ;;  %v6304_v59 = vld [vmem:[%s7962_s13] ss:$0 sm:$0xff] }
 0x10b   : > { %v8491_v43 = vpop.permute.xlu1 %7202  ;;  %v1483_v47 = vsel %vm1482_vm15, %v1478_v7, %v7189_v5  ;;  %v1484_v36 = vsel %vm1482_vm15, %v1479_v23, %v7190_v4 }
 0x10c   : > { %v7198_v20 = vpop.permute.xlu0 %7197  ;;  %v7204_v35 = vunpack.i.l.bf16 %v8491_v43  ;;  %v7205_v40 = vunpack.i.h.bf16 %v8491_v43  ;;  %v1486_v43 = vsel %vm1482_vm15, %v1481_v22, %v7195_v33  ;;  %v7508_v22 = vld [vmem:[%s7967_s17 + $0x10] sm:$0xff]   ;;  %vm9867_vm15 = vmmov %vm9866_vm14 }
 0x10d   : > { %v7200_v27 = vunpack.i.h.bf16 %v7198_v20  ;;  %v7199_v42 = vunpack.i.l.bf16 %v7198_v20 }
 0x10e   : > { %v1490_v55 = vsel %vm1487_vm7, %v1485_v52, %v7204_v35  ;;  %v1491_v60 = vsel %vm1487_vm7, %v1486_v43, %v7205_v40 }
 0x10f   : > { %v8497_v56 = vpop.permute.xlu1 %7212  ;;  %v1488_v11 = vsel %vm1487_vm7, %v1483_v47, %v7199_v42  ;;  %v1489_v46 = vsel %vm1487_vm7, %v1484_v36, %v7200_v27  ;;  %vm9869_vm7 = vmmov %vm9866_vm14 }
 0x110   : > { %v7208_v49 = vpop.permute.xlu0 %7207  ;;  %v7214_v44 = vunpack.i.l.bf16 %v8497_v56 }
 0x111   : > { %v7210_v29 = vunpack.i.h.bf16 %v7208_v49  ;;  %v7209_v58 = vunpack.i.l.bf16 %v7208_v49 }
 0x112   : > { %v1495_v62 = vsel %vm1492_vm8, %v1490_v55, %v7214_v44 }
 0x113   : > { %v8503_v25 = vpop.permute.xlu1 %7222  ;;  %v1493_v15 = vsel %vm1492_vm8, %v1488_v11, %v7209_v58  ;;  %v1494_v16 = vsel %vm1492_vm8, %v1489_v46, %v7210_v29 }
 0x114   : > { %v7218_v61 = vpop.permute.xlu0 %7217  ;;  %v7225_v4 = vunpack.i.h.bf16 %v8503_v25  ;;  %v7224_v5 = vunpack.i.l.bf16 %v8503_v25 }
 0x115   : > { %v7220_v6 = vunpack.i.h.bf16 %v7218_v61  ;;  %v7219_v45 = vunpack.i.l.bf16 %v7218_v61  ;;  %v7215_v61 = vunpack.i.h.bf16 %v8497_v56 }
 0x116   : > { %v1500_v63 = vsel %vm1497_vm9, %v1495_v62, %v7224_v5  ;;  %v7509_v62 = vld [vmem:[%s7967_s17 + $0x8] sm:$0xff]  }
 0x117   : > { %v8512_v1 = vpop.permute.xlu1 %7232  ;;  %v1498_v32 = vsel %vm1497_vm9, %v1493_v15, %v7219_v45  ;;  %v1499_v14 = vsel %vm1497_vm9, %v1494_v16, %v7220_v6  ;;  %v1496_v11 = vsel %vm1492_vm8, %v1491_v60, %v7215_v61  ;;  %vm9871_vm8 = vmmov %vm9869_vm7 }
 0x118   : > { %v7228_v41 = vpop.permute.xlu0 %7227  ;;  %v7235_v42 = vunpack.i.h.bf16 %v8512_v1 }
 0x119   : > { %v7230_v24 = vunpack.i.h.bf16 %v7228_v41  ;;  %v7229_v26 = vunpack.i.l.bf16 %v7228_v41  ;;  %v7234_v41 = vunpack.i.l.bf16 %v8512_v1  ;;  %v1501_v1 = vsel %vm1497_vm9, %v1496_v11, %v7225_v4 }
 0x11a   : > { %v1506_v45 = vsel %vm1502_vm10, %v1501_v1, %v7235_v42  ;;  %vm1875_vm9 = vcmask 261120  }
 0x11b   : > { %v7243_v38 = vpop.permute.xlu1 %7242  ;;  %v1503_v48 = vsel %vm1502_vm10, %v1498_v32, %v7229_v26  ;;  %v1504_v49 = vsel %vm1502_vm10, %v1499_v14, %v7230_v24  ;;  %v1505_v6 = vsel %vm1502_vm10, %v1500_v63, %v7234_v41  ;;  %v7504_v32 = vld [vmem:[%s7967_s17 + $0x30] sm:$0xff]   ;;  %v7505_v14 = vld [vmem:[%s7967_s17 + $0x28] sm:$0xff]   ;;  %vm1880_vm10 = vcmask 392192  }
 0x11c   : > { %v7238_v8 = vpop.permute.xlu0 %7237  ;;  %v7245_v56 = vunpack.i.h.bf16 %v7243_v38  ;;  %v7244_v29 = vunpack.i.l.bf16 %v7243_v38  ;;  %1996 = vmatpush1.bf16.msra.mxu1 %v7504_v32 }
 0x11d   : > { %v7240_v34 = vunpack.i.h.bf16 %v7238_v8  ;;  %v7239_v20 = vunpack.i.l.bf16 %v7238_v8  ;;  %1997 = vmatprep.subr.bf16.mxu1 %v7935_v28 }
 0x11e   : > { %v1510_v9 = vsel %vm1507_vm6, %v1505_v6, %v7244_v29  ;;  %v1511_v10 = vsel %vm1507_vm6, %v1506_v45, %v7245_v56 }
 0x11f   : > { %v1508_v13 = vsel %vm1507_vm6, %v1503_v48, %v7239_v20  ;;  %v1509_v18 = vsel %vm1507_vm6, %v1504_v49, %v7240_v34  ;;  %v7253_v7 = vpop.permute.xlu1 %7252  ;;  %vm1870_vm6 = vcmask 130048  }
 0x120   : > { %v7248_v39 = vpop.permute.xlu0 %7247  ;;  %v7255_v25 = vunpack.i.h.bf16 %v7253_v7  ;;  %v7254_v46 = vunpack.i.l.bf16 %v7253_v7  ;;  %1998 = vmatpush1.bf16.msra.mxu1 %v7505_v14 }
 0x121   : > { %v7250_v53 = vunpack.i.h.bf16 %v7248_v39  ;;  %v7249_v54 = vunpack.i.l.bf16 %v7248_v39  ;;  %1999 = vmatprep.subr.bf16.mxu1 %v7935_v28 }
 0x122   : > { %v1515_v17 = vsel %vm1512_vm11, %v1510_v9, %v7254_v46  ;;  %v1516_v19 = vsel %vm1512_vm11, %v1511_v10, %v7255_v25  ;;  %v7510_v25 = vld [vmem:[%s7967_s17] sm:$0xff]  }
 0x123   : > { %v1513_v47 = vsel %vm1512_vm11, %v1508_v13, %v7249_v54  ;;  %v1514_v36 = vsel %vm1512_vm11, %v1509_v18, %v7250_v53  ;;  %vm1885_vm11 = vcmask 523264  }
 0x124   : > { %2000 = vmatpush1.bf16.msra.mxu1 %v7506_v57 }
 0x125   : > { %2001 = vmatprep.subr.bf16.mxu1 %v7935_v28 }
 0x128   : > { %2002 = vmatpush1.bf16.msra.mxu1 %v7507_v30 }
 0x129   : > { %2003 = vmatprep.subr.bf16.mxu1 %v7935_v28 }
 0x12c   : > { %2004 = vmatpush1.bf16.msra.mxu1 %v7508_v22 }
 0x12d   : > { %2005 = vmatprep.subr.bf16.mxu1 %v7935_v28 }
 0x130   : > { %2006 = vmatpush1.bf16.msra.mxu1 %v7509_v62 }
 0x131   : > { %2007 = vmatprep.subr.bf16.mxu1 %v7935_v28 }
 0x134   : > { %2008 = vmatpush1.bf16.msra.mxu1 %v7510_v25 }
 0x135   : > { %2023 = vmatprep.subr.bf16.mxu1 %v7935_v28 }
 0x15f   : > { %v7258_v0 = vpop.permute.xlu0 %7257 }
 0x160   : > { %v7260_v23 = vunpack.i.h.bf16 %v7258_v0  ;;  %v7259_v27 = vunpack.i.l.bf16 %v7258_v0 }
 0x162   : > { %v1570_v58 = vsel %vm1569_vm12, %v1513_v47, %v7259_v27  ;;  %v1571_v12 = vsel %vm1569_vm12, %v1514_v36, %v7260_v23 }
 0x163   : > { %v1574_v50 = vpack.c.bf16 %v1571_v12, %v1570_v58 }
 0x165   : > { %v7263_v8 = vpop.permute.xlu1 %7262  ;;  %6777 = vmatprep.mubr.msk.bf16.mxu0 %vm1638_vm13, %v1574_v50 }
 0x166   : > { %v7265_v15 = vunpack.i.h.bf16 %v7263_v8  ;;  %v7264_v16 = vunpack.i.l.bf16 %v7263_v8 }
 0x168   : > { %v1572_v21 = vsel %vm1569_vm12, %v1515_v17, %v7264_v16  ;;  %v1573_v24 = vsel %vm1569_vm12, %v1516_v19, %v7265_v15  ;;  %v7511_v16 = vld [vmem:[%s7967_s17 + $0x40] sm:$0xff]  }
 0x169   : > { %v1575_v26 = vpack.c.bf16 %v1573_v24, %v1572_v21  ;;  %2024 = vmatpush2.bf16.msra.mxu1 %v7511_v16 }
 0x16b   : > { %6778 = vmatmul.mubr.msk.bf16.vlgmr.msra.gmra.mxu0 %vm1638_vm13, %v1575_v26  ;;  %vm1894_vm13 = vcmask 785408  }
 0x22b   : > { %v6779_v31 = vpop.f32.mrf.mxu0 }
 0x22c   : > { %v1693_v35 = vadd.f32 %v6779_v31, %v6304_v59 }
 0x22d   : > { %v1684_v33 = vpop.f32.mrf.mxu0 }
 0x22e   : > { %v1685_v38 = vadd.f32 %v6304_v59, %v1684_v33  ;;  %v1701_v40 = vmax.f32 %v1693_v35, 0.0 }
 0x22f   : > { %v6780_v34 = vpop.f32.mrf.mxu0 }
 0x230   : > { %v1699_v20 = vmax.f32 %v1685_v38, 0.0  ;;  %v1696_v49 = vadd.f32 %v6780_v34, %v6304_v59  ;;  %v1710_v52 = vrot.slane %v1701_v40, 4 }
 0x231   : > { %v1687_v39 = vpop.f32.mrf.mxu0 }
 0x232   : > { %v1707_v44 = vrot.slane %v1699_v20, 4  ;;  %v1688_v48 = vadd.f32 %v6304_v59, %v1687_v39  ;;  %v1702_v54 = vmax.f32 %v1696_v49, 0.0 }
 0x234   : > { %v8582_v37 = vsel %vm1244_vm4, 0.0, %v1707_v44  ;;  %v1700_v51 = vmax.f32 %v1688_v48, 0.0  ;;  %v1712_v58 = vrot.slane %v1702_v54, 4 }
 0x235   : > { %v1744_v43 = vrot.slane %v8582_v37, 2  ;;  %v1723_v55 = vrot.slane %v8582_v37, 1  ;;  %v1786_v60 = vrot.slane %v8582_v37, 4  ;;  %v1765_v61 = vrot.slane %v8582_v37, 3 }
 0x236   : > { %v1708_v53 = vrot.slane %v1700_v51, 4  ;;  %v1828_v10 = vrot.slane %v8582_v37, 6  ;;  %v8632_v17 = vsel %vm1244_vm4, %v1710_v52, %v1712_v58  ;;  %v8635_v19 = vsel %vm1244_vm4, %v1712_v58, 0.0 }
 0x237   : > { %v1807_v24 = vrot.slane %v8582_v37, 5  ;;  %v1728_v59 = vrot.slane %v8632_v17, 1  ;;  %v1730_v33 = vrot.slane %v8635_v19, 1  ;;  %v1849_v38 = vrot.slane %v8582_v37, 7 }
 0x238   : > { %v8589_v13 = vsel %vm1244_vm4, %v1707_v44, %v1708_v53  ;;  %v8592_v18 = vsel %vm1244_vm4, %v1708_v53, %v1710_v52  ;;  %v1770_v48 = vrot.slane %v8632_v17, 3  ;;  %v1772_v49 = vrot.slane %v8635_v19, 3 }
 0x239   : > { %v1905_v0 = vpack.c.bf16 %v8592_v18, %v8589_v13  ;;  %v1745_v4 = vrot.slane %v8589_v13, 2  ;;  %v1747_v5 = vrot.slane %v8592_v18, 2  ;;  %v1724_v7 = vrot.slane %v8589_v13, 1 }
 0x23a   : > { %v1726_v23 = vrot.slane %v8592_v18, 1  ;;  %v1787_v27 = vrot.slane %v8589_v13, 4  ;;  %v1789_v42 = vrot.slane %v8592_v18, 4  ;;  %v1766_v41 = vrot.slane %v8589_v13, 3 }
 0x23b   : > { %6324 = vmatprep.mubr.msk.bf16.mxu1 %vm1870_vm6, %v1905_v0  ;;  %v1746_v47 = vsel %vm1200_vm3, %v1744_v43, %v1745_v4  ;;  %v1748_v36 = vsel %vm1200_vm3, %v1745_v4, %v1747_v5  ;;  %v1725_v56 = vsel %vm1178_vm1, %v1723_v55, %v1724_v7  ;;  %v1768_v29 = vrot.slane %v8592_v18, 3 }
 0x23c   : > { %v7271_v12 = vpack.i.bf16 %v1748_v36, %v1746_v47  ;;  %v1727_v11 = vsel %vm1178_vm1, %v1724_v7, %v1726_v23  ;;  %v1788_v50 = vsel %vm1244_vm4, %v1786_v60, %v1787_v27  ;;  %v1790_v63 = vsel %vm1244_vm4, %v1787_v27, %v1789_v42 }
 0x23d   : > { %v7266_v46 = vpack.i.bf16 %v1727_v11, %v1725_v56  ;;  %v1767_v1 = vsel %vm1222_vm2, %v1765_v61, %v1766_v41  ;;  %v1769_v6 = vsel %vm1222_vm2, %v1766_v41, %v1768_v29  ;;  %v1829_v45 = vrot.slane %v8589_v13, 6 }
 0x23e   : > { %7272 = vrot.lane.b32.xlu1 %v7271_v12, %s9809_s1  ;;  %v1831_v8 = vrot.slane %v8592_v18, 6  ;;  %v1808_v9 = vrot.slane %v8589_v13, 5  ;;  %v1810_v15 = vrot.slane %v8592_v18, 5  ;;  %v7281_v21 = vpack.i.bf16 %v1790_v63, %v1788_v50  ;;  %s9817_s1 = smov 48  }
 0x23f   : > { %7267 = vrot.lane.b32.xlu0 %v7266_v46, %s9815_s11  ;;  %v7276_v26 = vpack.i.bf16 %v1769_v6, %v1767_v1  ;;  %v1830_v3 = vsel %vm1161_vm0, %v1828_v10, %v1829_v45  ;;  %v1850_v30 = vrot.slane %v8589_v13, 7  ;;  %v1852_v31 = vrot.slane %v8592_v18, 7 }
 0x240   : > { %v1832_v32 = vsel %vm1161_vm0, %v1829_v45, %v1831_v8  ;;  %v1809_v14 = vsel %vm1266_vm5, %v1807_v24, %v1808_v9  ;;  %v1811_v57 = vsel %vm1266_vm5, %v1808_v9, %v1810_v15  ;;  %v1729_v20 = vsel %vm1178_vm1, %v1726_v23, %v1728_v59 }
 0x241   : > { %v7291_v35 = vpack.i.bf16 %v1832_v32, %v1830_v3  ;;  %v7286_v34 = vpack.i.bf16 %v1811_v57, %v1809_v14  ;;  %v1851_v39 = vsel %vm9866_vm14, %v1849_v38, %v1850_v30  ;;  %v1853_v40 = vsel %vm9867_vm15, %v1850_v30, %v1852_v31  ;;  %vm9874_vm15 = vmmov %vm9869_vm7 }
 0x242   : > { %7282 = vrot.lane.b32.xlu1 %v7281_v21, %s9811_s23  ;;  %s9813_s23 = smov 96   ;;  %v1731_v44 = vsel %vm1178_vm1, %v1728_v59, %v1730_v33  ;;  %v1749_v22 = vrot.slane %v8632_v17, 2  ;;  %v1751_v52 = vrot.slane %v8635_v19, 2  ;;  %v7296_v53 = vpack.i.bf16 %v1853_v40, %v1851_v39 }
 0x243   : > { %7277 = vrot.lane.b32.xlu0 %v7276_v26, %s9817_s1  ;;  %v7301_v51 = vpack.i.bf16 %v1731_v44, %v1729_v20  ;;  %v1771_v54 = vsel %vm1222_vm2, %v1768_v29, %v1770_v48  ;;  %v1773_v55 = vsel %vm1222_vm2, %v1770_v48, %v1772_v49  ;;  %v1812_v60 = vrot.slane %v8632_v17, 5 }
 0x244   : > { %v1750_v43 = vsel %vm1200_vm3, %v1747_v5, %v1749_v22  ;;  %v1814_v61 = vrot.slane %v8635_v19, 5  ;;  %v7311_v62 = vpack.i.bf16 %v1773_v55, %v1771_v54  ;;  %v1752_v0 = vsel %vm1200_vm3, %v1749_v22, %v1751_v52 }
 0x245   : > { %v1791_v4 = vrot.slane %v8632_v17, 4  ;;  %v1793_v7 = vrot.slane %v8635_v19, 4  ;;  %v7306_v23 = vpack.i.bf16 %v1752_v0, %v1750_v43  ;;  %v1813_v27 = vsel %vm1266_vm5, %v1810_v15, %v1812_v60 }
 0x246   : > { %7292 = vrot.lane.b32.xlu1 %v7291_v35, %s9813_s23  ;;  %s9821_s23 = smov 112   ;;  %v1815_v41 = vsel %vm1266_vm5, %v1812_v60, %v1814_v61  ;;  %v1854_v47 = vrot.slane %v8632_v17, 7  ;;  %v1856_v36 = vrot.slane %v8635_v19, 7  ;;  %v1833_v58 = vrot.slane %v8632_v17, 6 }
 0x247   : > { %7287 = vrot.lane.b32.xlu0 %v7286_v34, %s9819_s28  ;;  %v1792_v5 = vsel %vm1244_vm4, %v1789_v42, %v1791_v4  ;;  %v7321_v56 = vpack.i.bf16 %v1815_v41, %v1813_v27  ;;  %v1794_v29 = vsel %vm1244_vm4, %v1791_v4, %v1793_v7  ;;  %v1835_v12 = vrot.slane %v8635_v19, 6 }
 0x248   : > { %v7316_v11 = vpack.i.bf16 %v1794_v29, %v1792_v5  ;;  %v1855_v25 = vsel %vm9869_vm7, %v1852_v31, %v1854_v47  ;;  %v1834_v42 = vsel %vm1161_vm0, %v1831_v8, %v1833_v58  ;;  %v1857_v46 = vsel %vm9871_vm8, %v1854_v47, %v1856_v36  ;;  %vm9875_vm8 = vmmov %vm9869_vm7 }
 0x249   : > { %v7331_v50 = vpack.i.bf16 %v1857_v46, %v1855_v25  ;;  %v1836_v63 = vsel %vm1161_vm0, %v1833_v58, %v1835_v12  ;;  %vm1899_vm14 = vcmask 916480   ;;  %v1907_v27 = vpack.c.bf16 %v8635_v19, %v8632_v17 }
 0x24a   : > { %7302 = vrot.lane.b32.xlu1 %v7301_v51, %s9815_s11  ;;  %s9868_s11 = smov 32   ;;  %v7326_v1 = vpack.i.bf16 %v1836_v63, %v1834_v42 }
 0x24b   : > { %7297 = vrot.lane.b32.xlu0 %v7296_v53, %s9821_s23 }
 0x24e   : > { %7312 = vrot.lane.b32.xlu1 %v7311_v62, %s9817_s1  ;;  %s9870_s1 = smov 64  }
 0x24f   : > { %7307 = vrot.lane.b32.xlu0 %v7306_v23, %s9868_s11 }
 0x252   : > { %7322 = vrot.lane.b32.xlu1 %v7321_v56, %s9819_s28  ;;  %s9876_s28 = smov 48  }
 0x253   : > { %7317 = vrot.lane.b32.xlu0 %v7316_v11, %s9870_s1 }
 0x256   : > { %7332 = vrot.lane.b32.xlu1 %v7331_v50, %s9821_s23 }
 0x257   : > { %7327 = vrot.lane.b32.xlu0 %v7326_v1, %s9872_s5 }
 0x2b0   : > { %v7273_v6 = vpop.permute.xlu1 %7272 }
 0x2b1   : > { %v7268_v45 = vpop.permute.xlu0 %7267  ;;  %v7275_v15 = vunpack.i.h.bf16 %v7273_v6  ;;  %v7274_v16 = vunpack.i.l.bf16 %v7273_v6 }
 0x2b2   : > { %v7270_v9 = vunpack.i.h.bf16 %v7268_v45  ;;  %v7269_v10 = vunpack.i.l.bf16 %v7268_v45 }
 0x2b4   : > { %v1872_v8 = vsel %vm1870_vm6, %v8589_v13, %v7270_v9  ;;  %v1871_v21 = vsel %vm1870_vm6, %v8582_v37, %v7269_v10  ;;  %v7283_v24 = vpop.permute.xlu1 %7282 }
 0x2b5   : > { %v7278_v26 = vpop.permute.xlu0 %7277  ;;  %v7285_v14 = vunpack.i.h.bf16 %v7283_v24  ;;  %v7284_v57 = vunpack.i.l.bf16 %v7283_v24  ;;  %v1876_v30 = vsel %vm1875_vm9, %v1871_v21, %v7274_v16  ;;  %v1877_v31 = vsel %vm1875_vm9, %v1872_v8, %v7275_v15 }
 0x2b6   : > { %v7280_v3 = vunpack.i.h.bf16 %v7278_v26  ;;  %v7279_v32 = vunpack.i.l.bf16 %v7278_v26 }
 0x2b8   : > { %v1881_v59 = vsel %vm1880_vm10, %v1876_v30, %v7279_v32  ;;  %v1882_v33 = vsel %vm1880_vm10, %v1877_v31, %v7280_v3  ;;  %v7293_v13 = vpop.permute.xlu1 %7292  ;;  %v7512_v32 = vld [vmem:[%s7977_s25 + $0x88] sm:$0xff]   ;;  %v7515_v30 = vld [vmem:[%s7977_s25 + $0x38] sm:$0xff]   ;;  %v7516_v31 = vld [vmem:[%s7977_s25 + $0x70] sm:$0xff]  }
 0x2b9   : > { %v7288_v35 = vpop.permute.xlu0 %7287  ;;  %v7295_v34 = vunpack.i.h.bf16 %v7293_v13  ;;  %v7294_v20 = vunpack.i.l.bf16 %v7293_v13  ;;  %v1886_v39 = vsel %vm1885_vm11, %v1881_v59, %v7284_v57  ;;  %v1887_v40 = vsel %vm1885_vm11, %v1882_v33, %v7285_v14  ;;  %v7513_v14 = vld [vmem:[%s7977_s25 + $0x80] sm:$0xff]   ;;  %6781 = vmatprep.subr.bf16.mxu1 %v7512_v32  ;;  %v7514_v57 = vld [vmem:[%s7977_s25 + $0x78] sm:$0xff]   ;;  %v7517_v59 = vld [vmem:[%s7977_s25 + $0x30] sm:$0xff]  }
 0x2ba   : > { %v7290_v37 = vunpack.i.h.bf16 %v7288_v35  ;;  %v7289_v38 = vunpack.i.l.bf16 %v7288_v35  ;;  %6532 = vmatprep.subr.bf16.mxu0 %v7514_v57  ;;  %v7518_v33 = vld [vmem:[%s7977_s25 + $0x68] sm:$0xff]   ;;  %v7520_v35 = vld [vmem:[%s7977_s25 + $0x60] sm:$0xff]  }
 0x2bb   : > { %6533 = vmatpush3.bf16.msra.mxu0 %v7515_v30  ;;  %v7519_v13 = vld [vmem:[%s7977_s25 + $0x28] sm:$0xff]  }
 0x2bc   : > { %v1890_v44 = vsel %vm1569_vm12, %v1886_v39, %v7289_v38  ;;  %v1891_v48 = vsel %vm1569_vm12, %v1887_v40, %v7290_v37  ;;  %v7303_v49 = vpop.permute.xlu1 %7302  ;;  %6534 = vmatprep.subr.bf16.mxu0 %v7516_v31  ;;  %v7521_v37 = vld [vmem:[%s7977_s25 + $0x20] sm:$0xff]   ;;  %v7522_v38 = vld [vmem:[%s7977_s25 + $0x58] sm:$0xff]  }
 0x2bd   : > { %v7298_v51 = vpop.permute.xlu0 %7297  ;;  %v7305_v53 = vunpack.i.h.bf16 %v7303_v49  ;;  %v7304_v54 = vunpack.i.l.bf16 %v7303_v49  ;;  %v1895_v43 = vsel %vm1894_vm13, %v1890_v44, %v7294_v20  ;;  %v1896_v55 = vsel %vm1894_vm13, %v1891_v48, %v7295_v34  ;;  %v7523_v34 = vld [vmem:[%s7977_s25 + $0x18] sm:$0xff]   ;;  %v6314_v20 = vld [vmem:[%s7972_s21] ss:$0 sm:$0xff] }
 0x2be   : > { %v7300_v22 = vunpack.i.h.bf16 %v7298_v51  ;;  %v7299_v52 = vunpack.i.l.bf16 %v7298_v51 }
 0x2bf   : > { %v1874_v5 = vsel %vm1870_vm6, %v8632_v17, %v7305_v53  ;;  %v1873_v41 = vsel %vm1870_vm6, %v8592_v18, %v7304_v54  ;;  %6535 = vmatpush3.bf16.msra.mxu0 %v7517_v59 }
 0x2c0   : > { %v7313_v60 = vpop.permute.xlu1 %7312  ;;  %v1900_v61 = vsel %vm1899_vm14, %v1895_v43, %v7299_v52  ;;  %v1901_v62 = vsel %vm1899_vm14, %v1896_v55, %v7300_v22  ;;  %6536 = vmatprep.subr.bf16.mxu0 %v7518_v33 }
 0x2c1   : > { %v7308_v0 = vpop.permute.xlu0 %7307  ;;  %v1904_v4 = vpack.c.bf16 %v1901_v62, %v1900_v61  ;;  %v7315_v47 = vunpack.i.h.bf16 %v7313_v60  ;;  %v7314_v36 = vunpack.i.l.bf16 %v7313_v60 }
 0x2c2   : > { %v7310_v7 = vunpack.i.h.bf16 %v7308_v0  ;;  %v7309_v23 = vunpack.i.l.bf16 %v7308_v0  ;;  %v7524_v0 = vld [vmem:[%s7977_s25 + $0x50] sm:$0xff]  }
 0x2c3   : > { %2026 = vmatmul.mubr.bf16.vlgmr.msra.gmra.mxu1 %v1904_v4  ;;  %6537 = vmatpush3.bf16.msra.mxu0 %v7519_v13  ;;  %v7525_v4 = vld [vmem:[%s7977_s25 + $0x10] sm:$0xff]  }
 0x2c4   : > { %v1879_v56 = vsel %vm1875_vm9, %v1874_v5, %v7310_v7  ;;  %v1878_v29 = vsel %vm1875_vm9, %v1873_v41, %v7309_v23  ;;  %6325 = vmatprep.mubr.msk.bf16.mxu1 %vm1870_vm6, %v1907_v27  ;;  %v7323_v58 = vpop.permute.xlu1 %7322  ;;  %6782 = vmatpush3.bf16.msra.mxu1 %v7512_v32 }
 0x2c5   : > { %v7318_v12 = vpop.permute.xlu0 %7317  ;;  %v7325_v19 = vunpack.i.h.bf16 %v7323_v58  ;;  %v7324_v42 = vunpack.i.l.bf16 %v7323_v58  ;;  %v1883_v17 = vsel %vm1880_vm10, %v1878_v29, %v7314_v36  ;;  %v1884_v46 = vsel %vm1880_vm10, %v1879_v56, %v7315_v47  ;;  %6783 = vmatprep.subr.bf16.mxu1 %v7513_v14  ;;  %6538 = vmatprep.subr.bf16.mxu0 %v7520_v35 }
 0x2c6   : > { %v7320_v11 = vunpack.i.h.bf16 %v7318_v12  ;;  %v7319_v25 = vunpack.i.l.bf16 %v7318_v12 }
 0x2c7   : > { %6539 = vmatpush3.bf16.msra.mxu0 %v7521_v37 }
 0x2c8   : > { %v1888_v18 = vsel %vm1885_vm11, %v1883_v17, %v7319_v25  ;;  %v1889_v50 = vsel %vm1885_vm11, %v1884_v46, %v7320_v11  ;;  %v7333_v63 = vpop.permute.xlu1 %7332  ;;  %6784 = vmatpush3.bf16.msra.mxu1 %v7513_v14  ;;  %6540 = vmatprep.subr.bf16.mxu0 %v7522_v38  ;;  %v7526_v25 = vld [vmem:[%s7977_s25 + $0x48] sm:$0xff]  }
 0x2c9   : > { %v7335_v1 = vunpack.i.h.bf16 %v7333_v63  ;;  %v7334_v6 = vunpack.i.l.bf16 %v7333_v63  ;;  %v7328_v45 = vpop.permute.xlu0 %7327  ;;  %v1892_v15 = vsel %vm1569_vm12, %v1888_v18, %v7324_v42  ;;  %v1893_v16 = vsel %vm1569_vm12, %v1889_v50, %v7325_v19  ;;  %v7527_v19 = vld [vmem:[%s7977_s25 + $0x8] sm:$0xff]   ;;  %vm9873_vm12 = vmmov %vm9869_vm7 }
 0x2ca   : > { %v7330_v9 = vunpack.i.h.bf16 %v7328_v45  ;;  %v7329_v10 = vunpack.i.l.bf16 %v7328_v45 }
 0x2cb   : > { %6541 = vmatpush3.bf16.msra.mxu0 %v7523_v34 }
 0x2cc   : > { %v1897_v8 = vsel %vm1894_vm13, %v1892_v15, %v7329_v10  ;;  %v1898_v21 = vsel %vm1894_vm13, %v1893_v16, %v7330_v9  ;;  %6542 = vmatprep.subr.bf16.mxu0 %v7524_v0 }
 0x2cd   : > { %v1902_v24 = vsel %vm1899_vm14, %v1897_v8, %v7334_v6  ;;  %v1903_v26 = vsel %vm1899_vm14, %v1898_v21, %v7335_v1  ;;  %vm9901_vm14 = vmmov %vm9869_vm7 }
 0x2ce   : > { %v1906_v3 = vpack.c.bf16 %v1903_v26, %v1902_v24  ;;  %v7528_v26 = vld [vmem:[%s7977_s25 + $0x40] sm:$0xff]  }
 0x2cf   : > { %6543 = vmatpush3.bf16.msra.mxu0 %v7525_v4 }
 0x2d0   : > { %2034 = vmatmul.mubr.bf16.gmra.mxu1 %v1906_v3  ;;  %6544 = vmatprep.subr.bf16.mxu0 %v7526_v25  ;;  %v7529_v3 = vld [vmem:[%s7977_s25] sm:$0xff]  }
 0x2d3   : > { %6545 = vmatpush3.bf16.msra.mxu0 %v7527_v19 }
 0x2d4   : > { %6546 = vmatprep.subr.bf16.mxu0 %v7528_v26 }
 0x2d7   : > { %6547 = vmatpush3.bf16.msra.mxu0 %v7529_v3 }
 0x383   : > { %v2027_v39 = vpop.f32.mrf.mxu1 }
 0x384   : > { %v2028_v44 = vadd.f32 %v6314_v20, %v2027_v39 }
 0x385   : > { %v2029_v40 = vpop.f32.mrf.mxu1 }
 0x386   : > { %v2042_v22 = vmax.f32 %v2028_v44, 0.0 }
 0x387   : > { %v2030_v48 = vpop.f32.mrf.mxu1 }
 0x388   : > { %v2031_v49 = vadd.f32 %v6314_v20, %v2030_v48  ;;  %v2050_v54 = vrot.slane %v2042_v22, 4 }
 0x389   : > { %v2032_v51 = vpop.f32.mrf.mxu1 }
 0x38a   : > { %v2043_v52 = vmax.f32 %v2031_v49, 0.0  ;;  %v8747_v61 = vsel %vm1244_vm4, 0.0, %v2050_v54 }
 0x38b   : > { %v2142_v47 = vrot.slane %v8747_v61, 5  ;;  %v2066_v29 = vrot.slane %v8747_v61, 1  ;;  %v2163_v58 = vrot.slane %v8747_v61, 6  ;;  %v2087_v11 = vrot.slane %v8747_v61, 2 }
 0x38c   : > { %v2051_v53 = vrot.slane %v2043_v52, 4  ;;  %v2184_v33 = vrot.slane %v8747_v61, 7  ;;  %v2108_v38 = vrot.slane %v8747_v61, 3 }
 0x38e   : > { %v8744_v43 = vsel %vm1244_vm4, %v2050_v54, %v2051_v53 }
 0x38f   : > { %v2143_v23 = vrot.slane %v8744_v43, 5  ;;  %v2067_v36 = vrot.slane %v8744_v43, 1  ;;  %v2164_v12 = vrot.slane %v8744_v43, 6  ;;  %v2088_v18 = vrot.slane %v8744_v43, 2 }
 0x390   : > { %v2035_v55 = vpop.f32.mrf.mxu1  ;;  %v2185_v13 = vrot.slane %v8744_v43, 7  ;;  %v2109_v34 = vrot.slane %v8744_v43, 3 }
 0x391   : > { %v2036_v60 = vadd.f32 %v6314_v20, %v2035_v55  ;;  %v2144_v46 = vsel %vm1266_vm5, %v2142_v47, %v2143_v23  ;;  %v2068_v9 = vsel %vm1178_vm1, %v2066_v29, %v2067_v36  ;;  %v2165_v35 = vsel %vm1161_vm0, %v2163_v58, %v2164_v12 }
 0x392   : > { %v2037_v62 = vpop.f32.mrf.mxu1  ;;  %v2089_v37 = vsel %vm1200_vm3, %v2087_v11, %v2088_v18  ;;  %v2186_v52 = vsel %vm9874_vm15, %v2184_v33, %v2185_v13  ;;  %v2110_v54 = vsel %vm1222_vm2, %v2108_v38, %v2109_v34 }
 0x393   : > { %v2044_v7 = vmax.f32 %v2036_v60, 0.0 }
 0x394   : > { %v2038_v27 = vpop.f32.mrf.mxu1 }
 0x395   : > { %v2053_v5 = vrot.slane %v2044_v7, 4  ;;  %v2039_v41 = vadd.f32 %v6314_v20, %v2038_v27 }
 0x396   : > { %v2040_v56 = vpop.f32.mrf.mxu1 }
 0x397   : > { %v8761_v42 = vsel %vm1244_vm4, %v2051_v53, %v2053_v5  ;;  %v2045_v17 = vmax.f32 %v2039_v41, 0.0 }
 0x398   : > { %v2231_v50 = vpack.c.bf16 %v8761_v42, %v8744_v43  ;;  %v2145_v63 = vrot.slane %v8761_v42, 5  ;;  %v2069_v1 = vrot.slane %v8761_v42, 1  ;;  %v2166_v6 = vrot.slane %v8761_v42, 6 }
 0x399   : > { %v2055_v45 = vrot.slane %v2045_v17, 4  ;;  %v2090_v10 = vrot.slane %v8761_v42, 2  ;;  %v2187_v15 = vrot.slane %v8761_v42, 7  ;;  %v2111_v24 = vrot.slane %v8761_v42, 3 }
 0x39a   : > { %6785 = vmatprep.mubr.msk.bf16.mxu1 %vm1875_vm9, %v2231_v50  ;;  %v2146_v16 = vsel %vm1266_vm5, %v2143_v23, %v2145_v63  ;;  %v2070_v8 = vsel %vm1178_vm1, %v2067_v36, %v2069_v1  ;;  %v2167_v21 = vsel %vm1161_vm0, %v2164_v12, %v2166_v6 }
 0x39b   : > { %v8781_v32 = vsel %vm1244_vm4, %v2053_v5, %v2055_v45  ;;  %v8784_v14 = vsel %vm1244_vm4, %v2055_v45, 0.0  ;;  %v7336_v57 = vpack.i.bf16 %v2146_v16, %v2144_v46  ;;  %v7341_v30 = vpack.i.bf16 %v2070_v8, %v2068_v9 }
 0x39c   : > { %v2234_v31 = vpack.c.bf16 %v8784_v14, %v8781_v32  ;;  %v2091_v59 = vsel %vm1200_vm3, %v2088_v18, %v2090_v10  ;;  %v7346_v20 = vpack.i.bf16 %v2167_v21, %v2165_v35  ;;  %v2188_v40 = vsel %vm9873_vm12, %v2185_v13, %v2187_v15  ;;  %vm9902_vm12 = vmmov %vm9869_vm7 }
 0x39d   : > { %7337 = vrot.lane.b32.xlu0 %v7336_v57, %s9868_s11  ;;  %7342 = vrot.lane.b32.xlu1 %v7341_v30, %s9868_s11  ;;  %v7351_v39 = vpack.i.bf16 %v2091_v59, %v2089_v37  ;;  %v2147_v44 = vrot.slane %v8781_v32, 5  ;;  %v2112_v48 = vsel %vm1222_vm2, %v2109_v34, %v2111_v24  ;;  %v2149_v49 = vrot.slane %v8784_v14, 5 }
 0x39e   : > { %6786 = vmatmul.mubr.msk.bf16.vlgmr.msra.gmra.mxu1 %vm1875_vm9, %v2234_v31  ;;  %v2071_v51 = vrot.slane %v8781_v32, 1  ;;  %v2073_v22 = vrot.slane %v8784_v14, 1  ;;  %v7356_v53 = vpack.i.bf16 %v2188_v40, %v2186_v52  ;;  %v7361_v55 = vpack.i.bf16 %v2112_v48, %v2110_v54 }
 0x39f   : > { %2602 = vmatprep.mubr.bf16.mxu1 %v7935_v28  ;;  %v2148_v60 = vsel %vm1266_vm5, %v2145_v63, %v2147_v44  ;;  %v2168_v62 = vrot.slane %v8781_v32, 6  ;;  %v2170_v0 = vrot.slane %v8784_v14, 6  ;;  %v2150_v4 = vsel %vm1266_vm5, %v2147_v44, %v2149_v49 }
 0x3a0   : > { %v2072_v7 = vsel %vm1178_vm1, %v2069_v1, %v2071_v51  ;;  %v2074_v23 = vsel %vm1178_vm1, %v2071_v51, %v2073_v22  ;;  %v2092_v27 = vrot.slane %v8781_v32, 2  ;;  %v2094_v5 = vrot.slane %v8784_v14, 2 }
 0x3a1   : > { %7347 = vrot.lane.b32.xlu0 %v7346_v20, %s9870_s1  ;;  %7352 = vrot.lane.b32.xlu1 %v7351_v39, %s9870_s1  ;;  %v7366_v41 = vpack.i.bf16 %v2150_v4, %v2148_v60  ;;  %v7371_v47 = vpack.i.bf16 %v2074_v23, %v2072_v7  ;;  %v2169_v36 = vsel %vm1161_vm0, %v2166_v6, %v2168_v62  ;;  %v2189_v58 = vrot.slane %v8781_v32, 7 }
 0x3a2   : > { %v2171_v56 = vsel %vm1161_vm0, %v2168_v62, %v2170_v0  ;;  %v2093_v29 = vsel %vm1200_vm3, %v2090_v10, %v2092_v27  ;;  %v2095_v12 = vsel %vm1200_vm3, %v2092_v27, %v2094_v5  ;;  %v2191_v11 = vrot.slane %v8784_v14, 7 }
 0x3a3   : > { %v2113_v25 = vrot.slane %v8781_v32, 3  ;;  %v2115_v19 = vrot.slane %v8784_v14, 3  ;;  %v7376_v17 = vpack.i.bf16 %v2171_v56, %v2169_v36  ;;  %v7381_v46 = vpack.i.bf16 %v2095_v12, %v2093_v29 }
 0x3a4   : > { %v2190_v18 = vsel %vm9869_vm7, %v2187_v15, %v2189_v58  ;;  %v2192_v50 = vsel %vm9875_vm8, %v2189_v58, %v2191_v11  ;;  %v2132_v15 = vrot.slane %v8761_v42, 4  ;;  %v2130_v16 = vrot.slane %v8744_v43, 4 }
 0x3a5   : > { %7357 = vrot.lane.b32.xlu0 %v7356_v53, %s9872_s5  ;;  %7362 = vrot.lane.b32.xlu1 %v7361_v55, %s9872_s5  ;;  %v2114_v63 = vsel %vm1222_vm2, %v2111_v24, %v2113_v25  ;;  %v2116_v1 = vsel %vm1222_vm2, %v2113_v25, %v2115_v19  ;;  %v7386_v6 = vpack.i.bf16 %v2192_v50, %v2190_v18  ;;  %v2129_v30 = vrot.slane %v8747_v61, 4 }
 0x3a6   : > { %v7391_v45 = vpack.i.bf16 %v2116_v1, %v2114_v63  ;;  %v2133_v37 = vsel %vm1244_vm4, %v2130_v16, %v2132_v15  ;;  %v2134_v27 = vrot.slane %v8781_v32, 4  ;;  %v2136_v5 = vrot.slane %v8784_v14, 4 }
 0x3a7   : > { %v2131_v35 = vsel %vm1244_vm4, %v2129_v30, %v2130_v16 }
 0x3a9   : > { %7367 = vrot.lane.b32.xlu0 %v7366_v41, %s9868_s11  ;;  %7372 = vrot.lane.b32.xlu1 %v7371_v47, %s9868_s11 }
 0x3ad   : > { %7377 = vrot.lane.b32.xlu0 %v7376_v17, %s9870_s1  ;;  %7382 = vrot.lane.b32.xlu1 %v7381_v46, %s9870_s1  ;;  %v2135_v17 = vsel %vm1244_vm4, %v2132_v15, %v2134_v27  ;;  %v2137_v46 = vsel %vm1244_vm4, %v2134_v27, %v2136_v5 }
 0x3b1   : > { %7387 = vrot.lane.b32.xlu0 %v7386_v6, %s9872_s5  ;;  %7392 = vrot.lane.b32.xlu1 %v7391_v45, %s9872_s5 }
 0x40f   : > { %v7338_v9 = vpop.permute.xlu0 %7337  ;;  %v7343_v10 = vpop.permute.xlu1 %7342 }
 0x410   : > { %v7340_v8 = vunpack.i.h.bf16 %v7338_v9  ;;  %v7339_v21 = vunpack.i.l.bf16 %v7338_v9  ;;  %v7345_v24 = vunpack.i.h.bf16 %v7343_v10  ;;  %v7344_v26 = vunpack.i.l.bf16 %v7343_v10 }
 0x412   : > { %v2217_v38 = vsel %vm1875_vm9, %v2131_v35, %v7339_v21  ;;  %v2218_v34 = vsel %vm1875_vm9, %v2133_v37, %v7340_v8  ;;  %v2206_v20 = vsel %vm1875_vm9, %v8744_v43, %v7345_v24  ;;  %v2205_v39 = vsel %vm1875_vm9, %v8747_v61, %v7344_v26  ;;  %v7538_v35 = vld [vmem:[%s9861_s8 + $0x14] ss:$8 sps:$4 sm:$0xff]   ;;  %v7536_v37 = vld [vmem:[%s9861_s8 + $0x10] ss:$8 sps:$4 sm:$0xff]  }
 0x413   : > { %v7348_v3 = vpop.permute.xlu0 %7347  ;;  %v7353_v57 = vpop.permute.xlu1 %7352 }
 0x414   : > { %v7350_v31 = vunpack.i.h.bf16 %v7348_v3  ;;  %v7349_v59 = vunpack.i.l.bf16 %v7348_v3  ;;  %v7355_v33 = vunpack.i.h.bf16 %v7353_v57  ;;  %v7354_v13 = vunpack.i.l.bf16 %v7353_v57 }
 0x416   : > { %v2209_v52 = vsel %vm1885_vm11, %v2205_v39, %v7354_v13  ;;  %v2210_v53 = vsel %vm1885_vm11, %v2206_v20, %v7355_v33  ;;  %v2221_v54 = vsel %vm1885_vm11, %v2217_v38, %v7349_v59  ;;  %v2222_v55 = vsel %vm1885_vm11, %v2218_v34, %v7350_v31  ;;  %v7530_v31 = vld [vmem:[%s9861_s8 + $0x30] ss:$8 sps:$4 sm:$0xff]   ;;  %v7532_v59 = vld [vmem:[%s9861_s8 + $0x34] ss:$8 sps:$4 sm:$0xff]   ;;  %v7533_v33 = vld [vmem:[%s9861_s8 + $0x20] ss:$8 sps:$4 sm:$0xff]  }
 0x417   : > { %v7358_v40 = vpop.permute.xlu0 %7357  ;;  %v7363_v44 = vpop.permute.xlu1 %7362  ;;  %2578 = vmatprep.subr.bf16.mxu1 %v7532_v59  ;;  %v7535_v13 = vld [vmem:[%s9861_s8 + $0x24] ss:$8 sps:$4 sm:$0xff]   ;;  %v7539_v34 = vld [vmem:[%s9861_s8] ss:$8 sps:$4 sm:$0xff]  }
 0x418   : > { %v7360_v48 = vunpack.i.h.bf16 %v7358_v40  ;;  %v7359_v49 = vunpack.i.l.bf16 %v7358_v40  ;;  %v7365_v51 = vunpack.i.h.bf16 %v7363_v44  ;;  %v7364_v22 = vunpack.i.l.bf16 %v7363_v44  ;;  %2579 = vmatpush1.bf16.msra.mxu1 %v7530_v31  ;;  %v7541_v38 = vld [vmem:[%s9861_s8 + $0x4] ss:$8 sps:$4 sm:$0xff]   ;;  %v6326_v44 = vld [vmem:[%s7982_s29] ss:$0 sm:$0xff]  ;;  %s9879_s8 = sld [smem:[#allocation9_spill]] }
 0x419   : > { %2580 = vmatprep.subr.bf16.mxu1 %v7535_v13 }
 0x41a   : > { %v2213_v60 = vsel %vm1894_vm13, %v2209_v52, %v7364_v22  ;;  %v2214_v43 = vsel %vm1894_vm13, %v2210_v53, %v7365_v51  ;;  %v2225_v61 = vsel %vm1894_vm13, %v2221_v54, %v7359_v49  ;;  %v2226_v62 = vsel %vm1894_vm13, %v2222_v55, %v7360_v48 }
 0x41b   : > { %v7368_v0 = vpop.permute.xlu0 %7367  ;;  %v7373_v4 = vpop.permute.xlu1 %7372  ;;  %v2230_v7 = vpack.c.bf16 %v2226_v62, %v2225_v61  ;;  %v2229_v23 = vpack.c.bf16 %v2214_v43, %v2213_v60 }
 0x41c   : > { %v7370_v41 = vunpack.i.h.bf16 %v7368_v0  ;;  %v7369_v47 = vunpack.i.l.bf16 %v7368_v0  ;;  %v7375_v36 = vunpack.i.h.bf16 %v7373_v4  ;;  %v7374_v56 = vunpack.i.l.bf16 %v7373_v4  ;;  %2581 = vmatpush1.bf16.msra.mxu1 %v7533_v33  ;;  %v2494_v0 = vld [vmem:[%s9862_s3] sm:$0xff]  ;;  %v2495_v4 = vld [vmem:[%s9862_s3 + $0x8] sm:$0xff] }
 0x41d   : > { %2424 = vmatprep.mubr.bf16.mxu0 %v2230_v7  ;;  %2582 = vmatprep.subr.bf16.mxu1 %v7538_v35 }
 0x41e   : > { %2425 = vmatmul.mubr.bf16.vlgmr.msra.gmra.mxu0 %v2229_v23  ;;  %v2220_v18 = vsel %vm1875_vm9, %v2137_v46, %v7370_v41  ;;  %v2219_v50 = vsel %vm1875_vm9, %v2135_v17, %v7369_v47  ;;  %v2208_v14 = vsel %vm1875_vm9, %v8781_v32, %v7375_v36  ;;  %v2207_v63 = vsel %vm1875_vm9, %v8761_v42, %v7374_v56  ;;  %v2496_v46 = vld [vmem:[%s9862_s3 + $0x10] sm:$0xff] }
 0x41f   : > { %v7378_v29 = vpop.permute.xlu0 %7377  ;;  %v7383_v58 = vpop.permute.xlu1 %7382 }
 0x420   : > { %v7380_v12 = vunpack.i.h.bf16 %v7378_v29  ;;  %v7379_v11 = vunpack.i.l.bf16 %v7378_v29  ;;  %v7385_v25 = vunpack.i.h.bf16 %v7383_v58  ;;  %v7384_v19 = vunpack.i.l.bf16 %v7383_v58  ;;  %2583 = vmatpush1.bf16.msra.mxu1 %v7536_v37 }
 0x421   : > { %2584 = vmatprep.subr.bf16.mxu1 %v7541_v38 }
 0x422   : > { %v2223_v16 = vsel %vm1885_vm11, %v2219_v50, %v7379_v11  ;;  %v2224_v8 = vsel %vm1885_vm11, %v2220_v18, %v7380_v12  ;;  %v2211_v21 = vsel %vm1885_vm11, %v2207_v63, %v7384_v19  ;;  %v2212_v32 = vsel %vm1885_vm11, %v2208_v14, %v7385_v25  ;;  %v2497_v18 = vld [vmem:[%s9862_s3 + $0x18] sm:$0xff]  ;;  %s9878_s3 = smov 80  }
 0x423   : > { %v7388_v1 = vpop.permute.xlu0 %7387  ;;  %v7393_v6 = vpop.permute.xlu1 %7392 }
 0x424   : > { %v7390_v45 = vunpack.i.h.bf16 %v7388_v1  ;;  %v7389_v9 = vunpack.i.l.bf16 %v7388_v1  ;;  %v7395_v10 = vunpack.i.h.bf16 %v7393_v6  ;;  %v7394_v15 = vunpack.i.l.bf16 %v7393_v6  ;;  %2585 = vmatpush1.bf16.msra.mxu1 %v7539_v34 }
 0x425   : > { %v2514_v6 = vlaneseq }
 0x426   : > { %v2227_v42 = vsel %vm1894_vm13, %v2223_v16, %v7389_v9  ;;  %v2228_v24 = vsel %vm1894_vm13, %v2224_v8, %v7390_v45  ;;  %v2215_v26 = vsel %vm1894_vm13, %v2211_v21, %v7394_v15  ;;  %v2216_v3 = vsel %vm1894_vm13, %v2212_v32, %v7395_v10  ;;  %v2512_v10 = vld [vmem:[%s7997_s14] sm:$0x3]  ;;  %vm9900_vm13 = vmmov %vm9869_vm7 }
 0x427   : > { %v2233_v57 = vpack.c.bf16 %v2228_v24, %v2227_v42  ;;  %v2232_v30 = vpack.c.bf16 %v2216_v3, %v2215_v26  ;;  %v2515_v45 = vshrl.u32 %v2514_v6, 7 }
 0x429   : > { %2432 = vmatprep.mubr.bf16.mxu0 %v2233_v57  ;;  %v8906_v9 = vsub.s32 0, %v2515_v45  ;;  %v8909_v15 = vsub.s32 1, %v2515_v45 }
 0x42a   : > { %2433 = vmatmul.mubr.bf16.gmra.mxu0 %v2232_v30 }
 0x42b   : > { %v2517_v8 = vrot.slane %v2512_v10, %v8906_v9  ;;  %v2521_v32 = vrot.slane %v2512_v10, %v8909_v15 }
 0x45e   : > { %v6787_v20 = vpop.f32.mrf.mxu1 }
 0x460   : > { %v2475_v40 = vpop.f32.mrf.mxu1 }
 0x462   : > { %v6788_v52 = vpop.f32.mrf.mxu1 }
 0x464   : > { %v2478_v43 = vpop.f32.mrf.mxu1 }
 0x4de   : > { %v6548_v39 = vpop.f32.mrf.mxu0 }
 0x4e0   : > { %v6549_v48 = vpop.f32.mrf.mxu0 }
 0x4e1   : > { %v6550_v49 = vadd.f32 %v6549_v48, %v6548_v39 }
 0x4e2   : > { %v6551_v51 = vpop.f32.mrf.mxu0 }
 0x4e3   : > { %v2427_v22 = vadd.f32 %v6550_v49, %v6326_v44 }
 0x4e4   : > { %v6552_v53 = vpop.f32.mrf.mxu0 }
 0x4e5   : > { %v2476_v54 = vadd.f32 %v2475_v40, %v2427_v22  ;;  %v6553_v55 = vadd.f32 %v6552_v53, %v6551_v51 }
 0x4e7   : > { %v2430_v60 = vadd.f32 %v6553_v55, %v6326_v44  ;;  %v2490_v61 = vmax.f32 %v2476_v54, 0.0 }
 0x4e9   : > { %v2479_v62 = vadd.f32 %v2478_v43, %v2430_v60  ;;  %v8889_v5 = vadd.f32 %v2494_v0, %v2490_v61 }
 0x4ea   : > { %v6554_v7 = vpop.f32.mrf.mxu0 }
 0x4eb   : > { %v2491_v23 = vmax.f32 %v2479_v62, 0.0 }
 0x4ec   : > { %v6555_v27 = vpop.f32.mrf.mxu0 }
 0x4ed   : > { %v8891_v41 = vadd.f32 %v2495_v4, %v2491_v23  ;;  %v6556_v47 = vadd.f32 %v6555_v27, %v6554_v7 }
 0x4ee   : > { %v6557_v36 = vpop.f32.mrf.mxu0 }
 0x4ef   : > { %v2502_v56 = vpack.c.bf16 %v8891_v41, %v8889_v5  ;;  %v2435_v29 = vadd.f32 %v6556_v47, %v6326_v44 }
 0x4f0   : > { %v6558_v58 = vpop.f32.mrf.mxu0 }
 0x4f1   : > { %v2484_v12 = vadd.f32 %v6787_v20, %v2435_v29  ;;  %v6559_v11 = vadd.f32 %v6558_v58, %v6557_v36  ;;  %6355 = vmatmul.mubr.msk.bf16.vlgmr.msra.gmra.mxu1 %vm1885_vm11, %v2502_v56 }
 0x4f2   : > { %2612 = vmatprep.mubr.bf16.mxu1 %v7935_v28 }
 0x4f3   : > { %v2438_v25 = vadd.f32 %v6559_v11, %v6326_v44  ;;  %v2492_v19 = vmax.f32 %v2484_v12, 0.0 }
 0x4f5   : > { %v2487_v17 = vadd.f32 %v6788_v52, %v2438_v25  ;;  %v8899_v14 = vadd.f32 %v2496_v46, %v2492_v19 }
 0x4f7   : > { %v2493_v50 = vmax.f32 %v2487_v17, 0.0 }
 0x4f9   : > { %v8901_v63 = vadd.f32 %v2497_v18, %v2493_v50 }
 0x4fb   : > { %v2503_v1 = vpack.c.bf16 %v8901_v63, %v8899_v14 }
 0x4fd   : > { %6356 = vmatmul.mubr.msk.bf16.gmra.mxu1 %vm1885_vm11, %v2503_v1 }
 0x5b1   : > { %v2604_v16 = vpop.f32.mrf.mxu1 }
 0x5b2   : > { %v2605_v24 = vadd.f32 %v2604_v16, %v2517_v8 }
 0x5b3   : > { %v2606_v21 = vpop.f32.mrf.mxu1 }
 0x5b4   : > { %v2607_v57 = vadd.f32 %v2606_v21, %v2521_v32 }
 0x5b5   : > { %v2608_v42 = vpop.f32.mrf.mxu1 }
 0x5b6   : > { %v2609_v26 = vadd.f32 %v2608_v42, %v2517_v8 }
 0x5b7   : > { %v2610_v3 = vpop.f32.mrf.mxu1 }
 0x5b8   : > { %v8913_v30 = vpack.c.bf16 %v2609_v26, %v2605_v24  ;;  %v2611_v31 = vadd.f32 %v2610_v3, %v2521_v32 }
 0x5ba   : > { %v8915_v59 = vpack.c.bf16 %v2611_v31, %v2607_v57  ;;  %6793 = vmatprep.mubr.msk.bf16.mxu0 %vm1870_vm6, %v8913_v30 }
 0x5bd   : > { %v2614_v33 = vpop.f32.mrf.mxu1 }
 0x5be   : > { %v2615_v37 = vadd.f32 %v2614_v33, %v2517_v8 }
 0x5bf   : > { %v2616_v13 = vpop.f32.mrf.mxu1 }
 0x5c0   : > { %v2617_v52 = vadd.f32 %v2616_v13, %v2521_v32 }
 0x5c1   : > { %v2618_v35 = vpop.f32.mrf.mxu1 }
 0x5c2   : > { %v2619_v38 = vadd.f32 %v2618_v35, %v2517_v8 }
 0x5c3   : > { %v2620_v48 = vpop.f32.mrf.mxu1 }
 0x5c4   : > { %v8919_v34 = vpack.c.bf16 %v2619_v38, %v2615_v37  ;;  %v2621_v22 = vadd.f32 %v2620_v48, %v2521_v32 }
 0x5c6   : > { %2805 = vrot.lane.b32.xlu1 %v8919_v34, %s9876_s28  ;;  %2631 = vrot.lane.b32.xlu0 %v8919_v34, %s9870_s1  ;;  %v8947_v54 = vpack.c.bf16 %v2621_v22, %v2617_v52 }
 0x5ca   : > { %2803 = vrot.lane.b32.xlu1 %v8913_v30, %s9876_s28  ;;  %2629 = vrot.lane.b32.xlu0 %v8913_v30, %s9870_s1 }
 0x5ce   : > { %2987 = vrot.lane.b32.xlu1 %v8919_v34, %s9868_s11  ;;  %2799 = vrot.lane.b32.xlu0 %v8913_v30, %s9821_s23 }
 0x5d2   : > { %2985 = vrot.lane.b32.xlu1 %v8913_v30, %s9868_s11  ;;  %2801 = vrot.lane.b32.xlu0 %v8919_v34, %s9821_s23 }
 0x5d6   : > { %2983 = vrot.lane.b32.xlu1 %v8919_v34, %s9872_s5  ;;  %2981 = vrot.lane.b32.xlu0 %v8913_v30, %s9872_s5 }
 0x638   : > { %v2806_v20 = vpop.permute.xlu1 %2805  ;;  %v2632_v39 = vpop.permute.xlu0 %2631 }
 0x639   : > { %6967 = vmatprep.subr.msk.bf16.mxu0 %vm1870_vm6, %v2632_v39  ;;  %6969 = vmatprep.subr.msk.bf16.mxu1 %vm1870_vm6, %v2806_v20  ;;  %v2643_v40 = vsel %vm1870_vm6, %v2632_v39, 0  ;;  %v2817_v44 = vsel %vm1870_vm6, %v2806_v20, 0 }
 0x63a   : > { %6790 = vmatpush3.bf16.xpose.msra.mxu0 %v2643_v40  ;;  %6806 = vmatpush3.bf16.xpose.msra.mxu1 %v2817_v44 }
 0x63c   : > { %v2804_v49 = vpop.permute.xlu1 %2803  ;;  %v2630_v51 = vpop.permute.xlu0 %2629 }
 0x63d   : > { %6968 = vmatprep.subr.msk.bf16.mxu0 %vm1870_vm6, %v2630_v51  ;;  %6970 = vmatprep.subr.msk.bf16.mxu1 %vm1870_vm6, %v2804_v49  ;;  %v2640_v55 = vsel %vm1870_vm6, %v2630_v51, 0  ;;  %v2814_v60 = vsel %vm1870_vm6, %v2804_v49, 0 }
 0x640   : > { %v2800_v53 = vpop.permute.xlu0 %2799  ;;  %v2988_v43 = vpop.permute.xlu1 %2987 }
 0x641   : > { %6809 = vmatprep.mubr.msk.bf16.mxu1 %vm1870_vm6, %v2800_v53  ;;  %v2999_v0 = vsel %vm1870_vm6, %v2988_v43, 0 }
 0x642   : > { %6792 = vmatpush3.bf16.xpose.msra.mxu0 %v2640_v55  ;;  %6808 = vmatpush3.bf16.xpose.msra.mxu1 %v2814_v60 }
 0x643   : > { %6797 = vmatprep.subr.bf16.mxu0 %v8947_v54  ;;  %6971 = vmatprep.subr.msk.bf16.mxu1 %vm1870_vm6, %v2988_v43 }
 0x644   : > { %v2802_v61 = vpop.permute.xlu0 %2801  ;;  %v2986_v4 = vpop.permute.xlu1 %2985 }
 0x645   : > { %v2996_v7 = vsel %vm1870_vm6, %v2986_v4, 0 }
 0x648   : > { %v2982_v62 = vpop.permute.xlu0 %2981  ;;  %v2984_v23 = vpop.permute.xlu1 %2983 }
 0x649   : > { %6794 = vmatmul.mubr.msk.bf16.vlgmr.msra.gmra.mxu0 %vm1870_vm6, %v8919_v34  ;;  %6810 = vmatmul.mubr.msk.bf16.vlgmr.msra.gmra.mxu1 %vm1870_vm6, %v2802_v61 }
 0x64a   : > { %6798 = vmatpush3.bf16.msra.mxu0 %v8947_v54  ;;  %6822 = vmatpush3.bf16.xpose.msra.mxu1 %v2999_v0 }
 0x64b   : > { %6825 = vmatprep.mubr.msk.bf16.mxu1 %vm1870_vm6, %v2982_v62  ;;  %6799 = vmatprep.subr.bf16.mxu0 %v8915_v59 }
 0x64c   : > { %6972 = vmatprep.subr.msk.bf16.mxu1 %vm1870_vm6, %v2986_v4 }
 0x64e   : > { %6800 = vmatpush3.bf16.msra.mxu0 %v8915_v59 }
 0x652   : > { %6824 = vmatpush3.bf16.xpose.msra.mxu1 %v2996_v7 }
 0x659   : > { %6826 = vmatmul.mubr.msk.bf16.vlgmr.msra.gmra.mxu1 %vm1870_vm6, %v2984_v23 }
 0x709   : > { %v6795_v27 = vpop.f32.mrf.mxu0  ;;  %v6811_v47 = vpop.f32.mrf.mxu1 }
 0x70a   : > { %v2696_v36 = vmul.f32 0.25, %v6795_v27  ;;  %v2870_v56 = vmul.f32 0.25, %v6811_v47 }
 0x70b   : > { %v2679_v29 = vpop.f32.mrf.mxu0  ;;  %v2853_v58 = vpop.f32.mrf.mxu1 }
 0x70c   : > { %v2694_v12 = vmul.f32 0.25, %v2679_v29  ;;  %v2868_v11 = vmul.f32 0.25, %v2853_v58  ;;  %v2878_v25 = vsel %vm1875_vm9, %v2870_v56, -inf  ;;  %v2704_v19 = vsel %vm1875_vm9, %v2696_v36, -inf }
 0x70d   : > { %2879 = vmax.xlane.f32.xlu1 %v2878_v25  ;;  %v6812_v17 = vpop.f32.mrf.mxu1  ;;  %2705 = vmax.xlane.f32.xlu0 %v2704_v19  ;;  %v6796_v46 = vpop.f32.mrf.mxu0 }
 0x70e   : > { %v2697_v50 = vmul.f32 0.25, %v6796_v46  ;;  %v2872_v6 = vsel %vm1875_vm9, %v2868_v11, -inf  ;;  %v2698_v45 = vsel %vm1875_vm9, %v2694_v12, -inf  ;;  %v2871_v32 = vmul.f32 0.25, %v6812_v17 }
 0x70f   : > { %v2682_v18 = vpop.f32.mrf.mxu0  ;;  %v2856_v10 = vpop.f32.mrf.mxu1 }
 0x710   : > { %v2695_v1 = vmul.f32 0.25, %v2682_v18  ;;  %v8969_v16 = vmul.f32 0.25, %v2856_v10  ;;  %v2707_v8 = vsel %vm1875_vm9, %v2697_v50, -inf  ;;  %v2881_v31 = vsel %vm1875_vm9, %v2871_v32, -inf }
 0x711   : > { %2873 = vmax.xlane.f32.xlu1 %v2872_v6  ;;  %2699 = vmax.xlane.f32.xlu0 %v2698_v45 }
 0x712   : > { %v2701_v21 = vsel %vm1875_vm9, %v2695_v1, -inf  ;;  %v2875_v42 = vsel %vm1875_vm9, %v8969_v16, -inf }
 0x715   : > { %2708 = vmax.xlane.f32.xlu0 %v2707_v8  ;;  %2702 = vmax.xlane.f32.xlu1 %v2701_v21 }
 0x719   : > { %v6827_v24 = vpop.f32.mrf.mxu1  ;;  %2876 = vmax.xlane.f32.xlu0 %v2875_v42 }
 0x71a   : > { %v8975_v26 = vmul.f32 0.25, %v6827_v24 }
 0x71b   : > { %v3035_v3 = vpop.f32.mrf.mxu1 }
 0x71c   : > { %v8977_v57 = vmul.f32 0.25, %v3035_v3  ;;  %v3060_v33 = vsel %vm1875_vm9, %v8975_v26, -inf }
 0x71d   : > { %v6828_v13 = vpop.f32.mrf.mxu1  ;;  %2882 = vmax.xlane.f32.xlu0 %v2881_v31  ;;  %3061 = vmax.xlane.f32.xlu1 %v3060_v33 }
 0x71e   : > { %v3054_v38 = vsel %vm1875_vm9, %v8977_v57, -inf  ;;  %v8986_v20 = vmul.f32 0.25, %v6828_v13 }
 0x71f   : > { %v3038_v35 = vpop.f32.mrf.mxu1 }
 0x720   : > { %v8982_v37 = vmul.f32 0.25, %v3038_v35  ;;  %v3063_v40 = vsel %vm1875_vm9, %v8986_v20, -inf }
 0x721   : > { %3055 = vmax.xlane.f32.xlu1 %v3054_v38 }
 0x722   : > { %v3057_v39 = vsel %vm1875_vm9, %v8982_v37, -inf }
 0x723   : > { %3058 = vmax.xlane.f32.xlu0 %v3057_v39 }
 0x727   : > { %3064 = vmax.xlane.f32.xlu0 %v3063_v40 }
 0x732   : > { %2922 = vrot.lane.b32.xlu1 %v8947_v54, %s9821_s23 }
 0x796   : > { %v2880_v44 = vpop.xlane.xlu1 %2879  ;;  %v2706_v48 = vpop.xlane.xlu0 %2705 }
 0x797   : > { %v2886_v49 = vsub.f32 %v2870_v56, %v2880_v44  ;;  %v2712_v51 = vsub.f32 %v2696_v36, %v2706_v48 }
 0x799   : > { %v2718_v22 = vmul.f32 1.442695, %v2712_v51  ;;  %v2892_v52 = vmul.f32 1.442695, %v2886_v49 }
 0x79a   : > { %v2700_v53 = vpop.xlane.xlu0 %2699  ;;  %v2874_v55 = vpop.xlane.xlu1 %2873 }
 0x79b   : > { %v2710_v60 = vsub.f32 %v2694_v12, %v2700_v53  ;;  %7657 = vpow2.f32 %v2718_v22  ;;  %v2884_v43 = vsub.f32 %v2868_v11, %v2874_v55 }
 0x79c   : > { %7659 = vpow2.f32 %v2892_v52 }
 0x79d   : > { %v2714_v61 = vmul.f32 1.442695, %v2710_v60  ;;  %v2888_v7 = vmul.f32 1.442695, %v2884_v43 }
 0x79e   : > { %v2709_v62 = vpop.xlane.xlu0 %2708  ;;  %v2703_v23 = vpop.xlane.xlu1 %2702 }
 0x79f   : > { %v2713_v0 = vsub.f32 %v2697_v50, %v2709_v62  ;;  %7661 = vpow2.f32 %v2714_v61  ;;  %v2711_v47 = vsub.f32 %v2695_v1, %v2703_v23 }
 0x7a1   : > { %v2720_v4 = vmul.f32 1.442695, %v2713_v0  ;;  %v2716_v12 = vmul.f32 1.442695, %v2711_v47 }
 0x7a2   : > { %v2877_v27 = vpop.xlane.xlu0 %2876 }
 0x7a3   : > { %7663 = vpow2.f32 %v2720_v4  ;;  %v2885_v35 = vsub.f32 %v8969_v16, %v2877_v27 }
 0x7a4   : > { %7665 = vpow2.f32 %v2888_v7 }
 0x7a5   : > { %v2890_v40 = vmul.f32 1.442695, %v2885_v35 }
 0x7a6   : > { %v2883_v36 = vpop.xlane.xlu0 %2882  ;;  %v3062_v56 = vpop.xlane.xlu1 %3061 }
 0x7a7   : > { %v2887_v29 = vsub.f32 %v2871_v32, %v2883_v36  ;;  %v3068_v3 = vsub.f32 %v8975_v26, %v3062_v56 }
 0x7a8   : > { %v8994_v58 = vpop.eup %7657 }
 0x7a9   : > { %v2894_v25 = vmul.f32 1.442695, %v2887_v29  ;;  %v2728_v11 = vsel %vm1875_vm9, %v8994_v58, 0.0  ;;  %v8998_v17 = vpop.eup %7659  ;;  %v3074_v33 = vmul.f32 1.442695, %v3068_v3 }
 0x7aa   : > { %v3056_v19 = vpop.xlane.xlu1 %3055  ;;  %2729 = vadd.xlane.f32.xlu1 %v2728_v11  ;;  %v2902_v46 = vsel %vm1875_vm9, %v8998_v17, 0.0 }
 0x7ab   : > { %7667 = vpow2.f32 %v2894_v25  ;;  %v3066_v13 = vsub.f32 %v8977_v57, %v3056_v19 }
 0x7ac   : > { %7669 = vpow2.f32 %v2716_v12  ;;  %v9004_v50 = vpop.eup %7661  ;;  %v3059_v31 = vpop.xlane.xlu0 %3058 }
 0x7ad   : > { %v2722_v45 = vsel %vm1875_vm9, %v9004_v50, 0.0  ;;  %7671 = vpow2.f32 %v3074_v33  ;;  %v3070_v38 = vmul.f32 1.442695, %v3066_v13  ;;  %v3067_v48 = vsub.f32 %v8982_v37, %v3059_v31 }
 0x7ae   : > { %v9002_v18 = vpop.permute.xlu1 %2922  ;;  %2903 = vadd.xlane.f32.xlu1 %v2902_v46 }
 0x7af   : > { %6813 = vmatprep.subr.bf16.mxu0 %v9002_v18  ;;  %7673 = vpow2.f32 %v3070_v38  ;;  %v3072_v49 = vmul.f32 1.442695, %v3067_v48 }
 0x7b0   : > { %v9007_v1 = vpop.eup %7663  ;;  %v3065_v39 = vpop.xlane.xlu0 %3064  ;;  %7675 = vpow2.f32 %v2890_v40 }
 0x7b1   : > { %v2731_v6 = vsel %vm1875_vm9, %v9007_v1, 0.0  ;;  %v9013_v10 = vpop.eup %7665  ;;  %v3069_v44 = vsub.f32 %v8986_v20, %v3065_v39 }
 0x7b2   : > { %2732 = vadd.xlane.f32.xlu0 %v2731_v6  ;;  %2723 = vadd.xlane.f32.xlu1 %v2722_v45  ;;  %v2896_v8 = vsel %vm1875_vm9, %v9013_v10, 0.0 }
 0x7b3   : > { %v3076_v26 = vmul.f32 1.442695, %v3069_v44 }
 0x7b5   : > { %7677 = vpow2.f32 %v3076_v26 }
 0x7b6   : > { %2897 = vadd.xlane.f32.xlu1 %v2896_v8  ;;  %7679 = vpow2.f32 %v3072_v49 }
 0x7b8   : > { %v9017_v21 = vpop.eup %7667 }
 0x7b9   : > { %v2905_v32 = vsel %vm1875_vm9, %v9017_v21, 0.0  ;;  %v7670_v42 = vpop.eup %7669 }
 0x7ba   : > { %2906 = vadd.xlane.f32.xlu0 %v2905_v32  ;;  %v2725_v24 = vsel %vm1875_vm9, %v7670_v42, 0.0  ;;  %v9031_v51 = vpop.eup %7671 }
 0x7bb   : > { %v3084_v57 = vsel %vm1875_vm9, %v9031_v51, 0.0 }
 0x7bc   : > { %v9035_v16 = vpop.eup %7673 }
 0x7bd   : > { %v9037_v22 = vpop.eup %7675  ;;  %v3078_v20 = vsel %vm1875_vm9, %v9035_v16, 0.0 }
 0x7be   : > { %2726 = vadd.xlane.f32.xlu0 %v2725_v24  ;;  %v2899_v37 = vsel %vm1875_vm9, %v9037_v22, 0.0 }
 0x7c2   : > { %v9043_v52 = vpop.eup %7677 }
 0x7c3   : > { %v3087_v53 = vsel %vm1875_vm9, %v9043_v52, 0.0  ;;  %v9047_v55 = vpop.eup %7679 }
 0x7c4   : > { %v3081_v60 = vsel %vm1875_vm9, %v9047_v55, 0.0 }
 0x7c7   : > { %3102 = vrot.lane.b32.xlu1 %v8947_v54, %s9872_s5 }
 0x7d4   : > { %2920 = vrot.lane.b32.xlu0 %v8915_v59, %s9821_s23  ;;  %s9877_s23 = smov 16  }
 0x7eb   : > { %3085 = vadd.xlane.f32.xlu1 %v3084_v57 }
 0x7ef   : > { %3079 = vadd.xlane.f32.xlu1 %v3078_v20 }
 0x7f3   : > { %2900 = vadd.xlane.f32.xlu0 %v2899_v37 }
 0x7f7   : > { %3088 = vadd.xlane.f32.xlu0 %v3087_v53 }
 0x7fb   : > { %3082 = vadd.xlane.f32.xlu0 %v3081_v60 }
 0x800   : > { %3100 = vrot.lane.b32.xlu1 %v8915_v59, %s9872_s5 }
 0x804   : > { %3165 = vrot.lane.b32.xlu1 %v8913_v30, %s9877_s23 }
 0x808   : > { %3163 = vrot.lane.b32.xlu1 %v8919_v34, %s9878_s3 }
 0x811   : > { %3167 = vrot.lane.b32.xlu0 %v8919_v34, %s9877_s23 }
 0x815   : > { %3161 = vrot.lane.b32.xlu0 %v8913_v30, %s9878_s3 }
 0x833   : > { %v2730_v43 = vpop.xlane.xlu1 %2729 }
 0x837   : > { %v2904_v61 = vpop.xlane.xlu1 %2903 }
 0x83b   : > { %v2733_v62 = vpop.xlane.xlu0 %2732  ;;  %v2724_v0 = vpop.xlane.xlu1 %2723 }
 0x83c   : > { %7681 = vrcp.f32 %v2733_v62 }
 0x83d   : > { %7683 = vrcp.f32 %v2724_v0 }
 0x83e   : > { %7685 = vrcp.f32 %v2730_v43 }
 0x83f   : > { %v2898_v11 = vpop.xlane.xlu1 %2897 }
 0x843   : > { %v2907_v4 = vpop.xlane.xlu0 %2906  ;;  %v3103_v46 = vpop.permute.xlu1 %3102 }
 0x847   : > { %v2727_v7 = vpop.xlane.xlu0 %2726 }
 0x848   : > { %7687 = vrcp.f32 %v2727_v7 }
 0x849   : > { %v7682_v23 = vpop.eup %7681  ;;  %7689 = vrcp.f32 %v2907_v4 }
 0x84a   : > { %v7684_v27 = vpop.eup %7683  ;;  %v2741_v56 = vmul.f32 %v7682_v23, %v9007_v1  ;;  %7691 = vrcp.f32 %v2898_v11 }
 0x84b   : > { %v7686_v47 = vpop.eup %7685  ;;  %v2738_v34 = vmul.f32 %v7684_v27, %v9004_v50  ;;  %v2921_v19 = vpop.permute.xlu0 %2920  ;;  %7693 = vrcp.f32 %v2904_v61 }
 0x84c   : > { %v2740_v30 = vmul.f32 %v7686_v47, %v8994_v58 }
 0x84e   : > { %v2743_v25 = vpack.c.bf16 %v2741_v56, %v2740_v30 }
 0x855   : > { %v7688_v36 = vpop.eup %7687 }
 0x856   : > { %v2739_v29 = vmul.f32 %v7688_v36, %v7670_v42  ;;  %v7690_v8 = vpop.eup %7689 }
 0x857   : > { %v7692_v32 = vpop.eup %7691  ;;  %v2915_v24 = vmul.f32 %v7690_v8, %v9017_v21 }
 0x858   : > { %v2742_v12 = vpack.c.bf16 %v2739_v29, %v2738_v34  ;;  %v2912_v3 = vmul.f32 %v7692_v32, %v9013_v10 }
 0x85a   : > { %6801 = vmatprep.mubr.msk.bf16.mxu0 %vm1875_vm9, %v2742_v12 }
 0x85b   : > { %6802 = vmatmul.mubr.msk.bf16.vlgmr.msra.gmra.mxu0 %vm1875_vm9, %v2743_v25 }
 0x85c   : > { %6814 = vmatpush3.bf16.msra.mxu0 %v9002_v18  ;;  %v7694_v18 = vpop.eup %7693 }
 0x85d   : > { %6815 = vmatprep.subr.bf16.mxu0 %v2921_v19  ;;  %v2914_v33 = vmul.f32 %v7694_v18, %v8998_v17 }
 0x85f   : > { %v2917_v35 = vpack.c.bf16 %v2915_v24, %v2914_v33 }
 0x860   : > { %6816 = vmatpush3.bf16.msra.mxu0 %v2921_v19 }
 0x861   : > { %6829 = vmatprep.subr.bf16.mxu0 %v3103_v46 }
 0x874   : > { %v3086_v1 = vpop.xlane.xlu1 %3085 }
 0x878   : > { %v3080_v58 = vpop.xlane.xlu1 %3079 }
 0x87c   : > { %v2901_v50 = vpop.xlane.xlu0 %2900  ;;  %v3101_v44 = vpop.permute.xlu1 %3100 }
 0x87d   : > { %7695 = vrcp.f32 %v2901_v50 }
 0x880   : > { %v3089_v6 = vpop.xlane.xlu0 %3088  ;;  %v3166_v53 = vpop.permute.xlu1 %3165 }
 0x881   : > { %7697 = vrcp.f32 %v3089_v6 }
 0x882   : > { %7699 = vrcp.f32 %v3080_v58 }
 0x883   : > { %7701 = vrcp.f32 %v3086_v1 }
 0x884   : > { %v3083_v45 = vpop.xlane.xlu0 %3082 }
 0x885   : > { %7703 = vrcp.f32 %v3083_v45 }
 0x888   : > { %v3168_v26 = vpop.permute.xlu0 %3167 }
 0x889   : > { %v3179_v37 = vsel %vm1870_vm6, %v3168_v26, 0 }
 0x88a   : > { %v7696_v42 = vpop.eup %7695 }
 0x88b   : > { %v2913_v31 = vmul.f32 %v7696_v42, %v9037_v22 }
 0x88c   : > { %v3162_v20 = vpop.permute.xlu0 %3161 }
 0x88d   : > { %v2916_v13 = vpack.c.bf16 %v2913_v31, %v2912_v3 }
 0x88e   : > { %v7698_v38 = vpop.eup %7697 }
 0x88f   : > { %6817 = vmatprep.mubr.msk.bf16.mxu0 %vm1875_vm9, %v2916_v13  ;;  %v7700_v39 = vpop.eup %7699  ;;  %v3097_v10 = vmul.f32 %v7698_v38, %v9043_v52 }
 0x890   : > { %6818 = vmatmul.mubr.msk.bf16.vlgmr.msra.gmra.mxu0 %vm1875_vm9, %v2917_v35  ;;  %v7702_v40 = vpop.eup %7701  ;;  %v3094_v21 = vmul.f32 %v7700_v39, %v9035_v16  ;;  %v3164_v16 = vpop.permute.xlu1 %3163 }
 0x891   : > { %6830 = vmatpush3.bf16.msra.mxu0 %v3103_v46  ;;  %v3096_v49 = vmul.f32 %v7702_v40, %v9031_v51  ;;  %v3176_v51 = vsel %vm1870_vm6, %v3166_v53, 0 }
 0x892   : > { %v7704_v48 = vpop.eup %7703  ;;  %6831 = vmatprep.subr.bf16.mxu0 %v3101_v44 }
 0x893   : > { %v3095_v17 = vmul.f32 %v7704_v48, %v9047_v55  ;;  %v3099_v22 = vpack.c.bf16 %v3097_v10, %v3096_v49 }
 0x895   : > { %6832 = vmatpush3.bf16.msra.mxu0 %v3101_v44  ;;  %v3098_v57 = vpack.c.bf16 %v3095_v17, %v3094_v21 }
 0x896   : > { %6973 = vmatprep.subr.msk.bf16.mxu0 %vm1870_vm6, %v3168_v26 }
 0x897   : > { %6833 = vmatprep.mubr.msk.bf16.mxu0 %vm1875_vm9, %v3098_v57 }
 0x898   : > { %6834 = vmatmul.mubr.msk.bf16.vlgmr.msra.gmra.mxu0 %vm1875_vm9, %v3099_v22 }
 0x899   : > { %6838 = vmatpush3.bf16.xpose.msra.mxu0 %v3179_v37  ;;  %6841 = vmatprep.mubr.msk.bf16.mxu0 %vm1870_vm6, %v3162_v20 }
 0x89a   : > { %6974 = vmatprep.subr.msk.bf16.mxu0 %vm1870_vm6, %v3166_v53 }
 0x8a1   : > { %6840 = vmatpush3.bf16.xpose.msra.mxu0 %v3176_v51 }
 0x8a8   : > { %6842 = vmatmul.mubr.msk.bf16.vlgmr.msra.gmra.mxu0 %vm1870_vm6, %v3164_v16 }
 0x8a9   : > { %3676 = vmatprep.mubr.bf16.mxu0 %v7935_v28 }
 0x91b   : > { %v9086_v52 = vpop.f32.mrf.mxu0 }
 0x91d   : > { %v9088_v55 = vpop.f32.mrf.mxu0 }
 0x91f   : > { %v9090_v60 = vpop.f32.mrf.mxu0 }
 0x921   : > { %v9092_v43 = vpop.f32.mrf.mxu0 }
 0x950   : > { %v6819_v61 = vpop.f32.mrf.mxu0 }
 0x952   : > { %v2966_v62 = vpop.f32.mrf.mxu0 }
 0x954   : > { %v6820_v0 = vpop.f32.mrf.mxu0 }
 0x955   : > { %v7401_v4 = vpack.i.bf16 %v6820_v0, %v6819_v61 }
 0x956   : > { %v2969_v7 = vpop.f32.mrf.mxu0 }
 0x957   : > { %v7396_v23 = vpack.i.bf16 %v2969_v7, %v2966_v62 }
 0x958   : > { %v6835_v27 = vpop.f32.mrf.mxu0 }
 0x95a   : > { %v3146_v47 = vpop.f32.mrf.mxu0 }
 0x95c   : > { %v6836_v36 = vpop.f32.mrf.mxu0 }
 0x95d   : > { %v7411_v56 = vpack.i.bf16 %v6836_v36, %v6835_v27  ;;  %v7542_v36 = vld [vmem:[%s8002_s19 + $0x18] sm:$0xff]  }
 0x95e   : > { %v3149_v34 = vpop.f32.mrf.mxu0 }
 0x95f   : > { %v7406_v29 = vpack.i.bf16 %v3149_v34, %v3146_v47  ;;  %v7544_v34 = vld [vmem:[%s8002_s19 + $0x8] sm:$0xff]  }
 0x968   : > { %v6843_v30 = vpop.f32.mrf.mxu0 }
 0x969   : > { %v3232_v19 = vmul.f32 0.25, %v6843_v30 }
 0x96a   : > { %v3215_v12 = vpop.f32.mrf.mxu0 }
 0x96b   : > { %v3230_v25 = vmul.f32 0.25, %v3215_v12  ;;  %v3240_v6 = vsel %vm1875_vm9, %v3232_v19, -inf }
 0x96c   : > { %v6844_v11 = vpop.f32.mrf.mxu0 }
 0x96d   : > { %v3234_v46 = vsel %vm1875_vm9, %v3230_v25, -inf  ;;  %v3233_v58 = vmul.f32 0.25, %v6844_v11 }
 0x96e   : > { %3235 = vmax.xlane.f32.xlu0 %v3234_v46  ;;  %v3218_v1 = vpop.f32.mrf.mxu0 }
 0x96f   : > { %v3231_v50 = vmul.f32 0.25, %v3218_v1  ;;  %v3243_v8 = vsel %vm1875_vm9, %v3233_v58, -inf }
 0x971   : > { %v3237_v45 = vsel %vm1875_vm9, %v3231_v50, -inf }
 0x972   : > { %3241 = vmax.xlane.f32.xlu0 %v3240_v6  ;;  %3238 = vmax.xlane.f32.xlu1 %v3237_v45 }
 0x976   : > { %3244 = vmax.xlane.f32.xlu0 %v3243_v8 }
 0x9f7   : > { %v3236_v32 = vpop.xlane.xlu0 %3235 }
 0x9f8   : > { %v3246_v18 = vsub.f32 %v3230_v25, %v3236_v32 }
 0x9fa   : > { %v3250_v31 = vmul.f32 1.442695, %v3246_v18 }
 0x9fb   : > { %v3242_v42 = vpop.xlane.xlu0 %3241  ;;  %v3239_v24 = vpop.xlane.xlu1 %3238 }
 0x9fc   : > { %v3248_v3 = vsub.f32 %v3232_v19, %v3242_v42  ;;  %v3247_v13 = vsub.f32 %v3231_v50, %v3239_v24 }
 0x9fe   : > { %v3254_v33 = vmul.f32 1.442695, %v3248_v3  ;;  %v3252_v39 = vmul.f32 1.442695, %v3247_v13 }
 0x9ff   : > { %v3245_v35 = vpop.xlane.xlu0 %3244 }
 0xa00   : > { %7705 = vpow2.f32 %v3254_v33  ;;  %v3249_v38 = vsub.f32 %v3233_v58, %v3245_v35 }
 0xa01   : > { %7707 = vpow2.f32 %v3250_v31 }
 0xa02   : > { %v3256_v40 = vmul.f32 1.442695, %v3249_v38 }
 0xa04   : > { %7709 = vpow2.f32 %v3256_v40 }
 0xa05   : > { %7711 = vpow2.f32 %v3252_v39 }
 0xa0d   : > { %v7706_v44 = vpop.eup %7705 }
 0xa0e   : > { %v3264_v48 = vsel %vm1875_vm9, %v7706_v44, 0.0  ;;  %v7708_v26 = vpop.eup %7707 }
 0xa0f   : > { %3265 = vadd.xlane.f32.xlu1 %v3264_v48  ;;  %v3258_v17 = vsel %vm1875_vm9, %v7708_v26, 0.0 }
 0xa11   : > { %v7710_v10 = vpop.eup %7709 }
 0xa12   : > { %v3267_v21 = vsel %vm1875_vm9, %v7710_v10, 0.0  ;;  %v7712_v49 = vpop.eup %7711 }
 0xa13   : > { %3268 = vadd.xlane.f32.xlu0 %v3267_v21  ;;  %3259 = vadd.xlane.f32.xlu1 %v3258_v17  ;;  %v3261_v57 = vsel %vm1875_vm9, %v7712_v49, 0.0 }
 0xa17   : > { %3262 = vadd.xlane.f32.xlu0 %v3261_v57 }
 0xa24   : > { %3282 = vrot.lane.b32.xlu1 %v8947_v54, %s9878_s3 }
 0xa28   : > { %7397 = vrot.lane.b32.xlu1 %v7396_v23, %s9877_s23 }
 0xa2c   : > { %7402 = vrot.lane.b32.xlu1 %v7401_v4, %s9877_s23 }
 0xa2d   : > { %3280 = vrot.lane.b32.xlu0 %v8915_v59, %s9878_s3 }
 0xa30   : > { %7412 = vrot.lane.b32.xlu1 %v7411_v56, %s9868_s11  ;;  %v7543_v56 = vld [vmem:[%s8002_s19 + $0x10] sm:$0xff]  }
 0xa31   : > { %7407 = vrot.lane.b32.xlu0 %v7406_v29, %s9868_s11  ;;  %v7545_v29 = vld [vmem:[%s8002_s19] sm:$0xff]  }
 0xa98   : > { %v3266_v22 = vpop.xlane.xlu1 %3265 }
 0xa9c   : > { %v3269_v20 = vpop.xlane.xlu0 %3268  ;;  %v3260_v37 = vpop.xlane.xlu1 %3259 }
 0xa9d   : > { %7713 = vrcp.f32 %v3269_v20 }
 0xa9e   : > { %7715 = vrcp.f32 %v3260_v37 }
 0xa9f   : > { %7717 = vrcp.f32 %v3266_v22 }
 0xaa0   : > { %v3263_v53 = vpop.xlane.xlu0 %3262  ;;  %v3283_v51 = vpop.permute.xlu1 %3282 }
 0xaa1   : > { %7719 = vrcp.f32 %v3263_v53  ;;  %6845 = vmatprep.subr.bf16.mxu1 %v3283_v51  ;;  %v6373_v53 = vld [vmem:[%s8007_s24] ss:$0 sm:$0xff] }
 0xaa2   : > { %6846 = vmatpush3.bf16.msra.mxu1 %v3283_v51 }
 0xaa4   : > { %v3281_v54 = vpop.permute.xlu0 %3280  ;;  %v7398_v1 = vpop.permute.xlu1 %7397 }
 0xaa5   : > { %6847 = vmatprep.subr.bf16.mxu1 %v3281_v54  ;;  %v7400_v45 = vunpack.i.h.bf16 %v7398_v1  ;;  %v7399_v8 = vunpack.i.l.bf16 %v7398_v1 }
 0xaa6   : > { %6848 = vmatpush3.bf16.msra.mxu1 %v3281_v54 }
 0xaa7   : > { %6853 = vmatprep.subr.bf16.mxu1 %v7542_v36  ;;  %v3390_v38 = vsel %vm1870_vm6, %v9092_v43, %v7400_v45  ;;  %v3389_v39 = vsel %vm1870_vm6, %v9088_v55, %v7399_v8 }
 0xaa8   : > { %v7403_v50 = vpop.permute.xlu1 %7402  ;;  %v7408_v6 = vpop.permute.xlu0 %7407 }
 0xaa9   : > { %v7405_v32 = vunpack.i.h.bf16 %v7403_v50  ;;  %v7404_v18 = vunpack.i.l.bf16 %v7403_v50  ;;  %v7410_v3 = vunpack.i.h.bf16 %v7408_v6  ;;  %v7409_v31 = vunpack.i.l.bf16 %v7408_v6 }
 0xaaa   : > { %v7714_v59 = vpop.eup %7713 }
 0xaab   : > { %v7716_v16 = vpop.eup %7715  ;;  %v3277_v0 = vmul.f32 %v7714_v59, %v7710_v10  ;;  %v3392_v40 = vsel %vm1870_vm6, %v9090_v60, %v7405_v32  ;;  %v3394_v43 = vsel %vm1875_vm9, %v3390_v38, %v7410_v3  ;;  %v7548_v3 = vld [vmem:[%s9859_s12 + $0x34] ss:$8 sps:$4 sm:$0xff]   ;;  %v7557_v38 = vld [vmem:[%s9859_s12 + $0x4] ss:$8 sps:$4 sm:$0xff]  }
 0xaac   : > { %v7718_v61 = vpop.eup %7717  ;;  %v3274_v4 = vmul.f32 %v7716_v16, %v7708_v26  ;;  %v7413_v58 = vpop.permute.xlu1 %7412  ;;  %3652 = vmatprep.subr.bf16.mxu0 %v7548_v3 }
 0xaad   : > { %v3276_v23 = vmul.f32 %v7718_v61, %v7706_v44  ;;  %v7415_v42 = vunpack.i.h.bf16 %v7413_v58  ;;  %v7414_v24 = vunpack.i.l.bf16 %v7413_v58  ;;  %v3391_v44 = vsel %vm1870_vm6, %v9086_v52, %v7404_v18 }
 0xaae   : > { %v7720_v62 = vpop.eup %7719 }
 0xaaf   : > { %v3275_v7 = vmul.f32 %v7720_v62, %v7712_v49  ;;  %v3279_v47 = vpack.c.bf16 %v3277_v0, %v3276_v23  ;;  %v3395_v26 = vsel %vm1875_vm9, %v3391_v44, %v7414_v24  ;;  %v3396_v10 = vsel %vm1875_vm9, %v3392_v40, %v7415_v42  ;;  %v7546_v24 = vld [vmem:[%s9859_s12 + $0x30] ss:$8 sps:$4 sm:$0xff]  }
 0xab0   : > { %v3393_v49 = vsel %vm1875_vm9, %v3389_v39, %v7409_v31  ;;  %v7551_v31 = vld [vmem:[%s9859_s12 + $0x24] ss:$8 sps:$4 sm:$0xff]   ;;  %3653 = vmatpush1.bf16.msra.mxu0 %v7546_v24  ;;  %v7555_v39 = vld [vmem:[%s9859_s12] ss:$8 sps:$4 sm:$0xff]   ;;  %v7558_v40 = vld [vmem:[%s8032_s27 + $0x78] sm:$0xff]  }
 0xab1   : > { %v3278_v27 = vpack.c.bf16 %v3275_v7, %v3274_v4  ;;  %3654 = vmatprep.subr.bf16.mxu0 %v7551_v31  ;;  %v7559_v44 = vld [vmem:[%s8032_s27 + $0x38] sm:$0xff]  }
 0xab3   : > { %6849 = vmatprep.mubr.msk.bf16.mxu1 %vm1875_vm9, %v3278_v27 }
 0xab4   : > { %6850 = vmatmul.mubr.msk.bf16.vlgmr.msra.gmra.mxu1 %vm1875_vm9, %v3279_v47 }
 0xab5   : > { %6854 = vmatpush3.bf16.msra.mxu1 %v7542_v36 }
 0xab6   : > { %6855 = vmatprep.subr.bf16.mxu1 %v7543_v56 }
 0xab9   : > { %6856 = vmatpush3.bf16.msra.mxu1 %v7543_v56 }
 0xaba   : > { %6857 = vmatprep.subr.bf16.mxu1 %v7544_v34 }
 0xabd   : > { %6858 = vmatpush3.bf16.msra.mxu1 %v7544_v34 }
 0xabe   : > { %6859 = vmatprep.subr.bf16.mxu1 %v7545_v29 }
 0xac1   : > { %6860 = vmatpush3.bf16.msra.mxu1 %v7545_v29 }
 0xac2   : > { %6602 = vmatprep.subr.bf16.mxu1 %v7558_v40 }
 0xb74   : > { %v6851_v30 = vpop.f32.mrf.mxu1 }
 0xb76   : > { %v3326_v12 = vpop.f32.mrf.mxu1 }
 0xb78   : > { %v6852_v25 = vpop.f32.mrf.mxu1 }
 0xb79   : > { %v7421_v11 = vpack.i.bf16 %v6852_v25, %v6851_v30 }
 0xb7a   : > { %v3329_v19 = vpop.f32.mrf.mxu1 }
 0xb7b   : > { %v7416_v46 = vpack.i.bf16 %v3329_v19, %v3326_v12  ;;  %7422 = vrot.lane.b32.xlu1 %v7421_v11, %s9876_s28 }
 0xb7d   : > { %7417 = vrot.lane.b32.xlu0 %v7416_v46, %s9876_s28 }
 0xbed   : > { %v7423_v33 = vpop.permute.xlu1 %7422 }
 0xbee   : > { %v7425_v13 = vunpack.i.h.bf16 %v7423_v33  ;;  %v7424_v35 = vunpack.i.l.bf16 %v7423_v33  ;;  %v7549_v33 = vld [vmem:[%s9859_s12 + $0x20] ss:$8 sps:$4 sm:$0xff]  }
 0xbef   : > { %v7418_v48 = vpop.permute.xlu0 %7417  ;;  %3655 = vmatpush1.bf16.msra.mxu0 %v7549_v33 }
 0xbf0   : > { %v7420_v21 = vunpack.i.h.bf16 %v7418_v48  ;;  %v7419_v17 = vunpack.i.l.bf16 %v7418_v48  ;;  %v3399_v55 = vsel %vm1880_vm10, %v3395_v26, %v7424_v35  ;;  %v3400_v57 = vsel %vm1880_vm10, %v3396_v10, %v7425_v13  ;;  %v7554_v13 = vld [vmem:[%s9859_s12 + $0x14] ss:$8 sps:$4 sm:$0xff]   ;;  %v7552_v35 = vld [vmem:[%s9859_s12 + $0x10] ss:$8 sps:$4 sm:$0xff]   ;;  %v7562_v10 = vld [vmem:[%s8032_s27 + $0x68] sm:$0xff]   ;;  %s9885_s12 = sld [smem:[#allocation15_spill]] }
 0xbf1   : > { %v3402_v20 = vpack.c.bf16 %v3400_v57, %v3399_v55  ;;  %3656 = vmatprep.subr.bf16.mxu0 %v7554_v13  ;;  %v7560_v48 = vld [vmem:[%s8032_s27 + $0x70] sm:$0xff]   ;;  %v7567_v55 = vld [vmem:[%s8032_s27 + $0x18] sm:$0xff]  }
 0xbf2   : > { %v3397_v60 = vsel %vm1880_vm10, %v3393_v49, %v7419_v17  ;;  %v3398_v52 = vsel %vm1880_vm10, %v3394_v43, %v7420_v21  ;;  %v7561_v26 = vld [vmem:[%s8032_s27 + $0x30] sm:$0xff]   ;;  %v7563_v21 = vld [vmem:[%s8032_s27 + $0x28] sm:$0xff]   ;;  %v7564_v17 = vld [vmem:[%s8032_s27 + $0x60] sm:$0xff]  }
 0xbf3   : > { %v3401_v22 = vpack.c.bf16 %v3398_v52, %v3397_v60  ;;  %3657 = vmatpush1.bf16.msra.mxu0 %v7552_v35  ;;  %v7565_v49 = vld [vmem:[%s8032_s27 + $0x20] sm:$0xff]   ;;  %v7566_v43 = vld [vmem:[%s8032_s27 + $0x58] sm:$0xff]  }
 0xbf4   : > { %3658 = vmatprep.subr.bf16.mxu0 %v7557_v38 }
 0xbf5   : > { %6861 = vmatprep.mubr.msk.bf16.mxu1 %vm1885_vm11, %v3401_v22 }
 0xbf6   : > { %6862 = vmatmul.mubr.msk.bf16.vlgmr.msra.gmra.mxu1 %vm1885_vm11, %v3402_v20 }
 0xbf7   : > { %3659 = vmatpush1.bf16.msra.mxu0 %v7555_v39  ;;  %6603 = vmatpush3.bf16.msra.mxu1 %v7559_v44 }
 0xbf8   : > { %6604 = vmatprep.subr.bf16.mxu1 %v7560_v48 }
 0xbfb   : > { %6605 = vmatpush3.bf16.msra.mxu1 %v7561_v26 }
 0xbfc   : > { %6606 = vmatprep.subr.bf16.mxu1 %v7562_v10 }
 0xbff   : > { %6607 = vmatpush3.bf16.msra.mxu1 %v7563_v21 }
 0xc00   : > { %6608 = vmatprep.subr.bf16.mxu1 %v7564_v17 }
 0xc03   : > { %6609 = vmatpush3.bf16.msra.mxu1 %v7565_v49 }
 0xc04   : > { %6610 = vmatprep.subr.bf16.mxu1 %v7566_v43 }
 0xc07   : > { %6611 = vmatpush3.bf16.msra.mxu1 %v7567_v55 }
 0xcb6   : > { %v6863_v37 = vpop.f32.mrf.mxu1 }
 0xcb7   : > { %v3491_v54 = vadd.f32 %v6863_v37, %v6373_v53 }
 0xcb8   : > { %v3482_v51 = vpop.f32.mrf.mxu1 }
 0xcb9   : > { %v3483_v59 = vadd.f32 %v6373_v53, %v3482_v51  ;;  %v3499_v0 = vadd.f32 %v3491_v54, %v8899_v14 }
 0xcba   : > { %v6864_v16 = vpop.f32.mrf.mxu1 }
 0xcbb   : > { %v3497_v61 = vadd.f32 %v3483_v59, %v8889_v5  ;;  %v3494_v4 = vadd.f32 %v6864_v16, %v6373_v53  ;;  %v3509_v56 = vsel %vm1885_vm11, %v3499_v0, 0.0 }
 0xcbc   : > { %v3485_v62 = vpop.f32.mrf.mxu1 }
 0xcbd   : > { %v3486_v7 = vadd.f32 %v6373_v53, %v3485_v62  ;;  %v3503_v23 = vsel %vm1885_vm11, %v3497_v61, 0.0  ;;  %v3500_v47 = vadd.f32 %v3494_v4, %v8901_v63  ;;  %v6380_v4 = vld [vmem:[%s9879_s8] ss:$0 sm:$0xff]  ;;  %s9882_s8 = sld [smem:[#allocation13_spill]] }
 0xcbe   : > { %3504 = vadd.xlane.f32.xlu0 %v3503_v23 }
 0xcbf   : > { %v3498_v27 = vadd.f32 %v3486_v7, %v8891_v41  ;;  %v3512_v5 = vsel %vm1885_vm11, %v3500_v47, 0.0 }
 0xcc1   : > { %v3506_v36 = vsel %vm1885_vm11, %v3498_v27, 0.0 }
 0xcc2   : > { %3507 = vadd.xlane.f32.xlu1 %v3506_v36  ;;  %3510 = vadd.xlane.f32.xlu0 %v3509_v56  ;;  %v6381_v36 = vld [vmem:[%s9880_s9] ss:$0 sm:$0xff]  ;;  %s9881_s9 = sld [smem:[#allocation12_spill]] }
 0xcc6   : > { %3513 = vadd.xlane.f32.xlu0 %v3512_v5 }
 0xd47   : > { %v3505_v34 = vpop.xlane.xlu0 %3504 }
 0xd48   : > { %v3516_v14 = vmul.f32 0.015625, %v3505_v34 }
 0xd4a   : > { %v9145_v29 = vsub.f32 %v3497_v61, %v3516_v14 }
 0xd4b   : > { %v3508_v30 = vpop.xlane.xlu1 %3507  ;;  %v3511_v12 = vpop.xlane.xlu0 %3510 }
 0xd4c   : > { %v3517_v25 = vmul.f32 0.015625, %v3508_v30  ;;  %v3518_v11 = vmul.f32 0.015625, %v3511_v12  ;;  %v3524_v41 = vmul.f32 %v9145_v29, %v9145_v29 }
 0xd4e   : > { %v9149_v63 = vsub.f32 %v3498_v27, %v3517_v25  ;;  %v9151_v19 = vsub.f32 %v3499_v0, %v3518_v11  ;;  %v3528_v46 = vsel %vm1885_vm11, %v3524_v41, 0.0 }
 0xd4f   : > { %3529 = vadd.xlane.f32.xlu1 %v3528_v46  ;;  %v3514_v1 = vpop.xlane.xlu0 %3513  ;;  %v7568_v46 = vld [vmem:[%s8032_s27 + $0x50] sm:$0xff]  }
 0xd50   : > { %v3519_v50 = vmul.f32 0.015625, %v3514_v1  ;;  %v3525_v58 = vmul.f32 %v9149_v63, %v9149_v63  ;;  %v3526_v6 = vmul.f32 %v9151_v19, %v9151_v19  ;;  %v7569_v1 = vld [vmem:[%s8032_s27 + $0x10] sm:$0xff]   ;;  %6612 = vmatprep.subr.bf16.mxu1 %v7568_v46 }
 0xd51   : > { %6613 = vmatpush3.bf16.msra.mxu1 %v7569_v1 }
 0xd52   : > { %v9158_v45 = vsub.f32 %v3500_v47, %v3519_v50  ;;  %v3531_v8 = vsel %vm1885_vm11, %v3525_v58, 0.0  ;;  %v3534_v32 = vsel %vm1885_vm11, %v3526_v6, 0.0  ;;  %v7570_v50 = vld [vmem:[%s8032_s27 + $0x48] sm:$0xff]   ;;  %v7572_v6 = vld [vmem:[%s8032_s27 + $0x40] sm:$0xff]  }
 0xd53   : > { %3532 = vadd.xlane.f32.xlu0 %v3531_v8  ;;  %3535 = vadd.xlane.f32.xlu1 %v3534_v32  ;;  %v7571_v58 = vld [vmem:[%s8032_s27 + $0x8] sm:$0xff]   ;;  %v3586_v8 = vld [vmem:[%s9881_s9] sm:$0x3]  ;;  %s9883_s9 = sld [smem:[#allocation16_spill]] }
 0xd54   : > { %v3527_v18 = vmul.f32 %v9158_v45, %v9158_v45  ;;  %6614 = vmatprep.subr.bf16.mxu1 %v7570_v50 }
 0xd55   : > { %6615 = vmatpush3.bf16.msra.mxu1 %v7571_v58 }
 0xd56   : > { %v3537_v42 = vsel %vm1885_vm11, %v3527_v18, 0.0  ;;  %6616 = vmatprep.subr.bf16.mxu1 %v7572_v6  ;;  %v3595_v18 = vrot.slane %v3586_v8, %v8909_v15 }
 0xd57   : > { %3538 = vadd.xlane.f32.xlu0 %v3537_v42  ;;  %v3591_v42 = vrot.slane %v3586_v8, %v8906_v9 }
 0xdd8   : > { %v3530_v57 = vpop.xlane.xlu1 %3529 }
 0xdd9   : > { %v3540_v60 = vmul.f32 0.015625, %v3530_v57 }
 0xddb   : > { %v3544_v52 = vadd.f32 1e-05, %v3540_v60 }
 0xddc   : > { %v3536_v22 = vpop.xlane.xlu1 %3535  ;;  %v3533_v20 = vpop.xlane.xlu0 %3532 }
 0xddd   : > { %7721 = vrsqrt.f32 %v3544_v52  ;;  %v3542_v37 = vmul.f32 0.015625, %v3536_v22  ;;  %v3541_v53 = vmul.f32 0.015625, %v3533_v20 }
 0xddf   : > { %v3545_v51 = vadd.f32 1e-05, %v3541_v53  ;;  %v3546_v54 = vadd.f32 1e-05, %v3542_v37 }
 0xde0   : > { %v3539_v59 = vpop.xlane.xlu0 %3538 }
 0xde1   : > { %v3543_v16 = vmul.f32 0.015625, %v3539_v59  ;;  %7723 = vrsqrt.f32 %v3545_v51 }
 0xde2   : > { %7725 = vrsqrt.f32 %v3546_v54 }
 0xde3   : > { %v3547_v61 = vadd.f32 1e-05, %v3543_v16  ;;  %v6392_v16 = vld [vmem:[%s9882_s8] ss:$0 sm:$0xff]  ;;  %s9884_s8 = sld [smem:[#allocation14_spill]] }
 0xde5   : > { %7727 = vrsqrt.f32 %v3547_v61 }
 0xdea   : > { %v7722_v62 = vpop.eup %7721 }
 0xdeb   : > { %v3552_v0 = vmul.f32 %v7722_v62, %v9145_v29 }
 0xded   : > { %v3562_v27 = vmul.f32 %v6380_v4, %v3552_v0 }
 0xdee   : > { %v7724_v7 = vpop.eup %7723 }
 0xdef   : > { %v3553_v23 = vmul.f32 %v7724_v7, %v9149_v63  ;;  %v7726_v47 = vpop.eup %7725  ;;  %v9188_v14 = vadd.f32 %v6381_v36, %v3562_v27 }
 0xdf0   : > { %v3554_v29 = vmul.f32 %v7726_v47, %v9151_v19 }
 0xdf1   : > { %v3563_v5 = vmul.f32 %v6380_v4, %v3553_v23 }
 0xdf2   : > { %v7728_v56 = vpop.eup %7727  ;;  %v3564_v11 = vmul.f32 %v6380_v4, %v3554_v29 }
 0xdf3   : > { %v3555_v34 = vmul.f32 %v7728_v56, %v9158_v45  ;;  %v9190_v30 = vadd.f32 %v6381_v36, %v3563_v5  ;;  %v7573_v45 = vld [vmem:[%s8032_s27] sm:$0xff]  }
 0xdf4   : > { %v9199_v63 = vadd.f32 %v6381_v36, %v3564_v11  ;;  %6617 = vmatpush3.bf16.msra.mxu1 %v7573_v45 }
 0xdf5   : > { %v3576_v12 = vpack.c.bf16 %v9190_v30, %v9188_v14  ;;  %v3565_v25 = vmul.f32 %v6380_v4, %v3555_v34 }
 0xdf7   : > { %6390 = vmatmul.mubr.msk.bf16.vlgmr.msra.gmra.mxu0 %vm1885_vm11, %v3576_v12  ;;  %v9197_v41 = vadd.f32 %v6381_v36, %v3565_v25 }
 0xdf8   : > { %3686 = vmatprep.mubr.bf16.mxu0 %v7935_v28 }
 0xdf9   : > { %v3577_v19 = vpack.c.bf16 %v9197_v41, %v9199_v63 }
 0xdff   : > { %6391 = vmatmul.mubr.msk.bf16.gmra.mxu0 %vm1885_vm11, %v3577_v19 }
 0xe00   : > { %4071 = vmatprep.mubr.bf16.mxu0 %v7935_v28 }
 0xeb7   : > { %v3678_v32 = vpop.f32.mrf.mxu0 }
 0xeb8   : > { %v3679_v13 = vadd.f32 %v3678_v32, %v3591_v42 }
 0xeb9   : > { %v3680_v24 = vpop.f32.mrf.mxu0 }
 0xeba   : > { %v3681_v31 = vadd.f32 %v3680_v24, %v3595_v18  ;;  %v3697_v26 = vmax.f32 %v3679_v13, 0.0 }
 0xebb   : > { %v3682_v3 = vpop.f32.mrf.mxu0 }
 0xebc   : > { %v3683_v33 = vadd.f32 %v3682_v3, %v3591_v42  ;;  %v3698_v44 = vmax.f32 %v3681_v31, 0.0 }
 0xebd   : > { %v3684_v35 = vpop.f32.mrf.mxu0 }
 0xebe   : > { %v3685_v38 = vadd.f32 %v3684_v35, %v3595_v18  ;;  %v3699_v39 = vmax.f32 %v3683_v33, 0.0 }
 0xebf   : > { %v3688_v40 = vpop.f32.mrf.mxu0 }
 0xec0   : > { %v3700_v48 = vmax.f32 %v3685_v38, 0.0  ;;  %v3705_v17 = vpack.c.bf16 %v3699_v39, %v3697_v26  ;;  %v3689_v57 = vadd.f32 %v3688_v40, %v3591_v42 }
 0xec1   : > { %v3690_v10 = vpop.f32.mrf.mxu0 }
 0xec2   : > { %v3706_v21 = vpack.c.bf16 %v3700_v48, %v3698_v44  ;;  %v3691_v43 = vadd.f32 %v3690_v10, %v3595_v18  ;;  %v3701_v53 = vmax.f32 %v3689_v57, 0.0  ;;  %v7574_v10 = vld [vmem:[%s9883_s9 + $0x30] ss:$8 sps:$4 sm:$0xff]   ;;  %v7585_v57 = vld [vmem:[%s9883_s9 + $0x4] ss:$8 sps:$4 sm:$0xff]  }
 0xec3   : > { %v3692_v49 = vpop.f32.mrf.mxu0 }
 0xec4   : > { %v3693_v55 = vadd.f32 %v3692_v49, %v3591_v42  ;;  %3876 = vmatprep.mubr.bf16.mxu1 %v3706_v21  ;;  %v3702_v20 = vmax.f32 %v3691_v43, 0.0  ;;  %v7576_v21 = vld [vmem:[%s9883_s9 + $0x34] ss:$8 sps:$4 sm:$0xff]   ;;  %v7577_v49 = vld [vmem:[%s9883_s9 + $0x20] ss:$8 sps:$4 sm:$0xff]  }
 0xec5   : > { %v3694_v60 = vpop.f32.mrf.mxu0  ;;  %3877 = vmatmul.mubr.bf16.vlgmr.msra.gmra.mxu1 %v3705_v17  ;;  %v7579_v17 = vld [vmem:[%s9883_s9 + $0x24] ss:$8 sps:$4 sm:$0xff]   ;;  %4047 = vmatprep.subr.bf16.mxu0 %v7576_v21  ;;  %v7582_v43 = vld [vmem:[%s9883_s9 + $0x14] ss:$8 sps:$4 sm:$0xff]  }
 0xec6   : > { %v3695_v52 = vadd.f32 %v3694_v60, %v3595_v18  ;;  %v3703_v22 = vmax.f32 %v3693_v55, 0.0  ;;  %4048 = vmatpush1.bf16.msra.mxu0 %v7574_v10  ;;  %v7580_v55 = vld [vmem:[%s9883_s9 + $0x10] ss:$8 sps:$4 sm:$0xff]   ;;  %v7583_v60 = vld [vmem:[%s9883_s9] ss:$8 sps:$4 sm:$0xff]   ;;  %s9886_s9 = sld [smem:[#allocation17_spill]] }
 0xec7   : > { %4049 = vmatprep.subr.bf16.mxu0 %v7579_v17 }
 0xec8   : > { %v3704_v37 = vmax.f32 %v3695_v52, 0.0  ;;  %v3707_v54 = vpack.c.bf16 %v3703_v22, %v3701_v53 }
 0xeca   : > { %v3708_v51 = vpack.c.bf16 %v3704_v37, %v3702_v20  ;;  %4050 = vmatpush1.bf16.msra.mxu0 %v7577_v49 }
 0xecb   : > { %4051 = vmatprep.subr.bf16.mxu0 %v7582_v43 }
 0xecc   : > { %3884 = vmatprep.mubr.bf16.mxu1 %v3708_v51 }
 0xecd   : > { %3885 = vmatmul.mubr.bf16.gmra.mxu1 %v3707_v54 }
 0xece   : > { %4052 = vmatpush1.bf16.msra.mxu0 %v7580_v55 }
 0xecf   : > { %4053 = vmatprep.subr.bf16.mxu0 %v7585_v57 }
 0xed2   : > { %4054 = vmatpush1.bf16.msra.mxu0 %v7583_v60 }
 0xf85   : > { %v6618_v59 = vpop.f32.mrf.mxu1 }
 0xf87   : > { %v6619_v61 = vpop.f32.mrf.mxu1 }
 0xf88   : > { %v6620_v62 = vadd.f32 %v6619_v61, %v6618_v59 }
 0xf89   : > { %v6621_v0 = vpop.f32.mrf.mxu1 }
 0xf8a   : > { %v3879_v4 = vadd.f32 %v6620_v62, %v6392_v16 }
 0xf8b   : > { %v6622_v7 = vpop.f32.mrf.mxu1 }
 0xf8c   : > { %v6623_v23 = vadd.f32 %v6622_v7, %v6621_v0  ;;  %v3893_v27 = vadd.f32 %v3879_v4, %v9188_v14 }
 0xf8d   : > { %v6624_v47 = vpop.f32.mrf.mxu1 }
 0xf8e   : > { %v3882_v36 = vadd.f32 %v6623_v23, %v6392_v16  ;;  %v3899_v56 = vsel %vm1885_vm11, %v3893_v27, 0.0  ;;  %v6409_v23 = vld [vmem:[%s9884_s8] ss:$0 sm:$0xff]  ;;  %s9894_s8 = sld [smem:[#allocation23_spill]] }
 0xf8f   : > { %3900 = vadd.xlane.f32.xlu1 %v3899_v56  ;;  %v6625_v5 = vpop.f32.mrf.mxu1  ;;  %v6410_v56 = vld [vmem:[%s9885_s12] ss:$0 sm:$0xff]  ;;  %s9887_s12 = smov 112  }
 0xf90   : > { %v6626_v34 = vadd.f32 %v6625_v5, %v6624_v47  ;;  %v3894_v29 = vadd.f32 %v3882_v36, %v9190_v30 }
 0xf91   : > { %v6627_v12 = vpop.f32.mrf.mxu1 }
 0xf92   : > { %v3887_v25 = vadd.f32 %v6626_v34, %v6392_v16  ;;  %v3902_v11 = vsel %vm1885_vm11, %v3894_v29, 0.0 }
 0xf93   : > { %3903 = vadd.xlane.f32.xlu0 %v3902_v11  ;;  %v6628_v19 = vpop.f32.mrf.mxu1 }
 0xf94   : > { %v6629_v46 = vadd.f32 %v6628_v19, %v6627_v12  ;;  %v3895_v1 = vadd.f32 %v3887_v25, %v9199_v63 }
 0xf96   : > { %v3890_v50 = vadd.f32 %v6629_v46, %v6392_v16  ;;  %v3905_v14 = vsel %vm1885_vm11, %v3895_v1, 0.0 }
 0xf97   : > { %3906 = vadd.xlane.f32.xlu1 %v3905_v14 }
 0xf98   : > { %v3896_v58 = vadd.f32 %v3890_v50, %v9197_v41 }
 0xf9a   : > { %v3908_v6 = vsel %vm1885_vm11, %v3896_v58, 0.0 }
 0xf9b   : > { %3909 = vadd.xlane.f32.xlu0 %v3908_v6 }
0x1018   : > { %v3901_v45 = vpop.xlane.xlu1 %3900 }
0x1019   : > { %v3911_v30 = vmul.f32 0.015625, %v3901_v45  ;;  %v3981_v45 = vld [vmem:[%s9886_s9] sm:$0x3]  ;;  %s9893_s9 = sld [smem:[#allocation21_spill]] }
0x101b   : > { %v3915_v8 = vsub.f32 %v3893_v27, %v3911_v30 }
0x101c   : > { %v3904_v32 = vpop.xlane.xlu0 %3903 }
0x101d   : > { %v3912_v18 = vmul.f32 0.015625, %v3904_v32  ;;  %v3919_v42 = vmul.f32 %v3915_v8, %v3915_v8 }
0x101f   : > { %v3916_v24 = vsub.f32 %v3894_v29, %v3912_v18  ;;  %v3923_v3 = vsel %vm1885_vm11, %v3919_v42, 0.0  ;;  %v3990_v18 = vrot.slane %v3981_v45, %v8909_v15 }
0x1020   : > { %3924 = vadd.xlane.f32.xlu1 %v3923_v3  ;;  %v3907_v63 = vpop.xlane.xlu1 %3906 }
0x1021   : > { %v3913_v31 = vmul.f32 0.015625, %v3907_v63  ;;  %v3920_v33 = vmul.f32 %v3916_v24, %v3916_v24 }
0x1023   : > { %v3917_v41 = vsub.f32 %v3895_v1, %v3913_v31  ;;  %v3926_v13 = vsel %vm1885_vm11, %v3920_v33, 0.0 }
0x1024   : > { %3927 = vadd.xlane.f32.xlu0 %v3926_v13  ;;  %v3910_v35 = vpop.xlane.xlu0 %3909 }
0x1025   : > { %v3914_v38 = vmul.f32 0.015625, %v3910_v35  ;;  %v3921_v39 = vmul.f32 %v3917_v41, %v3917_v41 }
0x1027   : > { %v3918_v40 = vsub.f32 %v3896_v58, %v3914_v38  ;;  %v3929_v44 = vsel %vm1885_vm11, %v3921_v39, 0.0 }
0x1028   : > { %3930 = vadd.xlane.f32.xlu1 %v3929_v44 }
0x1029   : > { %v3922_v48 = vmul.f32 %v3918_v40, %v3918_v40 }
0x102b   : > { %v3932_v26 = vsel %vm1885_vm11, %v3922_v48, 0.0 }
0x102c   : > { %3933 = vadd.xlane.f32.xlu0 %v3932_v26 }
0x10a9   : > { %v3925_v52 = vpop.xlane.xlu1 %3924 }
0x10aa   : > { %v3935_v22 = vmul.f32 0.015625, %v3925_v52 }
0x10ac   : > { %v3939_v20 = vadd.f32 1e-05, %v3935_v22 }
0x10ad   : > { %v3928_v37 = vpop.xlane.xlu0 %3927 }
0x10ae   : > { %7729 = vrsqrt.f32 %v3939_v20  ;;  %v3936_v53 = vmul.f32 0.015625, %v3928_v37 }
0x10b0   : > { %v3940_v51 = vadd.f32 1e-05, %v3936_v53 }
0x10b1   : > { %v3931_v54 = vpop.xlane.xlu1 %3930 }
0x10b2   : > { %7731 = vrsqrt.f32 %v3940_v51  ;;  %v3937_v59 = vmul.f32 0.015625, %v3931_v54 }
0x10b4   : > { %v3941_v16 = vadd.f32 1e-05, %v3937_v59 }
0x10b5   : > { %v3934_v61 = vpop.xlane.xlu0 %3933 }
0x10b6   : > { %7733 = vrsqrt.f32 %v3941_v16  ;;  %v3938_v62 = vmul.f32 0.015625, %v3934_v61 }
0x10b8   : > { %v3942_v0 = vadd.f32 1e-05, %v3938_v62 }
0x10ba   : > { %7735 = vrsqrt.f32 %v3942_v0 }
0x10bb   : > { %v7730_v4 = vpop.eup %7729 }
0x10bc   : > { %v3947_v7 = vmul.f32 %v7730_v4, %v3915_v8  ;;  %v3986_v8 = vrot.slane %v3981_v45, %v8906_v9 }
0x10be   : > { %v3957_v47 = vmul.f32 %v6409_v23, %v3947_v7 }
0x10bf   : > { %v7732_v27 = vpop.eup %7731 }
0x10c0   : > { %v3948_v36 = vmul.f32 %v7732_v27, %v3916_v24  ;;  %v9237_v29 = vadd.f32 %v6410_v56, %v3957_v47 }
0x10c2   : > { %v3958_v5 = vmul.f32 %v6409_v23, %v3948_v36 }
0x10c3   : > { %v7734_v34 = vpop.eup %7733 }
0x10c4   : > { %v9239_v12 = vadd.f32 %v6410_v56, %v3958_v5  ;;  %v3949_v25 = vmul.f32 %v7734_v34, %v3917_v41 }
0x10c6   : > { %v3971_v11 = vpack.c.bf16 %v9239_v12, %v9237_v29  ;;  %v3959_v1 = vmul.f32 %v6409_v23, %v3949_v25 }
0x10c7   : > { %v7736_v19 = vpop.eup %7735 }
0x10c8   : > { %6419 = vmatmul.mubr.msk.bf16.vlgmr.msra.gmra.mxu0 %vm1885_vm11, %v3971_v11  ;;  %v3950_v46 = vmul.f32 %v7736_v19, %v3918_v40  ;;  %v9245_v14 = vadd.f32 %v6410_v56, %v3959_v1 }
0x10c9   : > { %4081 = vmatprep.mubr.bf16.mxu0 %v7935_v28 }
0x10ca   : > { %v3960_v50 = vmul.f32 %v6409_v23, %v3950_v46 }
0x10cc   : > { %v9247_v58 = vadd.f32 %v6410_v56, %v3960_v50 }
0x10ce   : > { %v3972_v6 = vpack.c.bf16 %v9247_v58, %v9245_v14 }
0x10d0   : > { %6420 = vmatmul.mubr.msk.bf16.gmra.mxu0 %vm1885_vm11, %v3972_v6 }
0x1188   : > { %v4073_v30 = vpop.f32.mrf.mxu0 }
0x1189   : > { %v4074_v24 = vadd.f32 %v4073_v30, %v3986_v8 }
0x118a   : > { %v4075_v32 = vpop.f32.mrf.mxu0 }
0x118b   : > { %v4076_v31 = vadd.f32 %v4075_v32, %v3990_v18 }
0x118c   : > { %v4077_v42 = vpop.f32.mrf.mxu0 }
0x118d   : > { %v4078_v3 = vadd.f32 %v4077_v42, %v3986_v8 }
0x118e   : > { %v4079_v63 = vpop.f32.mrf.mxu0 }
0x118f   : > { %v9255_v33 = vpack.c.bf16 %v4078_v3, %v4074_v24  ;;  %v4080_v41 = vadd.f32 %v4079_v63, %v3990_v18 }
0x1190   : > { %v4083_v13 = vpop.f32.mrf.mxu0 }
0x1191   : > { %v9257_v35 = vpack.c.bf16 %v4080_v41, %v4076_v31  ;;  %6869 = vmatprep.mubr.msk.bf16.mxu0 %vm1870_vm6, %v9255_v33  ;;  %v4084_v40 = vadd.f32 %v4083_v13, %v3986_v8 }
0x1192   : > { %v4085_v38 = vpop.f32.mrf.mxu0 }
0x1193   : > { %v4086_v60 = vadd.f32 %v4085_v38, %v3990_v18 }
0x1194   : > { %v4087_v39 = vpop.f32.mrf.mxu0 }
0x1195   : > { %v4088_v44 = vadd.f32 %v4087_v39, %v3986_v8 }
0x1196   : > { %v4089_v49 = vpop.f32.mrf.mxu0 }
0x1197   : > { %v9261_v48 = vpack.c.bf16 %v4088_v44, %v4084_v40  ;;  %v4090_v57 = vadd.f32 %v4089_v49, %v3990_v18 }
0x1199   : > { %4274 = vrot.lane.b32.xlu0 %v9261_v48, %s9876_s28  ;;  %4100 = vrot.lane.b32.xlu1 %v9261_v48, %s9870_s1  ;;  %v9289_v22 = vpack.c.bf16 %v4090_v57, %v4086_v60 }
0x119d   : > { %4268 = vrot.lane.b32.xlu0 %v9255_v33, %s9887_s12  ;;  %4098 = vrot.lane.b32.xlu1 %v9255_v33, %s9870_s1 }
0x11a1   : > { %4270 = vrot.lane.b32.xlu0 %v9261_v48, %s9887_s12  ;;  %4272 = vrot.lane.b32.xlu1 %v9255_v33, %s9876_s28 }
0x11a5   : > { %4450 = vrot.lane.b32.xlu0 %v9255_v33, %s9872_s5  ;;  %4456 = vrot.lane.b32.xlu1 %v9261_v48, %s9868_s11 }
0x11a9   : > { %4454 = vrot.lane.b32.xlu1 %v9255_v33, %s9868_s11 }
0x11ad   : > { %4452 = vrot.lane.b32.xlu1 %v9261_v48, %s9872_s5 }
0x120b   : > { %v4275_v26 = vpop.permute.xlu0 %4274  ;;  %v4101_v10 = vpop.permute.xlu1 %4100 }
0x120c   : > { %v4286_v21 = vsel %vm1870_vm6, %v4275_v26, 0  ;;  %v4112_v17 = vsel %vm1870_vm6, %v4101_v10, 0  ;;  %6975 = vmatprep.subr.msk.bf16.mxu0 %vm1870_vm6, %v4101_v10  ;;  %6977 = vmatprep.subr.msk.bf16.mxu1 %vm1870_vm6, %v4275_v26 }
0x120d   : > { %6866 = vmatpush3.bf16.xpose.msra.mxu0 %v4112_v17  ;;  %6882 = vmatpush3.bf16.xpose.msra.mxu1 %v4286_v21 }
0x120f   : > { %v4269_v43 = vpop.permute.xlu0 %4268  ;;  %v4099_v55 = vpop.permute.xlu1 %4098 }
0x1210   : > { %6976 = vmatprep.subr.msk.bf16.mxu0 %vm1870_vm6, %v4099_v55  ;;  %6885 = vmatprep.mubr.msk.bf16.mxu1 %vm1870_vm6, %v4269_v43  ;;  %v4109_v20 = vsel %vm1870_vm6, %v4099_v55, 0 }
0x1213   : > { %v4273_v52 = vpop.permute.xlu1 %4272  ;;  %v4271_v53 = vpop.permute.xlu0 %4270 }
0x1214   : > { %v4283_v37 = vsel %vm1870_vm6, %v4273_v52, 0  ;;  %6978 = vmatprep.subr.msk.bf16.mxu1 %vm1870_vm6, %v4273_v52 }
0x1215   : > { %6868 = vmatpush3.bf16.xpose.msra.mxu0 %v4109_v20  ;;  %6884 = vmatpush3.bf16.xpose.msra.mxu1 %v4283_v37 }
0x1216   : > { %6873 = vmatprep.subr.bf16.mxu0 %v9289_v22 }
0x1217   : > { %v4457_v51 = vpop.permute.xlu1 %4456  ;;  %v4451_v59 = vpop.permute.xlu0 %4450 }
0x1218   : > { %6979 = vmatprep.subr.msk.bf16.mxu1 %vm1870_vm6, %v4457_v51  ;;  %v4468_v54 = vsel %vm1870_vm6, %v4457_v51, 0 }
0x121b   : > { %v4455_v16 = vpop.permute.xlu1 %4454 }
0x121c   : > { %6870 = vmatmul.mubr.msk.bf16.vlgmr.msra.gmra.mxu0 %vm1870_vm6, %v9261_v48  ;;  %6886 = vmatmul.mubr.msk.bf16.vlgmr.msra.gmra.mxu1 %vm1870_vm6, %v4271_v53  ;;  %v4465_v61 = vsel %vm1870_vm6, %v4455_v16, 0 }
0x121d   : > { %6874 = vmatpush3.bf16.msra.mxu0 %v9289_v22  ;;  %6898 = vmatpush3.bf16.xpose.msra.mxu1 %v4468_v54 }
0x121e   : > { %6901 = vmatprep.mubr.msk.bf16.mxu1 %vm1870_vm6, %v4451_v59  ;;  %6875 = vmatprep.subr.bf16.mxu0 %v9257_v35 }
0x121f   : > { %6980 = vmatprep.subr.msk.bf16.mxu1 %vm1870_vm6, %v4455_v16  ;;  %v4453_v62 = vpop.permute.xlu1 %4452 }
0x1221   : > { %6876 = vmatpush3.bf16.msra.mxu0 %v9257_v35 }
0x1225   : > { %6900 = vmatpush3.bf16.xpose.msra.mxu1 %v4465_v61 }
0x122c   : > { %6902 = vmatmul.mubr.msk.bf16.vlgmr.msra.gmra.mxu1 %vm1870_vm6, %v4453_v62 }
0x12dc   : > { %v6871_v0 = vpop.f32.mrf.mxu0  ;;  %v6887_v4 = vpop.f32.mrf.mxu1 }
0x12dd   : > { %v4165_v7 = vmul.f32 0.25, %v6871_v0  ;;  %v4339_v23 = vmul.f32 0.25, %v6887_v4 }
0x12de   : > { %v4148_v27 = vpop.f32.mrf.mxu0  ;;  %v4322_v47 = vpop.f32.mrf.mxu1 }
0x12df   : > { %v4163_v36 = vmul.f32 0.25, %v4148_v27  ;;  %v4337_v56 = vmul.f32 0.25, %v4322_v47  ;;  %v4173_v5 = vsel %vm1875_vm9, %v4165_v7, -inf  ;;  %v4347_v34 = vsel %vm1875_vm9, %v4339_v23, -inf }
0x12e0   : > { %4174 = vmax.xlane.f32.xlu0 %v4173_v5  ;;  %v6872_v25 = vpop.f32.mrf.mxu0  ;;  %4348 = vmax.xlane.f32.xlu1 %v4347_v34  ;;  %v6888_v11 = vpop.f32.mrf.mxu1 }
0x12e1   : > { %v4166_v46 = vmul.f32 0.25, %v6872_v25  ;;  %v4167_v50 = vsel %vm1875_vm9, %v4163_v36, -inf  ;;  %v4341_v6 = vsel %vm1875_vm9, %v4337_v56, -inf  ;;  %v4340_v18 = vmul.f32 0.25, %v6888_v11 }
0x12e2   : > { %v4151_v19 = vpop.f32.mrf.mxu0  ;;  %v4325_v45 = vpop.f32.mrf.mxu1 }
0x12e3   : > { %v4164_v1 = vmul.f32 0.25, %v4151_v19  ;;  %v9311_v30 = vmul.f32 0.25, %v4325_v45  ;;  %v4176_v8 = vsel %vm1875_vm9, %v4166_v46, -inf  ;;  %v4350_v41 = vsel %vm1875_vm9, %v4340_v18, -inf }
0x12e4   : > { %4168 = vmax.xlane.f32.xlu0 %v4167_v50  ;;  %4342 = vmax.xlane.f32.xlu1 %v4341_v6 }
0x12e5   : > { %v4170_v32 = vsel %vm1875_vm9, %v4164_v1, -inf  ;;  %v4344_v42 = vsel %vm1875_vm9, %v9311_v30, -inf }
0x12e8   : > { %4177 = vmax.xlane.f32.xlu0 %v4176_v8  ;;  %4171 = vmax.xlane.f32.xlu1 %v4170_v32 }
0x12ec   : > { %4345 = vmax.xlane.f32.xlu0 %v4344_v42  ;;  %v6903_v24 = vpop.f32.mrf.mxu1 }
0x12ed   : > { %v9317_v3 = vmul.f32 0.25, %v6903_v24 }
0x12ee   : > { %v4504_v63 = vpop.f32.mrf.mxu1 }
0x12ef   : > { %v9319_v31 = vmul.f32 0.25, %v4504_v63  ;;  %v4529_v13 = vsel %vm1875_vm9, %v9317_v3, -inf }
0x12f0   : > { %4351 = vmax.xlane.f32.xlu0 %v4350_v41  ;;  %4530 = vmax.xlane.f32.xlu1 %v4529_v13  ;;  %v6904_v38 = vpop.f32.mrf.mxu1 }
0x12f1   : > { %v4523_v44 = vsel %vm1875_vm9, %v9319_v31, -inf  ;;  %v9328_v26 = vmul.f32 0.25, %v6904_v38 }
0x12f2   : > { %v4507_v39 = vpop.f32.mrf.mxu1 }
0x12f3   : > { %v9324_v40 = vmul.f32 0.25, %v4507_v39  ;;  %v4532_v21 = vsel %vm1875_vm9, %v9328_v26, -inf }
0x12f4   : > { %4524 = vmax.xlane.f32.xlu1 %v4523_v44 }
0x12f5   : > { %v4526_v10 = vsel %vm1875_vm9, %v9324_v40, -inf }
0x12f6   : > { %4527 = vmax.xlane.f32.xlu0 %v4526_v10 }
0x12fa   : > { %4533 = vmax.xlane.f32.xlu0 %v4532_v21 }
0x1305   : > { %4391 = vrot.lane.b32.xlu1 %v9289_v22, %s9887_s12 }
0x1369   : > { %v4175_v17 = vpop.xlane.xlu0 %4174  ;;  %v4349_v49 = vpop.xlane.xlu1 %4348 }
0x136a   : > { %v4181_v43 = vsub.f32 %v4165_v7, %v4175_v17  ;;  %v4355_v55 = vsub.f32 %v4339_v23, %v4349_v49 }
0x136c   : > { %v4187_v57 = vmul.f32 1.442695, %v4181_v43  ;;  %v4361_v60 = vmul.f32 1.442695, %v4355_v55 }
0x136d   : > { %v4169_v52 = vpop.xlane.xlu0 %4168  ;;  %v4343_v20 = vpop.xlane.xlu1 %4342 }
0x136e   : > { %7737 = vpow2.f32 %v4187_v57  ;;  %v4179_v37 = vsub.f32 %v4163_v36, %v4169_v52  ;;  %v4353_v51 = vsub.f32 %v4337_v56, %v4343_v20 }
0x136f   : > { %7739 = vpow2.f32 %v4361_v60 }
0x1370   : > { %v4183_v53 = vmul.f32 1.442695, %v4179_v37  ;;  %v4357_v16 = vmul.f32 1.442695, %v4353_v51 }
0x1371   : > { %v4178_v54 = vpop.xlane.xlu0 %4177  ;;  %v4172_v62 = vpop.xlane.xlu1 %4171 }
0x1372   : > { %v4182_v59 = vsub.f32 %v4166_v46, %v4178_v54  ;;  %7741 = vpow2.f32 %v4183_v53  ;;  %v4180_v4 = vsub.f32 %v4164_v1, %v4172_v62 }
0x1374   : > { %v4189_v61 = vmul.f32 1.442695, %v4182_v59  ;;  %v4185_v5 = vmul.f32 1.442695, %v4180_v4 }
0x1375   : > { %v4346_v0 = vpop.xlane.xlu0 %4345 }
0x1376   : > { %7743 = vpow2.f32 %v4189_v61  ;;  %v4354_v39 = vsub.f32 %v9311_v30, %v4346_v0 }
0x1377   : > { %7745 = vpow2.f32 %v4357_v16 }
0x1378   : > { %v4359_v21 = vmul.f32 1.442695, %v4354_v39 }
0x1379   : > { %v4352_v7 = vpop.xlane.xlu0 %4351  ;;  %v4531_v23 = vpop.xlane.xlu1 %4530 }
0x137a   : > { %v4356_v27 = vsub.f32 %v4340_v18, %v4352_v7  ;;  %v4537_v63 = vsub.f32 %v9317_v3, %v4531_v23 }
0x137b   : > { %v9336_v47 = vpop.eup %7737 }
0x137c   : > { %v4363_v36 = vmul.f32 1.442695, %v4356_v27  ;;  %v4197_v56 = vsel %vm1875_vm9, %v9336_v47, 0.0  ;;  %v9340_v34 = vpop.eup %7739  ;;  %v4543_v13 = vmul.f32 1.442695, %v4537_v63 }
0x137d   : > { %4198 = vadd.xlane.f32.xlu1 %v4197_v56  ;;  %v4525_v25 = vpop.xlane.xlu1 %4524  ;;  %v4371_v11 = vsel %vm1875_vm9, %v9340_v34, 0.0 }
0x137e   : > { %7747 = vpow2.f32 %v4363_v36  ;;  %v4535_v38 = vsub.f32 %v9319_v31, %v4525_v25 }
0x137f   : > { %7749 = vpow2.f32 %v4185_v5  ;;  %v9344_v19 = vpop.eup %7741  ;;  %v4528_v41 = vpop.xlane.xlu0 %4527 }
0x1380   : > { %v4191_v6 = vsel %vm1875_vm9, %v9344_v19, 0.0  ;;  %7751 = vpow2.f32 %v4543_v13  ;;  %v4539_v44 = vmul.f32 1.442695, %v4535_v38  ;;  %v4536_v49 = vsub.f32 %v9324_v40, %v4528_v41 }
0x1381   : > { %4372 = vadd.xlane.f32.xlu1 %v4371_v11  ;;  %v9346_v46 = vpop.permute.xlu1 %4391 }
0x1382   : > { %6889 = vmatprep.subr.bf16.mxu0 %v9346_v46  ;;  %7753 = vpow2.f32 %v4539_v44  ;;  %v4541_v43 = vmul.f32 1.442695, %v4536_v49 }
0x1383   : > { %v9349_v1 = vpop.eup %7743  ;;  %v4534_v10 = vpop.xlane.xlu0 %4533  ;;  %7755 = vpow2.f32 %v4359_v21 }
0x1384   : > { %v4200_v50 = vsel %vm1875_vm9, %v9349_v1, 0.0  ;;  %v9355_v45 = vpop.eup %7745  ;;  %v4538_v17 = vsub.f32 %v9328_v26, %v4534_v10 }
0x1385   : > { %4201 = vadd.xlane.f32.xlu0 %v4200_v50  ;;  %4192 = vadd.xlane.f32.xlu1 %v4191_v6  ;;  %v4365_v8 = vsel %vm1875_vm9, %v9355_v45, 0.0 }
0x1386   : > { %v4545_v3 = vmul.f32 1.442695, %v4538_v17 }
0x1388   : > { %7757 = vpow2.f32 %v4545_v3 }
0x1389   : > { %4366 = vadd.xlane.f32.xlu1 %v4365_v8  ;;  %7759 = vpow2.f32 %v4541_v43 }
0x138b   : > { %v9359_v32 = vpop.eup %7747 }
0x138c   : > { %v4374_v18 = vsel %vm1875_vm9, %v9359_v32, 0.0  ;;  %v7750_v42 = vpop.eup %7749 }
0x138d   : > { %4375 = vadd.xlane.f32.xlu0 %v4374_v18  ;;  %v4194_v24 = vsel %vm1875_vm9, %v7750_v42, 0.0  ;;  %v9373_v55 = vpop.eup %7751 }
0x138e   : > { %v4553_v31 = vsel %vm1875_vm9, %v9373_v55, 0.0 }
0x138f   : > { %v9377_v30 = vpop.eup %7753 }
0x1390   : > { %v4547_v57 = vsel %vm1875_vm9, %v9377_v30, 0.0  ;;  %v9381_v60 = vpop.eup %7755 }
0x1391   : > { %4195 = vadd.xlane.f32.xlu0 %v4194_v24  ;;  %v4368_v40 = vsel %vm1875_vm9, %v9381_v60, 0.0 }
0x1395   : > { %v9385_v26 = vpop.eup %7757 }
0x1396   : > { %v4556_v52 = vsel %vm1875_vm9, %v9385_v26, 0.0  ;;  %v9389_v20 = vpop.eup %7759 }
0x1397   : > { %v4550_v37 = vsel %vm1875_vm9, %v9389_v20, 0.0 }
0x139a   : > { %4571 = vrot.lane.b32.xlu1 %v9289_v22, %s9872_s5 }
0x13a7   : > { %4389 = vrot.lane.b32.xlu0 %v9257_v35, %s9887_s12  ;;  %s9895_s12 = sld [smem:[#allocation25_spill]] }
0x13be   : > { %4554 = vadd.xlane.f32.xlu1 %v4553_v31 }
0x13c2   : > { %4548 = vadd.xlane.f32.xlu1 %v4547_v57 }
0x13c6   : > { %4369 = vadd.xlane.f32.xlu0 %v4368_v40 }
0x13ca   : > { %4557 = vadd.xlane.f32.xlu0 %v4556_v52 }
0x13ce   : > { %4551 = vadd.xlane.f32.xlu0 %v4550_v37 }
0x13d3   : > { %4569 = vrot.lane.b32.xlu1 %v9257_v35, %s9872_s5  ;;  %s9888_s5 = sld [smem:[#allocation18_spill]] }
0x13d7   : > { %4634 = vrot.lane.b32.xlu1 %v9255_v33, %s9877_s23 }
0x13db   : > { %4632 = vrot.lane.b32.xlu1 %v9261_v48, %s9878_s3 }
0x13e4   : > { %4636 = vrot.lane.b32.xlu0 %v9261_v48, %s9877_s23 }
0x13e8   : > { %4630 = vrot.lane.b32.xlu0 %v9255_v33, %s9878_s3 }
0x1406   : > { %v4199_v53 = vpop.xlane.xlu1 %4198 }
0x140a   : > { %v4373_v51 = vpop.xlane.xlu1 %4372 }
0x140e   : > { %v4202_v54 = vpop.xlane.xlu0 %4201  ;;  %v4193_v59 = vpop.xlane.xlu1 %4192 }
0x140f   : > { %7761 = vrcp.f32 %v4202_v54 }
0x1410   : > { %7763 = vrcp.f32 %v4193_v59 }
0x1411   : > { %7765 = vrcp.f32 %v4199_v53 }
0x1412   : > { %v4367_v56 = vpop.xlane.xlu1 %4366 }
0x1416   : > { %v4376_v16 = vpop.xlane.xlu0 %4375  ;;  %v4572_v11 = vpop.permute.xlu1 %4571 }
0x141a   : > { %v4196_v61 = vpop.xlane.xlu0 %4195 }
0x141b   : > { %7767 = vrcp.f32 %v4196_v61 }
0x141c   : > { %v7762_v62 = vpop.eup %7761  ;;  %7769 = vrcp.f32 %v4376_v16 }
0x141d   : > { %v7764_v0 = vpop.eup %7763  ;;  %v4210_v23 = vmul.f32 %v7762_v62, %v9349_v1  ;;  %7771 = vrcp.f32 %v4367_v56 }
0x141e   : > { %v7766_v4 = vpop.eup %7765  ;;  %v4207_v48 = vmul.f32 %v7764_v0, %v9344_v19  ;;  %v4390_v25 = vpop.permute.xlu0 %4389  ;;  %7773 = vrcp.f32 %v4373_v51 }
0x141f   : > { %v4209_v33 = vmul.f32 %v7766_v4, %v9336_v47 }
0x1421   : > { %v4212_v36 = vpack.c.bf16 %v4210_v23, %v4209_v33 }
0x1428   : > { %v7768_v7 = vpop.eup %7767 }
0x1429   : > { %v4208_v27 = vmul.f32 %v7768_v7, %v7750_v42  ;;  %v7770_v8 = vpop.eup %7769 }
0x142a   : > { %v7772_v18 = vpop.eup %7771  ;;  %v4384_v24 = vmul.f32 %v7770_v8, %v9359_v32 }
0x142b   : > { %v4211_v5 = vpack.c.bf16 %v4208_v27, %v4207_v48  ;;  %v4381_v63 = vmul.f32 %v7772_v18, %v9355_v45 }
0x142d   : > { %6877 = vmatprep.mubr.msk.bf16.mxu0 %vm1875_vm9, %v4211_v5 }
0x142e   : > { %6878 = vmatmul.mubr.msk.bf16.vlgmr.msra.gmra.mxu0 %vm1875_vm9, %v4212_v36 }
0x142f   : > { %6890 = vmatpush3.bf16.msra.mxu0 %v9346_v46  ;;  %v7774_v46 = vpop.eup %7773 }
0x1430   : > { %6891 = vmatprep.subr.bf16.mxu0 %v4390_v25  ;;  %v4383_v13 = vmul.f32 %v7774_v46, %v9340_v34 }
0x1432   : > { %v4386_v39 = vpack.c.bf16 %v4384_v24, %v4383_v13 }
0x1433   : > { %6892 = vmatpush3.bf16.msra.mxu0 %v4390_v25 }
0x1434   : > { %6905 = vmatprep.subr.bf16.mxu0 %v4572_v11 }
0x1447   : > { %v4555_v1 = vpop.xlane.xlu1 %4554 }
0x144b   : > { %v4549_v47 = vpop.xlane.xlu1 %4548 }
0x144f   : > { %v4370_v19 = vpop.xlane.xlu0 %4369  ;;  %v4570_v17 = vpop.permute.xlu1 %4569 }
0x1450   : > { %7775 = vrcp.f32 %v4370_v19 }
0x1453   : > { %v4558_v50 = vpop.xlane.xlu0 %4557  ;;  %v4635_v52 = vpop.permute.xlu1 %4634 }
0x1454   : > { %7777 = vrcp.f32 %v4558_v50 }
0x1455   : > { %7779 = vrcp.f32 %v4549_v47 }
0x1456   : > { %7781 = vrcp.f32 %v4555_v1 }
0x1457   : > { %v4552_v6 = vpop.xlane.xlu0 %4551 }
0x1458   : > { %7783 = vrcp.f32 %v4552_v6 }
0x145b   : > { %v4637_v3 = vpop.permute.xlu0 %4636 }
0x145d   : > { %v7776_v42 = vpop.eup %7775 }
0x145e   : > { %v4382_v41 = vmul.f32 %v7776_v42, %v9381_v60  ;;  %v4648_v60 = vsel %vm1870_vm6, %v4637_v3, 0 }
0x145f   : > { %v4631_v40 = vpop.permute.xlu0 %4630 }
0x1460   : > { %v4385_v38 = vpack.c.bf16 %v4382_v41, %v4381_v63 }
0x1461   : > { %v7778_v44 = vpop.eup %7777 }
0x1462   : > { %6893 = vmatprep.mubr.msk.bf16.mxu0 %vm1875_vm9, %v4385_v38  ;;  %v7780_v10 = vpop.eup %7779  ;;  %v4566_v45 = vmul.f32 %v7778_v44, %v9385_v26 }
0x1463   : > { %6894 = vmatmul.mubr.msk.bf16.vlgmr.msra.gmra.mxu0 %vm1875_vm9, %v4386_v39  ;;  %v7782_v21 = vpop.eup %7781  ;;  %v4563_v32 = vmul.f32 %v7780_v10, %v9377_v30  ;;  %v4633_v30 = vpop.permute.xlu1 %4632 }
0x1464   : > { %6906 = vmatpush3.bf16.msra.mxu0 %v4572_v11  ;;  %v4565_v43 = vmul.f32 %v7782_v21, %v9373_v55  ;;  %v4645_v55 = vsel %vm1870_vm6, %v4635_v52, 0 }
0x1465   : > { %v7784_v49 = vpop.eup %7783  ;;  %6907 = vmatprep.subr.bf16.mxu0 %v4570_v17 }
0x1466   : > { %v4564_v34 = vmul.f32 %v7784_v49, %v9389_v20  ;;  %v4568_v57 = vpack.c.bf16 %v4566_v45, %v4565_v43 }
0x1468   : > { %6908 = vmatpush3.bf16.msra.mxu0 %v4570_v17  ;;  %v4567_v31 = vpack.c.bf16 %v4564_v34, %v4563_v32 }
0x1469   : > { %6981 = vmatprep.subr.msk.bf16.mxu0 %vm1870_vm6, %v4637_v3 }
0x146a   : > { %6909 = vmatprep.mubr.msk.bf16.mxu0 %vm1875_vm9, %v4567_v31 }
0x146b   : > { %6910 = vmatmul.mubr.msk.bf16.vlgmr.msra.gmra.mxu0 %vm1875_vm9, %v4568_v57 }
0x146c   : > { %6914 = vmatpush3.bf16.xpose.msra.mxu0 %v4648_v60  ;;  %6917 = vmatprep.mubr.msk.bf16.mxu0 %vm1870_vm6, %v4631_v40 }
0x146d   : > { %6982 = vmatprep.subr.msk.bf16.mxu0 %vm1870_vm6, %v4635_v52 }
0x1474   : > { %6916 = vmatpush3.bf16.xpose.msra.mxu0 %v4645_v55 }
0x147b   : > { %6918 = vmatmul.mubr.msk.bf16.vlgmr.msra.gmra.mxu0 %vm1870_vm6, %v4633_v30 }
0x147c   : > { %5144 = vmatprep.mubr.bf16.mxu0 %v7935_v28 }
0x14ee   : > { %v9428_v26 = vpop.f32.mrf.mxu0 }
0x14f0   : > { %v9430_v20 = vpop.f32.mrf.mxu0 }
0x14f2   : > { %v9432_v37 = vpop.f32.mrf.mxu0 }
0x14f4   : > { %v9434_v53 = vpop.f32.mrf.mxu0 }
0x1523   : > { %v6895_v51 = vpop.f32.mrf.mxu0 }
0x1525   : > { %v4435_v54 = vpop.f32.mrf.mxu0 }
0x1527   : > { %v6896_v59 = vpop.f32.mrf.mxu0 }
0x1528   : > { %v7431_v16 = vpack.i.bf16 %v6896_v59, %v6895_v51 }
0x1529   : > { %v4438_v61 = vpop.f32.mrf.mxu0 }
0x152a   : > { %v7426_v62 = vpack.i.bf16 %v4438_v61, %v4435_v54 }
0x152b   : > { %v6911_v0 = vpop.f32.mrf.mxu0 }
0x152d   : > { %v4615_v4 = vpop.f32.mrf.mxu0 }
0x152f   : > { %v6912_v7 = vpop.f32.mrf.mxu0 }
0x1530   : > { %v7441_v23 = vpack.i.bf16 %v6912_v7, %v6911_v0  ;;  %v7586_v7 = vld [vmem:[%s9888_s5 + $0x18] sm:$0xff]  }
0x1531   : > { %v4618_v48 = vpop.f32.mrf.mxu0 }
0x1532   : > { %v7436_v27 = vpack.i.bf16 %v4618_v48, %v4615_v4  ;;  %v7588_v48 = vld [vmem:[%s9888_s5 + $0x8] sm:$0xff]  }
0x153b   : > { %v6919_v33 = vpop.f32.mrf.mxu0 }
0x153c   : > { %v4701_v25 = vmul.f32 0.25, %v6919_v33 }
0x153d   : > { %v4684_v5 = vpop.f32.mrf.mxu0 }
0x153e   : > { %v4699_v36 = vmul.f32 0.25, %v4684_v5  ;;  %v4709_v50 = vsel %vm1875_vm9, %v4701_v25, -inf }
0x153f   : > { %v6920_v56 = vpop.f32.mrf.mxu0 }
0x1540   : > { %v4703_v11 = vsel %vm1875_vm9, %v4699_v36, -inf  ;;  %v4702_v47 = vmul.f32 0.25, %v6920_v56 }
0x1541   : > { %4704 = vmax.xlane.f32.xlu0 %v4703_v11  ;;  %v4687_v1 = vpop.f32.mrf.mxu0 }
0x1542   : > { %v4700_v19 = vmul.f32 0.25, %v4687_v1  ;;  %v4712_v8 = vsel %vm1875_vm9, %v4702_v47, -inf }
0x1544   : > { %v4706_v6 = vsel %vm1875_vm9, %v4700_v19, -inf }
0x1545   : > { %4710 = vmax.xlane.f32.xlu0 %v4709_v50  ;;  %4707 = vmax.xlane.f32.xlu1 %v4706_v6 }
0x1549   : > { %4713 = vmax.xlane.f32.xlu0 %v4712_v8 }
0x15ca   : > { %v4705_v18 = vpop.xlane.xlu0 %4704 }
0x15cb   : > { %v4715_v46 = vsub.f32 %v4699_v36, %v4705_v18 }
0x15cd   : > { %v4719_v41 = vmul.f32 1.442695, %v4715_v46 }
0x15ce   : > { %v4711_v42 = vpop.xlane.xlu0 %4710  ;;  %v4708_v24 = vpop.xlane.xlu1 %4707 }
0x15cf   : > { %v4717_v63 = vsub.f32 %v4701_v25, %v4711_v42  ;;  %v4716_v38 = vsub.f32 %v4700_v19, %v4708_v24 }
0x15d1   : > { %v4723_v13 = vmul.f32 1.442695, %v4717_v63  ;;  %v4721_v10 = vmul.f32 1.442695, %v4716_v38 }
0x15d2   : > { %v4714_v39 = vpop.xlane.xlu0 %4713 }
0x15d3   : > { %7785 = vpow2.f32 %v4723_v13  ;;  %v4718_v44 = vsub.f32 %v4702_v47, %v4714_v39 }
0x15d4   : > { %7787 = vpow2.f32 %v4719_v41 }
0x15d5   : > { %v4725_v21 = vmul.f32 1.442695, %v4718_v44 }
0x15d7   : > { %7789 = vpow2.f32 %v4725_v21 }
0x15d8   : > { %7791 = vpow2.f32 %v4721_v10 }
0x15e0   : > { %v7786_v17 = vpop.eup %7785 }
0x15e1   : > { %v4733_v49 = vsel %vm1875_vm9, %v7786_v17, 0.0  ;;  %v7788_v3 = vpop.eup %7787 }
0x15e2   : > { %4734 = vadd.xlane.f32.xlu1 %v4733_v49  ;;  %v4727_v34 = vsel %vm1875_vm9, %v7788_v3, 0.0 }
0x15e4   : > { %v7790_v45 = vpop.eup %7789 }
0x15e5   : > { %v4736_v32 = vsel %vm1875_vm9, %v7790_v45, 0.0  ;;  %v7792_v43 = vpop.eup %7791 }
0x15e6   : > { %4737 = vadd.xlane.f32.xlu0 %v4736_v32  ;;  %4728 = vadd.xlane.f32.xlu1 %v4727_v34  ;;  %v4730_v31 = vsel %vm1875_vm9, %v7792_v43, 0.0 }
0x15ea   : > { %4731 = vadd.xlane.f32.xlu0 %v4730_v31 }
0x15f7   : > { %4751 = vrot.lane.b32.xlu1 %v9289_v22, %s9878_s3 }
0x15fb   : > { %7427 = vrot.lane.b32.xlu1 %v7426_v62, %s9877_s23 }
0x15ff   : > { %7432 = vrot.lane.b32.xlu1 %v7431_v16, %s9877_s23  ;;  %s9892_s23 = sld [smem:[#allocation20_spill]] }
0x1600   : > { %4749 = vrot.lane.b32.xlu0 %v9257_v35, %s9878_s3  ;;  %s9889_s3 = sld [smem:[#allocation19_spill]] }
0x1603   : > { %7442 = vrot.lane.b32.xlu1 %v7441_v23, %s9868_s11  ;;  %v7587_v23 = vld [vmem:[%s9888_s5 + $0x10] sm:$0xff]  }
0x1604   : > { %7437 = vrot.lane.b32.xlu0 %v7436_v27, %s9868_s11  ;;  %v7589_v27 = vld [vmem:[%s9888_s5] sm:$0xff]   ;;  %s9891_s11 = sld [smem:[#allocation24_spill]] }
0x166b   : > { %v4735_v57 = vpop.xlane.xlu1 %4734 }
0x166f   : > { %v4738_v60 = vpop.xlane.xlu0 %4737  ;;  %v4729_v40 = vpop.xlane.xlu1 %4728 }
0x1670   : > { %7793 = vrcp.f32 %v4738_v60 }
0x1671   : > { %7795 = vrcp.f32 %v4729_v40 }
0x1672   : > { %7797 = vrcp.f32 %v4735_v57 }
0x1673   : > { %v4732_v52 = vpop.xlane.xlu0 %4731  ;;  %v4752_v55 = vpop.permute.xlu1 %4751 }
0x1674   : > { %7799 = vrcp.f32 %v4732_v52  ;;  %6921 = vmatprep.subr.bf16.mxu1 %v4752_v55  ;;  %v6437_v52 = vld [vmem:[%s9889_s3] ss:$0 sm:$0xff]  ;;  %s9896_s3 = sld [smem:[#allocation28_spill]] }
0x1675   : > { %6922 = vmatpush3.bf16.msra.mxu1 %v4752_v55 }
0x1677   : > { %v4750_v22 = vpop.permute.xlu0 %4749  ;;  %v7428_v1 = vpop.permute.xlu1 %7427 }
0x1678   : > { %6923 = vmatprep.subr.bf16.mxu1 %v4750_v22  ;;  %v7430_v6 = vunpack.i.h.bf16 %v7428_v1  ;;  %v7429_v8 = vunpack.i.l.bf16 %v7428_v1 }
0x1679   : > { %6924 = vmatpush3.bf16.msra.mxu1 %v4750_v22 }
0x167a   : > { %6929 = vmatprep.subr.bf16.mxu1 %v7586_v7  ;;  %v4859_v44 = vsel %vm1870_vm6, %v9434_v53, %v7430_v6  ;;  %v4858_v10 = vsel %vm1870_vm6, %v9430_v20, %v7429_v8 }
0x167b   : > { %v7433_v19 = vpop.permute.xlu1 %7432  ;;  %v7438_v50 = vpop.permute.xlu0 %7437 }
0x167c   : > { %v7435_v18 = vunpack.i.h.bf16 %v7433_v19  ;;  %v7434_v46 = vunpack.i.l.bf16 %v7433_v19  ;;  %v7440_v63 = vunpack.i.h.bf16 %v7438_v50  ;;  %v7439_v41 = vunpack.i.l.bf16 %v7438_v50 }
0x167d   : > { %v7794_v35 = vpop.eup %7793 }
0x167e   : > { %v7796_v30 = vpop.eup %7795  ;;  %v4746_v59 = vmul.f32 %v7794_v35, %v7790_v45  ;;  %v4861_v21 = vsel %vm1870_vm6, %v9432_v37, %v7435_v18  ;;  %v4863_v53 = vsel %vm1875_vm9, %v4859_v44, %v7440_v63 }
0x167f   : > { %v7798_v51 = vpop.eup %7797  ;;  %v4743_v16 = vmul.f32 %v7796_v30, %v7788_v3  ;;  %v7443_v47 = vpop.permute.xlu1 %7442 }
0x1680   : > { %v4745_v62 = vmul.f32 %v7798_v51, %v7786_v17  ;;  %v7445_v42 = vunpack.i.h.bf16 %v7443_v47  ;;  %v7444_v24 = vunpack.i.l.bf16 %v7443_v47  ;;  %v4860_v17 = vsel %vm1870_vm6, %v9428_v26, %v7434_v46 }
0x1681   : > { %v7800_v54 = vpop.eup %7799 }
0x1682   : > { %v4744_v61 = vmul.f32 %v7800_v54, %v7792_v43  ;;  %v4748_v4 = vpack.c.bf16 %v4746_v59, %v4745_v62  ;;  %v4864_v3 = vsel %vm1875_vm9, %v4860_v17, %v7444_v24  ;;  %v4865_v45 = vsel %vm1875_vm9, %v4861_v21, %v7445_v42  ;;  %v7602_v21 = vld [vmem:[%s9891_s11 + $0x78] sm:$0xff]  }
0x1683   : > { %v4862_v43 = vsel %vm1875_vm9, %v4858_v10, %v7439_v41  ;;  %v7603_v17 = vld [vmem:[%s9891_s11 + $0x38] sm:$0xff]  }
0x1684   : > { %v4747_v0 = vpack.c.bf16 %v4744_v61, %v4743_v16 }
0x1686   : > { %6925 = vmatprep.mubr.msk.bf16.mxu1 %vm1875_vm9, %v4747_v0 }
0x1687   : > { %6926 = vmatmul.mubr.msk.bf16.vlgmr.msra.gmra.mxu1 %vm1875_vm9, %v4748_v4 }
0x1688   : > { %6930 = vmatpush3.bf16.msra.mxu1 %v7586_v7 }
0x1689   : > { %6931 = vmatprep.subr.bf16.mxu1 %v7587_v23 }
0x168c   : > { %6932 = vmatpush3.bf16.msra.mxu1 %v7587_v23 }
0x168d   : > { %6933 = vmatprep.subr.bf16.mxu1 %v7588_v48 }
0x1690   : > { %6934 = vmatpush3.bf16.msra.mxu1 %v7588_v48 }
0x1691   : > { %6935 = vmatprep.subr.bf16.mxu1 %v7589_v27 }
0x1694   : > { %6936 = vmatpush3.bf16.msra.mxu1 %v7589_v27 }
0x1695   : > { %6668 = vmatprep.subr.bf16.mxu1 %v7602_v21 }
0x1747   : > { %v6927_v33 = vpop.f32.mrf.mxu1 }
0x1749   : > { %v4795_v5 = vpop.f32.mrf.mxu1 }
0x174b   : > { %v6928_v36 = vpop.f32.mrf.mxu1 }
0x174c   : > { %v7451_v56 = vpack.i.bf16 %v6928_v36, %v6927_v33 }
0x174d   : > { %v4798_v25 = vpop.f32.mrf.mxu1 }
0x174e   : > { %v7446_v11 = vpack.i.bf16 %v4798_v25, %v4795_v5  ;;  %7452 = vrot.lane.b32.xlu1 %v7451_v56, %s9876_s28 }
0x1750   : > { %7447 = vrot.lane.b32.xlu0 %v7446_v11, %s9876_s28  ;;  %s9890_s28 = sld [smem:[#allocation22_spill]] }
0x1756   : > { %v7590_v24 = vld [vmem:[%s9890_s28 + $0x30] ss:$8 sps:$4 sm:$0xff]   ;;  %v7592_v63 = vld [vmem:[%s9890_s28 + $0x34] ss:$8 sps:$4 sm:$0xff]   ;;  %v7595_v41 = vld [vmem:[%s9890_s28 + $0x24] ss:$8 sps:$4 sm:$0xff]  }
0x1757   : > { %5120 = vmatprep.subr.bf16.mxu0 %v7592_v63  ;;  %v7601_v44 = vld [vmem:[%s9890_s28 + $0x4] ss:$8 sps:$4 sm:$0xff]   ;;  %v7599_v10 = vld [vmem:[%s9890_s28] ss:$8 sps:$4 sm:$0xff]  }
0x1758   : > { %5121 = vmatpush1.bf16.msra.mxu0 %v7590_v24 }
0x1759   : > { %5122 = vmatprep.subr.bf16.mxu0 %v7595_v41 }
0x17c0   : > { %v7453_v13 = vpop.permute.xlu1 %7452 }
0x17c1   : > { %v7455_v38 = vunpack.i.h.bf16 %v7453_v13  ;;  %v7454_v39 = vunpack.i.l.bf16 %v7453_v13  ;;  %v7593_v13 = vld [vmem:[%s9890_s28 + $0x20] ss:$8 sps:$4 sm:$0xff]  }
0x17c2   : > { %v7448_v49 = vpop.permute.xlu0 %7447  ;;  %5123 = vmatpush1.bf16.msra.mxu0 %v7593_v13 }
0x17c3   : > { %v7450_v32 = vunpack.i.h.bf16 %v7448_v49  ;;  %v7449_v34 = vunpack.i.l.bf16 %v7448_v49  ;;  %v4868_v20 = vsel %vm1880_vm10, %v4864_v3, %v7454_v39  ;;  %v4869_v31 = vsel %vm1880_vm10, %v4865_v45, %v7455_v38  ;;  %v7598_v38 = vld [vmem:[%s9890_s28 + $0x14] ss:$8 sps:$4 sm:$0xff]   ;;  %v7596_v39 = vld [vmem:[%s9890_s28 + $0x10] ss:$8 sps:$4 sm:$0xff]   ;;  %v7606_v45 = vld [vmem:[%s9891_s11 + $0x68] sm:$0xff]  }
0x17c4   : > { %v4871_v60 = vpack.c.bf16 %v4869_v31, %v4868_v20  ;;  %5124 = vmatprep.subr.bf16.mxu0 %v7598_v38  ;;  %v7604_v49 = vld [vmem:[%s9891_s11 + $0x70] sm:$0xff]   ;;  %v7611_v20 = vld [vmem:[%s9891_s11 + $0x18] sm:$0xff]  }
0x17c5   : > { %v4866_v37 = vsel %vm1880_vm10, %v4862_v43, %v7449_v34  ;;  %v4867_v26 = vsel %vm1880_vm10, %v4863_v53, %v7450_v32  ;;  %v7605_v3 = vld [vmem:[%s9891_s11 + $0x30] sm:$0xff]   ;;  %v7607_v32 = vld [vmem:[%s9891_s11 + $0x28] sm:$0xff]   ;;  %v7608_v34 = vld [vmem:[%s9891_s11 + $0x60] sm:$0xff]  }
0x17c6   : > { %v4870_v57 = vpack.c.bf16 %v4867_v26, %v4866_v37  ;;  %5125 = vmatpush1.bf16.msra.mxu0 %v7596_v39  ;;  %v7609_v43 = vld [vmem:[%s9891_s11 + $0x20] sm:$0xff]   ;;  %v7610_v53 = vld [vmem:[%s9891_s11 + $0x58] sm:$0xff]   ;;  %vm9899_vm10 = vmmov %vm9869_vm7 }
0x17c7   : > { %5126 = vmatprep.subr.bf16.mxu0 %v7601_v44 }
0x17c8   : > { %6937 = vmatprep.mubr.msk.bf16.mxu1 %vm1885_vm11, %v4870_v57 }
0x17c9   : > { %6938 = vmatmul.mubr.msk.bf16.vlgmr.msra.gmra.mxu1 %vm1885_vm11, %v4871_v60 }
0x17ca   : > { %5127 = vmatpush1.bf16.msra.mxu0 %v7599_v10  ;;  %6669 = vmatpush3.bf16.msra.mxu1 %v7603_v17 }
0x17cb   : > { %6670 = vmatprep.subr.bf16.mxu1 %v7604_v49 }
0x17ce   : > { %6671 = vmatpush3.bf16.msra.mxu1 %v7605_v3 }
0x17cf   : > { %6672 = vmatprep.subr.bf16.mxu1 %v7606_v45 }
0x17d2   : > { %6673 = vmatpush3.bf16.msra.mxu1 %v7607_v32 }
0x17d3   : > { %6674 = vmatprep.subr.bf16.mxu1 %v7608_v34 }
0x17d6   : > { %6675 = vmatpush3.bf16.msra.mxu1 %v7609_v43 }
0x17d7   : > { %6676 = vmatprep.subr.bf16.mxu1 %v7610_v53 }
0x17da   : > { %6677 = vmatpush3.bf16.msra.mxu1 %v7611_v20 }
0x1889   : > { %v6939_v40 = vpop.f32.mrf.mxu1 }
0x188a   : > { %v4960_v22 = vadd.f32 %v6939_v40, %v6437_v52 }
0x188b   : > { %v4951_v55 = vpop.f32.mrf.mxu1 }
0x188c   : > { %v4952_v35 = vadd.f32 %v6437_v52, %v4951_v55  ;;  %v4968_v59 = vadd.f32 %v4960_v22, %v9245_v14 }
0x188d   : > { %v6940_v30 = vpop.f32.mrf.mxu1 }
0x188e   : > { %v4966_v51 = vadd.f32 %v4952_v35, %v9237_v29  ;;  %v4963_v16 = vadd.f32 %v6940_v30, %v6437_v52  ;;  %v4978_v23 = vsel %vm1885_vm11, %v4968_v59, 0.0 }
0x188f   : > { %v4954_v54 = vpop.f32.mrf.mxu1 }
0x1890   : > { %v4955_v61 = vadd.f32 %v6437_v52, %v4954_v54  ;;  %v4972_v62 = vsel %vm1885_vm11, %v4966_v51, 0.0  ;;  %v4969_v4 = vadd.f32 %v4963_v16, %v9247_v58  ;;  %v6444_v16 = vld [vmem:[%s9892_s23] ss:$0 sm:$0xff]  ;;  %s9897_s23 = sld [smem:[#allocation26_spill]] }
0x1891   : > { %4973 = vadd.xlane.f32.xlu0 %v4972_v62 }
0x1892   : > { %v4967_v0 = vadd.f32 %v4955_v61, %v9239_v12  ;;  %v4981_v29 = vsel %vm1885_vm11, %v4969_v4, 0.0 }
0x1894   : > { %v4975_v7 = vsel %vm1885_vm11, %v4967_v0, 0.0 }
0x1895   : > { %4976 = vadd.xlane.f32.xlu1 %v4975_v7  ;;  %4979 = vadd.xlane.f32.xlu0 %v4978_v23  ;;  %v6445_v7 = vld [vmem:[%s9893_s9] ss:$0 sm:$0xff]  ;;  %s9898_s9 = sld [smem:[#allocation27_spill]] }
0x1899   : > { %4982 = vadd.xlane.f32.xlu0 %v4981_v29 }
0x191a   : > { %v4974_v48 = vpop.xlane.xlu0 %4973 }
0x191b   : > { %v4984_v14 = vmul.f32 0.015625, %v4974_v48 }
0x191d   : > { %v9487_v27 = vsub.f32 %v4966_v51, %v4984_v14 }
0x191e   : > { %v4977_v33 = vpop.xlane.xlu1 %4976  ;;  %v4980_v5 = vpop.xlane.xlu0 %4979 }
0x191f   : > { %v4985_v36 = vmul.f32 0.015625, %v4977_v33  ;;  %v4986_v56 = vmul.f32 0.015625, %v4980_v5  ;;  %v4992_v12 = vmul.f32 %v9487_v27, %v9487_v27 }
0x1921   : > { %v9491_v58 = vsub.f32 %v4967_v0, %v4985_v36  ;;  %v9493_v25 = vsub.f32 %v4968_v59, %v4986_v56  ;;  %v4996_v11 = vsel %vm1885_vm11, %v4992_v12, 0.0 }
0x1922   : > { %4997 = vadd.xlane.f32.xlu1 %v4996_v11  ;;  %v4983_v1 = vpop.xlane.xlu0 %4982 }
0x1923   : > { %v4987_v19 = vmul.f32 0.015625, %v4983_v1  ;;  %v4993_v47 = vmul.f32 %v9491_v58, %v9491_v58  ;;  %v4994_v50 = vmul.f32 %v9493_v25, %v9493_v25  ;;  %v7613_v1 = vld [vmem:[%s9891_s11 + $0x10] sm:$0xff]  }
0x1925   : > { %v9500_v6 = vsub.f32 %v4969_v4, %v4987_v19  ;;  %v4999_v8 = vsel %vm1885_vm11, %v4993_v47, 0.0  ;;  %v5002_v18 = vsel %vm1885_vm11, %v4994_v50, 0.0  ;;  %v7614_v19 = vld [vmem:[%s9891_s11 + $0x48] sm:$0xff]   ;;  %v7616_v50 = vld [vmem:[%s9891_s11 + $0x40] sm:$0xff]  }
0x1926   : > { %5000 = vadd.xlane.f32.xlu0 %v4999_v8  ;;  %5003 = vadd.xlane.f32.xlu1 %v5002_v18  ;;  %v7615_v47 = vld [vmem:[%s9891_s11 + $0x8] sm:$0xff]  }
0x1927   : > { %v4995_v46 = vmul.f32 %v9500_v6, %v9500_v6 }
0x1929   : > { %v5005_v42 = vsel %vm1885_vm11, %v4995_v46, 0.0 }
0x192a   : > { %5006 = vadd.xlane.f32.xlu0 %v5005_v42 }
0x19ab   : > { %v4998_v31 = vpop.xlane.xlu1 %4997 }
0x19ac   : > { %v5008_v37 = vmul.f32 0.015625, %v4998_v31 }
0x19ae   : > { %v5012_v26 = vadd.f32 1e-05, %v5008_v37 }
0x19af   : > { %v5004_v57 = vpop.xlane.xlu1 %5003  ;;  %v5001_v60 = vpop.xlane.xlu0 %5000 }
0x19b0   : > { %7801 = vrsqrt.f32 %v5012_v26  ;;  %v5010_v40 = vmul.f32 0.015625, %v5004_v57  ;;  %v5009_v52 = vmul.f32 0.015625, %v5001_v60 }
0x19b2   : > { %v5013_v55 = vadd.f32 1e-05, %v5009_v52  ;;  %v5014_v22 = vadd.f32 1e-05, %v5010_v40 }
0x19b3   : > { %v5007_v35 = vpop.xlane.xlu0 %5006 }
0x19b4   : > { %v5011_v30 = vmul.f32 0.015625, %v5007_v35  ;;  %7803 = vrsqrt.f32 %v5013_v55  ;;  %v6456_v55 = vld [vmem:[%s9895_s12] ss:$0 sm:$0xff]  ;;  %s1145_s12 = sand.u32 1, %s7869_s16  }
0x19b5   : > { %7805 = vrsqrt.f32 %v5014_v22 }
0x19b6   : > { %v5015_v51 = vadd.f32 1e-05, %v5011_v30 }
0x19b8   : > { %7807 = vrsqrt.f32 %v5015_v51 }
0x19bd   : > { %v7802_v54 = vpop.eup %7801 }
0x19be   : > { %v5020_v59 = vmul.f32 %v7802_v54, %v9487_v27 }
0x19c0   : > { %v5030_v0 = vmul.f32 %v6444_v16, %v5020_v59 }
0x19c1   : > { %v7804_v61 = vpop.eup %7803 }
0x19c2   : > { %v5021_v62 = vmul.f32 %v7804_v61, %v9491_v58  ;;  %v7806_v4 = vpop.eup %7805  ;;  %v9530_v14 = vadd.f32 %v6445_v7, %v5030_v0 }
0x19c3   : > { %v5022_v27 = vmul.f32 %v7806_v4, %v9493_v25  ;;  %v7612_v25 = vld [vmem:[%s9891_s11 + $0x50] sm:$0xff]  }
0x19c4   : > { %v5031_v29 = vmul.f32 %v6444_v16, %v5021_v62  ;;  %6678 = vmatprep.subr.bf16.mxu1 %v7612_v25 }
0x19c5   : > { %v7808_v23 = vpop.eup %7807  ;;  %v5032_v56 = vmul.f32 %v6444_v16, %v5022_v27  ;;  %6679 = vmatpush3.bf16.msra.mxu1 %v7613_v1 }
0x19c6   : > { %v5023_v48 = vmul.f32 %v7808_v23, %v9500_v6  ;;  %v9532_v33 = vadd.f32 %v6445_v7, %v5031_v29  ;;  %6680 = vmatprep.subr.bf16.mxu1 %v7614_v19  ;;  %v5054_v6 = vld [vmem:[%s9894_s8] sm:$0x3]  ;;  %s9904_s8 = sld [smem:[#allocation29_spill]] }
0x19c7   : > { %v9541_v58 = vadd.f32 %v6445_v7, %v5032_v56  ;;  %v5063_v18 = vrot.slane %v5054_v6, %v8909_v15  ;;  %v5059_v46 = vrot.slane %v5054_v6, %v8906_v9 }
0x19c8   : > { %v5044_v5 = vpack.c.bf16 %v9532_v33, %v9530_v14  ;;  %v5033_v36 = vmul.f32 %v6444_v16, %v5023_v48 }
0x19c9   : > { %6681 = vmatpush3.bf16.msra.mxu1 %v7615_v47 }
0x19ca   : > { %6454 = vmatmul.mubr.msk.bf16.vlgmr.msra.gmra.mxu0 %vm1885_vm11, %v5044_v5  ;;  %v9539_v12 = vadd.f32 %v6445_v7, %v5033_v36  ;;  %6682 = vmatprep.subr.bf16.mxu1 %v7616_v50 }
0x19cb   : > { %5154 = vmatprep.mubr.bf16.mxu0 %v7935_v28  ;;  %v7617_v28 = vld [vmem:[%s9891_s11] sm:$0xff]  }
0x19cc   : > { %v5045_v11 = vpack.c.bf16 %v9539_v12, %v9541_v58 }
0x19cd   : > { %6683 = vmatpush3.bf16.msra.mxu1 %v7617_v28 }
0x19d2   : > { %6455 = vmatmul.mubr.msk.bf16.gmra.mxu0 %vm1885_vm11, %v5045_v11 }
0x1a8a   : > { %v5146_v8 = vpop.f32.mrf.mxu0 }
0x1a8b   : > { %v5147_v13 = vadd.f32 %v5146_v8, %v5059_v46 }
0x1a8c   : > { %v5148_v42 = vpop.f32.mrf.mxu0 }
0x1a8d   : > { %v5149_v63 = vadd.f32 %v5148_v42, %v5063_v18  ;;  %v5165_v49 = vmax.f32 %v5147_v13, 0.0 }
0x1a8e   : > { %v5150_v24 = vpop.f32.mrf.mxu0 }
0x1a8f   : > { %v5151_v41 = vadd.f32 %v5150_v24, %v5059_v46  ;;  %v5166_v21 = vmax.f32 %v5149_v63, 0.0 }
0x1a90   : > { %v5152_v38 = vpop.f32.mrf.mxu0 }
0x1a91   : > { %v5153_v39 = vadd.f32 %v5152_v38, %v5063_v18  ;;  %v5167_v44 = vmax.f32 %v5151_v41, 0.0 }
0x1a92   : > { %v5156_v10 = vpop.f32.mrf.mxu0 }
0x1a93   : > { %v5168_v17 = vmax.f32 %v5153_v39, 0.0  ;;  %v5173_v32 = vpack.c.bf16 %v5167_v44, %v5165_v49  ;;  %v5157_v9 = vadd.f32 %v5156_v10, %v5059_v46  ;;  %v7620_v49 = vld [vmem:[%s9896_s3 + $0x70] sm:$0xff]  }
0x1a94   : > { %v5158_v3 = vpop.f32.mrf.mxu0 }
0x1a95   : > { %v5174_v45 = vpack.c.bf16 %v5168_v17, %v5166_v21  ;;  %v5159_v43 = vadd.f32 %v5158_v3, %v5063_v18  ;;  %v5169_v57 = vmax.f32 %v5157_v9, 0.0  ;;  %v7618_v21 = vld [vmem:[%s9896_s3 + $0x78] sm:$0xff]   ;;  %v7632_v9 = vld [vmem:[%s9896_s3 + $0xe8] sm:$0xff]  }
0x1a96   : > { %v5160_v34 = vpop.f32.mrf.mxu0  ;;  %v7619_v17 = vld [vmem:[%s9896_s3 + $0x38] sm:$0xff]   ;;  %6696 = vmatprep.subr.bf16.mxu0 %v7618_v21 }
0x1a97   : > { %v5161_v15 = vadd.f32 %v5160_v34, %v5059_v46  ;;  %5344 = vmatprep.mubr.bf16.mxu1 %v5174_v45  ;;  %v5170_v37 = vmax.f32 %v5159_v43, 0.0  ;;  %v7624_v3 = vld [vmem:[%s9896_s3 + $0xf8] sm:$0xff]   ;;  %6697 = vmatpush3.bf16.msra.mxu0 %v7619_v17  ;;  %v7628_v34 = vld [vmem:[%s9896_s3 + $0xf0] sm:$0xff]   ;;  %v7622_v43 = vld [vmem:[%s9896_s3 + $0x68] sm:$0xff]  }
0x1a98   : > { %v5162_v53 = vpop.f32.mrf.mxu0  ;;  %5345 = vmatmul.mubr.bf16.vlgmr.msra.gmra.mxu1 %v5173_v32  ;;  %v7626_v45 = vld [vmem:[%s9896_s3 + $0xb8] sm:$0xff]   ;;  %v7621_v32 = vld [vmem:[%s9896_s3 + $0x30] sm:$0xff]   ;;  %6698 = vmatprep.subr.bf16.mxu0 %v7620_v49 }
0x1a99   : > { %v5163_v20 = vadd.f32 %v5162_v53, %v5063_v18  ;;  %v5171_v31 = vmax.f32 %v5161_v15, 0.0  ;;  %6724 = vmatprep.subr.bf16.mxu1 %v7624_v3  ;;  %v7630_v15 = vld [vmem:[%s9896_s3 + $0xb0] sm:$0xff]   ;;  %v7623_v53 = vld [vmem:[%s9896_s3 + $0x28] sm:$0xff]  }
0x1a9a   : > { %6725 = vmatpush3.bf16.msra.mxu1 %v7626_v45  ;;  %v7645_v17 = vld [vmem:[%s9896_s3 + $0x90] sm:$0xff]  }
0x1a9b   : > { %v5172_v26 = vmax.f32 %v5163_v20, 0.0  ;;  %v5175_v40 = vpack.c.bf16 %v5171_v31, %v5169_v57  ;;  %6726 = vmatprep.subr.bf16.mxu1 %v7628_v34  ;;  %6699 = vmatpush3.bf16.msra.mxu0 %v7621_v32  ;;  %v7625_v20 = vld [vmem:[%s9896_s3 + $0x60] sm:$0xff]   ;;  %v7634_v31 = vld [vmem:[%s9896_s3 + $0xa8] sm:$0xff]   ;;  %v7629_v57 = vld [vmem:[%s9896_s3 + $0x58] sm:$0xff]  }
0x1a9c   : > { %6700 = vmatprep.subr.bf16.mxu0 %v7622_v43 }
0x1a9d   : > { %v5176_v60 = vpack.c.bf16 %v5172_v26, %v5170_v37  ;;  %v7636_v37 = vld [vmem:[%s9896_s3 + $0xe0] sm:$0xff]  }
0x1a9e   : > { %6727 = vmatpush3.bf16.msra.mxu1 %v7630_v15  ;;  %v7627_v26 = vld [vmem:[%s9896_s3 + $0x20] sm:$0xff]  }
0x1a9f   : > { %5352 = vmatprep.mubr.bf16.mxu1 %v5176_v60  ;;  %6728 = vmatprep.subr.bf16.mxu1 %v7632_v9  ;;  %v7638_v60 = vld [vmem:[%s9896_s3 + $0xa0] sm:$0xff]   ;;  %v7647_v9 = vld [vmem:[%s9896_s3 + $0xc8] sm:$0xff]  }
0x1aa0   : > { %5353 = vmatmul.mubr.bf16.gmra.mxu1 %v5175_v40  ;;  %6701 = vmatpush3.bf16.msra.mxu0 %v7623_v53  ;;  %v7631_v40 = vld [vmem:[%s9896_s3 + $0x18] sm:$0xff]  }
0x1aa1   : > { %6702 = vmatprep.subr.bf16.mxu0 %v7625_v20 }
0x1aa2   : > { %6729 = vmatpush3.bf16.msra.mxu1 %v7634_v31 }
0x1aa3   : > { %6730 = vmatprep.subr.bf16.mxu1 %v7636_v37 }
0x1aa4   : > { %6703 = vmatpush3.bf16.msra.mxu0 %v7627_v26 }
0x1aa5   : > { %6704 = vmatprep.subr.bf16.mxu0 %v7629_v57 }
0x1aa6   : > { %6731 = vmatpush3.bf16.msra.mxu1 %v7638_v60 }
0x1aa8   : > { %6705 = vmatpush3.bf16.msra.mxu0 %v7631_v40  ;;  %v7648_v40 = vld [vmem:[%s9896_s3 + $0x88] sm:$0xff]  }
0x1b58   : > { %v6684_v52 = vpop.f32.mrf.mxu1 }
0x1b5a   : > { %v6685_v22 = vpop.f32.mrf.mxu1 }
0x1b5b   : > { %v6686_v35 = vadd.f32 %v6685_v22, %v6684_v52  ;;  %v7633_v52 = vld [vmem:[%s9896_s3 + $0x50] sm:$0xff]   ;;  %v7637_v22 = vld [vmem:[%s9896_s3 + $0x48] sm:$0xff]  }
0x1b5c   : > { %v6687_v30 = vpop.f32.mrf.mxu1  ;;  %6706 = vmatprep.subr.bf16.mxu0 %v7633_v52 }
0x1b5d   : > { %v5347_v51 = vadd.f32 %v6686_v35, %v6456_v55  ;;  %v7639_v35 = vld [vmem:[%s9896_s3 + $0x8] sm:$0xff]  }
0x1b5e   : > { %v6688_v54 = vpop.f32.mrf.mxu1 }
0x1b5f   : > { %v6689_v59 = vadd.f32 %v6688_v54, %v6687_v30  ;;  %v5361_v16 = vadd.f32 %v5347_v51, %v9530_v14 }
0x1b60   : > { %v6690_v61 = vpop.f32.mrf.mxu1 }
0x1b61   : > { %v5350_v62 = vadd.f32 %v6689_v59, %v6456_v55  ;;  %v5367_v0 = vsel %vm1885_vm11, %v5361_v16, 0.0 }
0x1b62   : > { %5368 = vadd.xlane.f32.xlu1 %v5367_v0  ;;  %v6691_v4 = vpop.f32.mrf.mxu1 }
0x1b63   : > { %v6692_v7 = vadd.f32 %v6691_v4, %v6690_v61  ;;  %v5362_v23 = vadd.f32 %v5350_v62, %v9532_v33 }
0x1b64   : > { %v6693_v29 = vpop.f32.mrf.mxu1 }
0x1b65   : > { %v5355_v48 = vadd.f32 %v6692_v7, %v6456_v55  ;;  %v5370_v27 = vsel %vm1885_vm11, %v5362_v23, 0.0 }
0x1b66   : > { %5371 = vadd.xlane.f32.xlu0 %v5370_v27  ;;  %v6694_v5 = vpop.f32.mrf.mxu1  ;;  %v6473_v27 = vld [vmem:[%s9897_s23] ss:$0 sm:$0xff]  ;;  %s6519_s23 = sshll.u32 %s8165_s0, 4  ;;  %s7943_s0 = smov [#allocation2]  }
0x1b67   : > { %v6695_v36 = vadd.f32 %v6694_v5, %v6693_v29  ;;  %v5363_v56 = vadd.f32 %v5355_v48, %v9541_v58 }
0x1b69   : > { %v5358_v11 = vadd.f32 %v6695_v36, %v6456_v55  ;;  %v5373_v14 = vsel %vm1885_vm11, %v5363_v56, 0.0  ;;  %v7635_v55 = vld [vmem:[%s9896_s3 + $0x10] sm:$0xff]   ;;  %v6474_v36 = vld [vmem:[%s9898_s9] ss:$0 sm:$0xff]  ;;  %s1146_s9 = scalar_lea.vmem [#allocation2], %s1145_s12 }
0x1b6a   : > { %5374 = vadd.xlane.f32.xlu1 %v5373_v14  ;;  %6707 = vmatpush3.bf16.msra.mxu0 %v7635_v55 }
0x1b6b   : > { %v5364_v25 = vadd.f32 %v5358_v11, %v9539_v12  ;;  %6708 = vmatprep.subr.bf16.mxu0 %v7637_v22 }
0x1b6d   : > { %v5376_v1 = vsel %vm1885_vm11, %v5364_v25, 0.0 }
0x1b6e   : > { %5377 = vadd.xlane.f32.xlu0 %v5376_v1  ;;  %6709 = vmatpush3.bf16.msra.mxu0 %v7639_v35 }
0x1beb   : > { %v5369_v19 = vpop.xlane.xlu1 %5368 }
0x1bec   : > { %v5379_v33 = vmul.f32 0.015625, %v5369_v19 }
0x1bee   : > { %v9564_v47 = vsub.f32 %v5361_v16, %v5379_v33 }
0x1bef   : > { %v5372_v50 = vpop.xlane.xlu0 %5371 }
0x1bf0   : > { %v5380_v28 = vmul.f32 0.015625, %v5372_v50  ;;  %v5387_v6 = vmul.f32 %v9564_v47, %v9564_v47 }
0x1bf2   : > { %v9568_v8 = vsub.f32 %v5362_v23, %v5380_v28  ;;  %v5391_v58 = vsel %vm1885_vm11, %v5387_v6, 0.0 }
0x1bf3   : > { %5392 = vadd.xlane.f32.xlu1 %v5391_v58  ;;  %v5375_v18 = vpop.xlane.xlu1 %5374 }
0x1bf4   : > { %v5381_v12 = vmul.f32 0.015625, %v5375_v18  ;;  %v5388_v46 = vmul.f32 %v9568_v8, %v9568_v8 }
0x1bf6   : > { %v9573_v42 = vsub.f32 %v5363_v56, %v5381_v12  ;;  %v5394_v24 = vsel %vm1885_vm11, %v5388_v46, 0.0  ;;  %v7640_v46 = vld [vmem:[%s9896_s3 + $0xd8] sm:$0xff]  }
0x1bf7   : > { %5395 = vadd.xlane.f32.xlu0 %v5394_v24  ;;  %v5378_v63 = vpop.xlane.xlu0 %5377  ;;  %v7641_v24 = vld [vmem:[%s9896_s3 + $0x40] sm:$0xff]   ;;  %6732 = vmatprep.subr.bf16.mxu1 %v7640_v46 }
0x1bf8   : > { %v5382_v41 = vmul.f32 0.015625, %v5378_v63  ;;  %v5389_v13 = vmul.f32 %v9573_v42, %v9573_v42  ;;  %v7642_v63 = vld [vmem:[%s9896_s3 + $0x98] sm:$0xff]   ;;  %6710 = vmatprep.subr.bf16.mxu0 %v7641_v24 }
0x1bf9   : > { %6733 = vmatpush3.bf16.msra.mxu1 %v7642_v63 }
0x1bfa   : > { %v9578_v38 = vsub.f32 %v5364_v25, %v5382_v41  ;;  %v5397_v39 = vsel %vm1885_vm11, %v5389_v13, 0.0 }
0x1bfb   : > { %5398 = vadd.xlane.f32.xlu1 %v5397_v39 }
0x1bfc   : > { %v5390_v44 = vmul.f32 %v9578_v38, %v9578_v38 }
0x1bfe   : > { %v5400_v10 = vsel %vm1885_vm11, %v5390_v44, 0.0  ;;  %v7644_v44 = vld [vmem:[%s9896_s3 + $0xd0] sm:$0xff]  }
0x1bff   : > { %5401 = vadd.xlane.f32.xlu0 %v5400_v10  ;;  %6734 = vmatprep.subr.bf16.mxu1 %v7644_v44 }
0x1c00   : > { %6735 = vmatpush3.bf16.msra.mxu1 %v7645_v17 }
0x1c01   : > { %6736 = vmatprep.subr.bf16.mxu1 %v7647_v9 }
0x1c04   : > { %6737 = vmatpush3.bf16.msra.mxu1 %v7648_v40 }
0x1c7c   : > { %v5393_v30 = vpop.xlane.xlu1 %5392 }
0x1c7d   : > { %v5403_v51 = vmul.f32 0.015625, %v5393_v30 }
0x1c7f   : > { %v5407_v54 = vadd.f32 1e-05, %v5403_v51 }
0x1c80   : > { %v5396_v59 = vpop.xlane.xlu0 %5395 }
0x1c81   : > { %7809 = vrsqrt.f32 %v5407_v54  ;;  %v5404_v16 = vmul.f32 0.015625, %v5396_v59 }
0x1c83   : > { %v5408_v61 = vadd.f32 1e-05, %v5404_v16 }
0x1c84   : > { %v5399_v62 = vpop.xlane.xlu1 %5398 }
0x1c85   : > { %7811 = vrsqrt.f32 %v5408_v61  ;;  %v5405_v0 = vmul.f32 0.015625, %v5399_v62 }
0x1c87   : > { %v5409_v4 = vadd.f32 1e-05, %v5405_v0 }
0x1c88   : > { %v5402_v7 = vpop.xlane.xlu0 %5401 }
0x1c89   : > { %7813 = vrsqrt.f32 %v5409_v4  ;;  %v5406_v23 = vmul.f32 0.015625, %v5402_v7 }
0x1c8b   : > { %v5410_v29 = vadd.f32 1e-05, %v5406_v23 }
0x1c8d   : > { %7815 = vrsqrt.f32 %v5410_v29 }
0x1c8e   : > { %v7810_v48 = vpop.eup %7809 }
0x1c8f   : > { %v5415_v5 = vmul.f32 %v7810_v48, %v9564_v47 }
0x1c91   : > { %v5425_v56 = vmul.f32 %v6473_v27, %v5415_v5  ;;  %v7651_v5 = vld [vmem:[%s9896_s3 + $0x80] sm:$0xff]  }
0x1c92   : > { %v7812_v11 = vpop.eup %7811 }
0x1c93   : > { %v5416_v14 = vmul.f32 %v7812_v11, %v9568_v8  ;;  %v5435_v25 = vadd.f32 %v6474_v36, %v5425_v56 }
0x1c95   : > { %v5426_v1 = vmul.f32 %v6473_v27, %v5416_v14  ;;  %v5443_v28 = vrot.slane %v5435_v25, 4 }
0x1c96   : > { %v7814_v19 = vpop.eup %7813 }
0x1c97   : > { %v5436_v33 = vadd.f32 %v6474_v36, %v5426_v1  ;;  %v5417_v50 = vmul.f32 %v7814_v19, %v9573_v42  ;;  %v9619_v41 = vsel %vm1244_vm4, 0.0, %v5443_v28  ;;  %v7643_v42 = vld [vmem:[%s9896_s3] sm:$0xff]  }
0x1c98   : > { %v5493_v45 = vrot.slane %v9619_v41, 3  ;;  %6711 = vmatpush3.bf16.msra.mxu0 %v7643_v42  ;;  %v5459_v34 = vrot.slane %v9619_v41, 1  ;;  %v5561_v20 = vrot.slane %v9619_v41, 7 }
0x1c99   : > { %v5444_v6 = vrot.slane %v5436_v33, 4  ;;  %v5427_v58 = vmul.f32 %v6473_v27, %v5417_v50  ;;  %v5527_v33 = vrot.slane %v9619_v41, 5 }
0x1c9a   : > { %v7816_v47 = vpop.eup %7815 }
0x1c9b   : > { %v9612_v18 = vsel %vm1244_vm4, %v5443_v28, %v5444_v6  ;;  %v5437_v12 = vadd.f32 %v6474_v36, %v5427_v58  ;;  %v5418_v8 = vmul.f32 %v7816_v47, %v9578_v38  ;;  %v9627_v38 = vld [vmem:[%s9896_s3 + $0x118] sm:$0xff]  }
0x1c9c   : > { %v5494_v10 = vrot.slane %v9612_v18, 3  ;;  %v5460_v21 = vrot.slane %v9612_v18, 1  ;;  %6941 = vmatprep.subr.bf16.mxu0 %v9627_v38  ;;  %v5562_v31 = vrot.slane %v9612_v18, 7  ;;  %v5528_v25 = vrot.slane %v9612_v18, 5 }
0x1c9d   : > { %v5446_v13 = vrot.slane %v5437_v12, 4  ;;  %v5428_v39 = vmul.f32 %v6473_v27, %v5418_v8  ;;  %v7650_v27 = vld [vmem:[%s9896_s3 + $0xc0] sm:$0xff]   ;;  %v5481_v24 = vrot.slane %v9612_v18, 2 }
0x1c9e   : > { %v5495_v37 = vsel %vm1222_vm2, %v5493_v45, %v5494_v10  ;;  %v5461_v57 = vsel %vm1178_vm1, %v5459_v34, %v5460_v21  ;;  %v5563_v0 = vsel %vm9900_vm13, %v5561_v20, %v5562_v31  ;;  %6738 = vmatprep.subr.bf16.mxu1 %v7650_v27  ;;  %v5529_v58 = vsel %vm1266_vm5, %v5527_v33, %v5528_v25 }
0x1c9f   : > { %v9630_v49 = vsel %vm1244_vm4, %v5444_v6, %v5446_v13  ;;  %v5438_v3 = vadd.f32 %v6474_v36, %v5428_v39  ;;  %6739 = vmatpush3.bf16.msra.mxu1 %v7651_v5  ;;  %v5480_v39 = vrot.slane %v9619_v41, 2 }
0x1ca0   : > { %v5496_v32 = vrot.slane %v9630_v49, 3  ;;  %v5462_v43 = vrot.slane %v9630_v49, 1  ;;  %v5564_v15 = vrot.slane %v9630_v49, 7  ;;  %v5530_v48 = vrot.slane %v9630_v49, 5 }
0x1ca1   : > { %v5448_v53 = vrot.slane %v5438_v3, 4  ;;  %v5483_v63 = vrot.slane %v9630_v49, 2  ;;  %v5482_v3 = vsel %vm1200_vm3, %v5480_v39, %v5481_v24  ;;  %v5551_v34 = vrot.slane %v9630_v49, 6 }
0x1ca2   : > { %v5497_v26 = vsel %vm1222_vm2, %v5494_v10, %v5496_v32  ;;  %v5463_v60 = vsel %vm1178_vm1, %v5460_v21, %v5462_v43  ;;  %v5565_v30 = vsel %vm9899_vm10, %v5562_v31, %v5564_v15  ;;  %v5531_v50 = vsel %vm1266_vm5, %v5528_v25, %v5530_v48 }
0x1ca3   : > { %v9647_v52 = vsel %vm1244_vm4, %v5446_v13, %v5448_v53  ;;  %v9650_v55 = vsel %vm1244_vm4, %v5448_v53, 0.0  ;;  %v7456_v22 = vpack.i.bf16 %v5497_v26, %v5495_v37  ;;  %v7461_v35 = vpack.i.bf16 %v5463_v60, %v5461_v57 }
0x1ca4   : > { %v5464_v51 = vrot.slane %v9647_v52, 1  ;;  %v5466_v54 = vrot.slane %v9650_v55, 1  ;;  %v5498_v59 = vrot.slane %v9647_v52, 3  ;;  %v5500_v16 = vrot.slane %v9650_v55, 3 }
0x1ca5   : > { %7457 = vrot.lane.b32.xlu1 %v7456_v22, %s9870_s1  ;;  %7462 = vrot.lane.b32.xlu0 %v7461_v35, %s9870_s1  ;;  %v5566_v61 = vrot.slane %v9647_v52, 7  ;;  %v5568_v62 = vrot.slane %v9650_v55, 7  ;;  %v7466_v23 = vpack.i.bf16 %v5565_v30, %v5563_v0  ;;  %v5532_v28 = vrot.slane %v9647_v52, 5  ;;  %v7649_v22 = vld [vmem:[%s9896_s3 + $0x110] sm:$0xff]  }
0x1ca6   : > { %v5465_v4 = vsel %vm1178_vm1, %v5462_v43, %v5464_v51  ;;  %v5467_v7 = vsel %vm1178_vm1, %v5464_v51, %v5466_v54  ;;  %v5499_v36 = vsel %vm1222_vm2, %v5496_v32, %v5498_v59  ;;  %v5501_v56 = vsel %vm1222_vm2, %v5498_v59, %v5500_v16 }
0x1ca7   : > { %v7476_v29 = vpack.i.bf16 %v5467_v7, %v5465_v4  ;;  %v5567_v11 = vsel %vm9901_vm14, %v5564_v15, %v5566_v61  ;;  %v5569_v14 = vsel %vm9902_vm12, %v5566_v61, %v5568_v62  ;;  %v7471_v1 = vpack.i.bf16 %v5501_v56, %v5499_v36 }
0x1ca8   : > { %v7486_v19 = vpack.i.bf16 %v5569_v14, %v5567_v11  ;;  %v5534_v6 = vrot.slane %v9650_v55, 5  ;;  %v7481_v47 = vpack.i.bf16 %v5531_v50, %v5529_v58  ;;  %v5533_v12 = vsel %vm1266_vm5, %v5530_v48, %v5532_v28  ;;  %v7652_v14 = vld [vmem:[%s9896_s3 + $0x108] sm:$0xff]  }
0x1ca9   : > { %7467 = vrot.lane.b32.xlu1 %v7466_v23, %s9870_s1  ;;  %7477 = vrot.lane.b32.xlu0 %v7476_v29, %s9870_s1  ;;  %v5484_v45 = vsel %vm1200_vm3, %v5481_v24, %v5483_v63  ;;  %v5549_v32 = vrot.slane %v9612_v18, 6  ;;  %v5548_v57 = vrot.slane %v9619_v41, 6  ;;  %v5485_v35 = vrot.slane %v9647_v52, 2 }
0x1caa   : > { %v5535_v8 = vsel %vm1266_vm5, %v5532_v28, %v5534_v6  ;;  %v5487_v30 = vrot.slane %v9650_v55, 2  ;;  %v5514_v0 = vrot.slane %v9619_v41, 4  ;;  %v5515_v4 = vrot.slane %v9612_v18, 4 }
0x1cab   : > { %v7491_v46 = vpack.i.bf16 %v5535_v8, %v5533_v12  ;;  %v5550_v59 = vsel %vm1161_vm0, %v5548_v57, %v5549_v32  ;;  %v5552_v16 = vsel %vm1161_vm0, %v5549_v32, %v5551_v34  ;;  %v5517_v48 = vrot.slane %v9630_v49, 4 }
0x1cac   : > { %v5553_v27 = vrot.slane %v9647_v52, 6  ;;  %v5555_v5 = vrot.slane %v9650_v55, 6  ;;  %v5486_v11 = vsel %vm1200_vm3, %v5483_v63, %v5485_v35  ;;  %v5516_v28 = vsel %vm1244_vm4, %v5514_v0, %v5515_v4  ;;  %v7653_v63 = vld [vmem:[%s9896_s3 + $0x100] sm:$0xff]   ;;  %s6193_s3 = scalar_lea.sflag [#allocation3], %s1145_s12 }
0x1cad   : > { %7472 = vrot.lane.b32.xlu1 %v7471_v1, %s9870_s1  ;;  %7487 = vrot.lane.b32.xlu0 %v7486_v19, %s9870_s1  ;;  %v5521_v32 = vrot.slane %v9650_v55, 4  ;;  %vm6190_vm1 = vcmask 16384  }
0x1cae   : > { %v5556_v24 = vsel %vm1161_vm0, %v5553_v27, %v5555_v5 }
0x1cb1   : > { %7482 = vrot.lane.b32.xlu1 %v7481_v47, %s9870_s1  ;;  %v5554_v47 = vsel %vm1161_vm0, %v5551_v34, %v5553_v27  ;;  %vm7942_vm0 = vmmov 0  }
0x1cb5   : > { %7492 = vrot.lane.b32.xlu1 %v7491_v46, %s9870_s1  ;;  %s9903_s1 = sld [smem:[#allocation30_spill]] }
0x1d17   : > { %v7458_v42 = vpop.permute.xlu1 %7457  ;;  %v7463_v13 = vpop.permute.xlu0 %7462 }
0x1d18   : > { %v7460_v44 = vunpack.i.h.bf16 %v7458_v42  ;;  %v7459_v10 = vunpack.i.l.bf16 %v7458_v42  ;;  %v7465_v21 = vunpack.i.h.bf16 %v7463_v13  ;;  %v7464_v17 = vunpack.i.l.bf16 %v7463_v13 }
0x1d19   : > { %v5518_v42 = vsel %vm1244_vm4, %v5515_v4, %v5517_v48  ;;  %v5602_v13 = vpack.c.bf16 %v9630_v49, %v9612_v18 }
0x1d1a   : > { %v5583_v43 = vsel %vm1885_vm11, %v9612_v18, %v7465_v21  ;;  %v5582_v15 = vsel %vm1885_vm11, %v9619_v41, %v7464_v17  ;;  %v5586_v9 = vsel %vm1885_vm11, %v5482_v3, %v7459_v10  ;;  %v5587_v53 = vsel %vm1885_vm11, %v5484_v45, %v7460_v44 }
0x1d1b   : > { %v5598_v20 = vpack.c.bf16 %v5583_v43, %v5582_v15  ;;  %v7468_v31 = vpop.permute.xlu1 %7467  ;;  %v7478_v37 = vpop.permute.xlu0 %7477  ;;  %v5599_v26 = vpack.c.bf16 %v5587_v53, %v5586_v9  ;;  %v5488_v41 = vsel %vm1200_vm3, %v5485_v35, %v5487_v30  ;;  %v5519_v45 = vrot.slane %v9647_v52, 4  ;;  %v6475_v30 = vld [vmem:[%s9904_s8] ss:$0 sm:$0xff]  ;;  %s6205_s8 = sshll.u32 %s1146_s9, 4  ;;  %s9766_s8 = int_to_ptr.vmem [resolvable:$true] %s6205_s8 }
0x1d1c   : > { %v7470_v60 = vunpack.i.h.bf16 %v7468_v31  ;;  %v7469_v40 = vunpack.i.l.bf16 %v7468_v31  ;;  %v7480_v51 = vunpack.i.h.bf16 %v7478_v37  ;;  %v7479_v54 = vunpack.i.l.bf16 %v7478_v37  ;;  %v7654_v37 = vld [vmem:[%s9903_s1 + $0x8] sm:$0xff]   ;;  %s7817_s5 = scalar_lea.vmem %s9766_s8, 16 }
0x1d1d   : > { %5941 = vmatprep.mubr.bf16.mxu0 %v5599_v26  ;;  %v5520_v43 = vsel %vm1244_vm4, %v5517_v48, %v5519_v45  ;;  %v5522_v15 = vsel %vm1244_vm4, %v5519_v45, %v5521_v32  ;;  %v5607_v9 = vpack.c.bf16 %v9650_v55, %v9647_v52  ;;  %v7655_v26 = vld [vmem:[%s9903_s1] sm:$0xff]   ;;  %s9764_s1 = scalar_lea.hbm %s8142_s6, %s6519_s23  ;;  %p7818_p11 = scmp.ne.s32.totalorder %s9766_s8, %s7817_s5 }
0x1d1e   : > { %5942 = vmatmul.mubr.bf16.vlgmr.msra.gmra.mxu0 %v5598_v20  ;;  %v5594_v61 = vsel %vm1885_vm11, %v5550_v59, %v7469_v40  ;;  %v5595_v62 = vsel %vm1885_vm11, %v5552_v16, %v7470_v60  ;;  %v5585_v19 = vsel %vm1885_vm11, %v9647_v52, %v7480_v51 }
0x1d1f   : > { %v7473_v7 = vpop.permute.xlu1 %7472  ;;  %v7488_v23 = vpop.permute.xlu0 %7487  ;;  %6942 = vmatpush3.bf16.msra.mxu0 %v9627_v38  ;;  %v5601_v29 = vpack.c.bf16 %v5595_v62, %v5594_v61  ;;  %v5584_v38 = vsel %vm1885_vm11, %v9630_v49, %v7479_v54  ;;  %p7819_p12 = pnand %p7818_p11, %p8182_p5 }
0x1d20   : > { %v7475_v36 = vunpack.i.h.bf16 %v7473_v7  ;;  %v7474_v56 = vunpack.i.l.bf16 %v7473_v7  ;;  %6943 = vmatprep.subr.bf16.mxu0 %v7649_v22  ;;  %v7490_v25 = vunpack.i.h.bf16 %v7488_v23  ;;  %v7489_v1 = vunpack.i.l.bf16 %v7488_v23 }
0x1d21   : > { %5990 = vmatprep.mubr.bf16.mxu1 %v5601_v29  ;;  %v5603_v46 = vpack.c.bf16 %v5585_v19, %v5584_v38  ;;  %p7820_p13 = pneg %p7819_p12 }
0x1d22   : > { %v5588_v33 = vsel %vm1885_vm11, %v5486_v11, %v7474_v56  ;;  %v5589_v50 = vsel %vm1885_vm11, %v5488_v41, %v7475_v36  ;;  %v5596_v39 = vsel %vm1885_vm11, %v5554_v47, %v7489_v1  ;;  %v5597_v44 = vsel %vm1885_vm11, %v5556_v24, %v7490_v25 }
0x1d23   : > { %v7483_v6 = vpop.permute.xlu1 %7482  ;;  %6944 = vmatpush3.bf16.msra.mxu0 %v7649_v22  ;;  %v5604_v58 = vpack.c.bf16 %v5589_v50, %v5588_v33  ;;  %v5606_v49 = vpack.c.bf16 %v5597_v44, %v5596_v39 }
0x1d24   : > { %v7485_v12 = vunpack.i.h.bf16 %v7483_v6  ;;  %v7484_v8 = vunpack.i.l.bf16 %v7483_v6  ;;  %6945 = vmatprep.subr.bf16.mxu0 %v7652_v14 }
0x1d25   : > { %5949 = vmatprep.mubr.bf16.mxu0 %v5604_v58 }
0x1d26   : > { %v5591_v10 = vsel %vm1885_vm11, %v5518_v42, %v7485_v12  ;;  %v5590_v21 = vsel %vm1885_vm11, %v5516_v28, %v7484_v8  ;;  %5950 = vmatmul.mubr.bf16.gmra.mxu0 %v5603_v46 }
0x1d27   : > { %v5600_v17 = vpack.c.bf16 %v5591_v10, %v5590_v21  ;;  %v7493_v3 = vpop.permute.xlu1 %7492  ;;  %6946 = vmatpush3.bf16.msra.mxu0 %v7652_v14  ;;  %6949 = vmatprep.mubr.msk.bf16.mxu0 %vm1885_vm11, %v5602_v13 }
0x1d28   : > { %v7495_v34 = vunpack.i.h.bf16 %v7493_v3  ;;  %v7494_v18 = vunpack.i.l.bf16 %v7493_v3  ;;  %6947 = vmatprep.subr.bf16.mxu0 %v7653_v63 }
0x1d29   : > { %5991 = vmatmul.mubr.bf16.vlgmr.msra.gmra.mxu1 %v5600_v17 }
0x1d2a   : > { %5998 = vmatprep.mubr.bf16.mxu1 %v5606_v49  ;;  %v5592_v53 = vsel %vm1885_vm11, %v5520_v43, %v7494_v18  ;;  %v5593_v20 = vsel %vm1885_vm11, %v5522_v15, %v7495_v34 }
0x1d2b   : > { %6948 = vmatpush3.bf16.msra.mxu0 %v7653_v63  ;;  %v5605_v31 = vpack.c.bf16 %v5593_v20, %v5592_v53 }
0x1d2c   : > { %6953 = vmatprep.subr.bf16.mxu0 %v7917_v2 }
0x1d2e   : > { %6950 = vmatmul.mubr.msk.bf16.vlgmr.msra.gmra.mxu0 %vm1885_vm11, %v5607_v9 }
0x1d2f   : > { %6957 = vmatprep.mubr.msk.bf16.mxu0 %vm7942_vm0, %v7917_v2  ;;  %6954 = vmatpush3.bf16.msra.mxu0 %v7654_v37  ;;  %v6080_v37 = vld [vmem:[%s8127_s20] sm:$0x1] }
0x1d30   : > { %6955 = vmatprep.subr.bf16.mxu0 %v7917_v2 }
0x1d31   : > { %5999 = vmatmul.mubr.bf16.gmra.mxu1 %v5605_v31  ;;  %v7656_v31 = vld [vmem:[%s8132_s30] sm:$0xff]  }
0x1d33   : > { %6956 = vmatpush3.bf16.msra.mxu0 %v7655_v26 }
0x1d34   : > { %6961 = vmatprep.subr.bf16.mxu0 %v7917_v2 }
0x1dde   : > { %v6712_v52 = vpop.f32.mrf.mxu0 }
0x1de0   : > { %v6713_v55 = vpop.f32.mrf.mxu0 }
0x1de1   : > { %v6714_v22 = vadd.f32 %v6713_v55, %v6712_v52 }
0x1de2   : > { %v6715_v57 = vpop.f32.mrf.mxu0 }
0x1de3   : > { %v5944_v16 = vadd.f32 %v6714_v22, %v6475_v30 }
0x1de4   : > { %v6716_v60 = vpop.f32.mrf.mxu0 }
0x1de5   : > { %v6717_v61 = vadd.f32 %v6716_v60, %v6715_v57 }
0x1de6   : > { %v6718_v40 = vpop.f32.mrf.mxu0 }
0x1de7   : > { %v5947_v48 = vadd.f32 %v6717_v61, %v6475_v30 }
0x1de8   : > { %v6719_v35 = vpop.f32.mrf.mxu0 }
0x1de9   : > { %v6740_v51 = vpop.f32.mrf.mxu1  ;;  %v6720_v27 = vadd.f32 %v6719_v35, %v6718_v40  ;;  %v6140_v35 = vld [vmem:[%s9905_s4] sm:$0x1]  ;;  %s7821_s4 = sshll.u32 %s7943_s0, 4  ;;  %s7822_s4 = int_to_ptr.vmem [resolvable:$false] %s7821_s4 }
0x1dea   : > { %v6721_v54 = vpop.f32.mrf.mxu0  ;;  %s7823_s11 = scalar_lea.vmem %s7822_s4, 32  ;;  %p7824_p0 = scmp.lt.s32.totalorder %s9766_s8, %s7822_s4 }
0x1deb   : > { %v6741_v59 = vpop.f32.mrf.mxu1  ;;  %v5952_v1 = vadd.f32 %v6720_v27, %v6475_v30  ;;  %p7825_p1 = scmp.lt.s32.totalorder %s7823_s11, %s7817_s5 }
0x1dec   : > { %v6742_v62 = vadd.f32 %v6741_v59, %v6740_v51  ;;  %v6722_v0 = vpop.f32.mrf.mxu0 }
0x1ded   : > { %v6743_v4 = vpop.f32.mrf.mxu1  ;;  %v6723_v38 = vadd.f32 %v6722_v0, %v6721_v54  ;;  %p7826_p2 = por %p7825_p1, %p7824_p0 }
0x1dee   : > { %v6951_v7 = vpop.f32.mrf.mxu0  ;;  %v5993_v23 = vadd.f32 %v6742_v62, %v5944_v16 }
0x1def   : > { %v6744_v29 = vpop.f32.mrf.mxu1  ;;  %v5955_v8 = vadd.f32 %v6723_v38, %v6475_v30  ;;  %p7827_p3 = pnand %p7826_p2, %p7820_p13 }
0x1df0   : > { %v6745_v5 = vadd.f32 %v6744_v29, %v6743_v4  ;;  %v6041_v36 = vpop.f32.mrf.mxu0 }
0x1df1   : > { %v6746_v56 = vpop.f32.mrf.mxu1  ;;  %v6042_v11 = vadd.f32 %v6041_v36, %v5993_v23 }
0x1df2   : > { %v6952_v41 = vpop.f32.mrf.mxu0  ;;  %v5996_v14 = vadd.f32 %v6745_v5, %v5947_v48 }
0x1df3   : > { %v6747_v25 = vpop.f32.mrf.mxu1  ;;  %v6056_v6 = vmax.f32 %v6042_v11, 0.0 }
0x1df4   : > { %v6748_v19 = vadd.f32 %v6747_v25, %v6746_v56  ;;  %v6044_v33 = vpop.f32.mrf.mxu0 }
0x1df5   : > { %v6045_v50 = vadd.f32 %v6044_v33, %v5996_v14  ;;  %v6749_v28 = vpop.f32.mrf.mxu1  ;;  %v6060_v42 = vsel %vm1875_vm9, %v6056_v6, 0.0 }
0x1df6   : > { %v6001_v58 = vadd.f32 %v6748_v19, %v5952_v1 }
0x1df7   : > { %v6057_v47 = vmax.f32 %v6045_v50, 0.0  ;;  %v6750_v12 = vpop.f32.mrf.mxu1 }
0x1df8   : > { %v6050_v46 = vadd.f32 %v6951_v7, %v6001_v58  ;;  %v6751_v24 = vadd.f32 %v6750_v12, %v6749_v28 }
0x1df9   : > { %v6061_v63 = vsel %vm1875_vm9, %v6057_v47, 0.0 }
0x1dfa   : > { %v6058_v13 = vmax.f32 %v6050_v46, 0.0  ;;  %v6004_v39 = vadd.f32 %v6751_v24, %v5955_v8  ;;  %v6062_v44 = vadd.f32 %v6061_v63, %v6060_v42 }
0x1dfc   : > { %v6063_v10 = vsel %vm1875_vm9, %v6058_v13, 0.0  ;;  %v6053_v21 = vadd.f32 %v6952_v41, %v6004_v39 }
0x1dfd   : > { %v6064_v3 = vadd.f32 %v6063_v10, %v6062_v44 }
0x1dfe   : > { %v6059_v17 = vmax.f32 %v6053_v21, 0.0 }
0x1e00   : > { %v6065_v45 = vsel %vm1875_vm9, %v6059_v17, 0.0 }
0x1e01   : > { %v6066_v32 = vadd.f32 %v6065_v45, %v6064_v3 }
0x1e03   : > { %v6067_v34 = vrot.slane %v6066_v32, 4 }
0x1e05   : > { %v6068_v18 = vadd.f32 %v6067_v34, %v6066_v32 }
0x1e07   : > { %v6069_v49 = vrot.slane %v6068_v18, 2 }
0x1e09   : > { %v6070_v43 = vadd.f32 %v6069_v49, %v6068_v18 }
0x1e0b   : > { %v6071_v15 = vrot.slane %v6070_v43, 1 }
0x1e0d   : > { %v6072_v9 = vadd.f32 %v6071_v15, %v6070_v43 }
0x1e0f   : > { %v6074_v53 = vmul.f32 0.03125, %v6072_v9 }
0x1e11   : > { %v6075_v20 = vpack.c.bf16 %v6074_v53, %v6074_v53 }
0x1e13   : > { %6958 = vmatmul.mubr.msk.bf16.vlgmr.msra.gmra.mxu0 %vm1875_vm9, %v6075_v20 }
0x1e14   : > { %6963 = vmatprep.mubr.msk.bf16.mxu0 %vm7942_vm0, %v7917_v2  ;;  %6962 = vmatpush3.bf16.msra.mxu0 %v7656_v31 }
0x1ed3   : > { %v6130_v26 = vpop.f32.mrf.mxu0 }
0x1ed4   : > { %v6131_v52 = vadd.f32 %v6130_v26, %v6080_v37 }
0x1ed5   : > { %v6959_v55 = vpop.f32.mrf.mxu0 }
0x1ed6   : > { %v6136_v57 = vmax.f32 %v6131_v52, 0.0 }
0x1ed7   : > { %v6133_v60 = vpop.f32.mrf.mxu0 }
0x1ed8   : > { %v6137_v40 = vpack.c.bf16 %v6136_v57, %v6136_v57 }
0x1ed9   : > { %v6960_v22 = vpop.f32.mrf.mxu0 }
0x1eda   : > { %6964 = vmatmul.mubr.msk.bf16.vlgmr.msra.gmra.mxu0 %vm1870_vm6, %v6137_v40 }
0x1f9a   : > { %v6184_v2 = vpop.f32.mrf.mxu0 }
0x1f9b   : > { %v6185_v30 = vadd.f32 %v6184_v2, %v6140_v35 }
0x1f9c   : > { %v6965_v51 = vpop.f32.mrf.mxu0 }
0x1f9d   : > { %6191 = vst.msk [vmem:[%s1146_s9] sm:$0x1] %vm6190_vm1, %v6185_v30 }
0x1f9e   : > { %v6187_v54 = vpop.f32.mrf.mxu0 }
0x1f9f   : > { %7830 = shalt.err (!%p7827_p3)
}
0x1fa0   : > { %s7831_s12 = scalar_lea.hbm %s9764_s1, 16  ;;  %s7835_s23 = scalar_lea.hbm %s8142_s6, 32 }
0x1fa1   : > { %p7832_p4 = scmp.ne.s32.totalorder %s9764_s1, %s7831_s12  ;;  %p7836_p9 = scmp.lt.s32.totalorder %s9764_s1, %s8142_s6 }
0x1fa2   : > { %p7837_p10 = scmp.lt.s32.totalorder %s7835_s23, %s7831_s12 }
0x1fa3   : > { %p7833_p7 = pnand %p7832_p4, %p8182_p5 }
0x1fa4   : > { %p7838_p11 = por %p7837_p10, %p7836_p9 }
0x1fa5   : > { %p7834_p8 = pneg %p7833_p7 }
0x1fa7   : > { %p7839_p12 = pnand %p7838_p11, %p7834_p8 }
0x1fa9   : > { %7842 = shalt.err (!%p7839_p12)
}
0x1faa   : > { %6983 = dma.vmem_to_hbm [thread:$0]  (%p8182_p5), %s9766_s8, 16, %s9764_s1, %s6193_s3   ;;  %v6966_v59 = vpop.f32.mrf.mxu0 }
0x1fab PF: > { %p6989_p13 = scmp.ge.s32.totalorder %s7877_s22, 2  ;;  %s6217_s4 = sand.u32 1, %s7865_s15  }
0x1fac   : > { %s6218_s5 = scalar_lea.sflag [#allocation3], %s6217_s4 }
0x1fad   : > { %p6986_p0 = pnand %p6989_p13, %p8186_p6 }
0x1faf   : > { %p6987_p1 = pneg %p6986_p0 }
0x1fb1   : > { %7860 = dma.done.wait (%p6987_p1), %s6218_s5, 16  }
0x1fb2   : > { %7862 = vsyncadd (%p6987_p1), %s6218_s5, 4294967280  ;;  %p87_p2 = scmp.ge.s32.totalorder %s8169_s26, 4   ;;  %s9906_s15 = smov %s7869_s16 }
0x1fb3   : > { %s9907_s16 = smov %s7873_s18  ;;  %s9908_s18 = smov %s8180_s2 }
0x1fb4   : > { %s9909_s22 = smov %s8169_s26  ;;  %89 = sbr.rel (!%p87_p2) target bundleno = 78 (0x4e), region = 245 }
0x1fb9   :  { %6222 = vsyncpa [#allocation3], 1 }
0x1fba   :  { %6224 = vsyncpa [#allocation3 + $0x1], 1 }

</bundles_post_ra>
